<compile_context>
chip_gen: v6e
topology: v6e:2x2x1
jax: 0.10.0
libtpu: 0.0.40
codegen_flags: <defaults>
</compile_context>

<pallas_src>
import functools

import jax
import jax.numpy as jnp
from jax.experimental import pallas as pl
from jax.experimental.pallas import tpu as pltpu


# ---------------------------------------------------------------------------
# Fused forward kernel: one grid step == TB images.
# ---------------------------------------------------------------------------
def _net_kernel(xf_ref, w1_ref, b1_ref, w2_ref, b2_ref,
                wf1_ref, bf1_ref, wf2_ref, bf2_ref, wf3_ref, bf3_ref,
                out_ref, y1buf, p1buf, y2buf, fbuf, *, tb):
    f32 = jnp.float32
    bf16 = jnp.bfloat16

    def dot(a, b):
        return jnp.dot(a, b, preferred_element_type=f32)

    def shift_lanes(x, s):
        # y[:, l] = x[:, l - s] for l >= s, zeros below.  The sources' high
        # lanes are exactly zero, so summing shifted copies builds an
        # interleaved lane layout without masks.
        if s == 0:
            return x
        z = jnp.zeros((x.shape[0], s), x.dtype)
        return jnp.concatenate([z, x[:, :x.shape[1] - s]], axis=1)

    # 0/1 selection matrices for pool2's stride-2 width compaction, hoisted out
    # of the per-image loop (exact in bf16).
    rr = jax.lax.broadcasted_iota(jnp.int32, (8, 16), 0)
    cc = jax.lax.broadcasted_iota(jnp.int32, (8, 16), 1)
    se2 = jnp.logical_and(cc == 2 * rr, rr < 5).astype(bf16)
    so2 = jnp.logical_and(cc == 2 * rr + 1, rr < 5).astype(bf16)

    # conv1 never writes y1buf rows 896..903, but pool1's +j shifted reads for
    # the last pooled row touch them -> keep them at zero (finite).
    y1buf[896:904, :] = jnp.zeros((8, 128), f32)

    @pl.loop(0, tb)
    def _per_image(bi):
        # ---- conv1 (5x5, 3->6) + ReLU --------------------------------------
        # xf row r = h*32 + (wo%2)*16 + wo//2 carries all 75 taps of output
        # (h, wo) in its lanes -> conv1 is one [224,80]@[80,128] dot per chunk.
        for q in range(4):
            r0 = q * 224
            acc = dot(xf_ref[bi, r0:r0 + 224, :], w1_ref[...])
            y1buf[r0:r0 + 224, :] = jnp.maximum(acc + b1_ref[...], 0.0)

        # ---- pool1 (2x2/2) fused with the conv2 (kw x cin) tap interleave ---
        # Width parity-split rows make the 2x2 max four contiguous, 16-aligned
        # slices.  p1buf[h*16+w, 6j+ci] = pooled1[h, w+j, ci].
        for po in range(14):
            r0 = 64 * po
            pm = jnp.maximum(
                jnp.maximum(y1buf[r0:r0 + 20, :], y1buf[r0 + 16:r0 + 36, :]),
                jnp.maximum(y1buf[r0 + 32:r0 + 52, :], y1buf[r0 + 48:r0 + 68, :]))
            acc = pm[0:16, :]
            for j in range(1, 5):
                acc = acc + shift_lanes(pm[j:j + 16, :], 6 * j)
            p1buf[po * 16:(po + 1) * 16, :] = acc[:, :32]

        # ---- conv2 (5x5, 6->16) + ReLU: 5 accumulated [160,32]@[32,128] dots -
        acc2 = dot(p1buf[0:160, :].astype(bf16), w2_ref[0])
        for i in range(1, 5):
            acc2 = acc2 + dot(p1buf[i * 16:i * 16 + 160, :].astype(bf16), w2_ref[i])
        y2buf[...] = jnp.maximum(acc2 + b2_ref[...], 0.0)

        # ---- pool2 (2x2/2) + flatten into one lane-dense [1, 640] feature row
        rows = []
        for p in range(5):
            m2 = jnp.maximum(y2buf[32 * p:32 * p + 16, :],
                             y2buf[32 * p + 16:32 * p + 32, :]).astype(bf16)
            pq = jnp.maximum(dot(se2, m2), dot(so2, m2))   # rows 0..4 = widths
            rowp = pq[0:1, :]
            for qq in range(1, 5):
                rowp = rowp + shift_lanes(pq[qq:qq + 1, :], 16 * qq)
            rows.append(rowp)                              # lanes q*16+c real
        fbuf[bi] = jnp.concatenate(rows, axis=1)           # [1, 640]

    # ---- fully connected head on the whole batch tile (M = TB) --------------
    feats = fbuf[...].reshape(tb, 640).astype(bf16)
    h1 = jnp.maximum(dot(feats, wf1_ref[...]) + bf1_ref[...], 0.0)
    h2 = jnp.maximum(dot(h1.astype(bf16), wf2_ref[...]) + bf2_ref[...], 0.0)
    out_ref[...] = dot(h2.astype(bf16), wf3_ref[...]) + bf3_ref[...]


# ---------------------------------------------------------------------------
# Wrapper-side (one-time) layout plumbing
# ---------------------------------------------------------------------------
def _prep_input(x_nchw):
    """NCHW image -> [B, 896, 80] bf16 im2col slab.

    Row r = h*32 + (wo % 2)*16 + wo//2 (width parity-split so pooling reads are
    contiguous aligned slices); lane l = i*15 + j*3 + ci holds x[h+i, wo+j, ci]
    (all 25 conv1 taps pre-gathered, zero-padded 75 -> 80, wo 28 -> 32)."""
    x = jnp.transpose(x_nchw, (0, 2, 3, 1))                     # [B,32,32,3]
    taps = [x[:, i:i + 28, j:j + 28, :] for i in range(5) for j in range(5)]
    xf = jnp.concatenate(taps, axis=-1)                         # [B,28,28,75]
    xf = jnp.pad(xf, ((0, 0), (0, 0), (0, 4), (0, 5)))          # [B,28,32,80]
    b = xf.shape[0]
    xf = xf.reshape(b, 28, 16, 2, 80).transpose(0, 1, 3, 2, 4)  # [B,h,par,u,80]
    return xf.reshape(b, 28 * 32, 80).astype(jnp.bfloat16)


def pack_params(p):
    """Repack PyTorch-layout parameters into de-padded, bf16, lane-dense operands."""
    f32, bf16 = jnp.float32, jnp.bfloat16
    # conv1: (cout,cin,kh,kw) -> [kh*kw*cin, cout] -> [80, 128]
    w1 = jnp.transpose(p["conv1_w"], (2, 3, 1, 0)).reshape(75, 6)
    w1p = jnp.zeros((80, 128), f32).at[:75, :6].set(w1).astype(bf16)
    b1p = jnp.zeros((1, 128), f32).at[0, :6].set(p["conv1_b"])
    # conv2: (cout,cin,kh,kw) -> [kh, kw*cin, cout] -> [5, 32, 128]
    w2 = jnp.transpose(p["conv2_w"], (2, 3, 1, 0)).reshape(5, 30, 16)
    w2p = jnp.zeros((5, 32, 128), f32).at[:, :30, :16].set(w2).astype(bf16)
    b2p = jnp.zeros((1, 128), f32).at[0, :16].set(p["conv2_b"])
    # fc1: fold the NCHW flatten (idx = c*25 + h*5 + w) into the packing so the
    # kernel's (h, w*16+c) feature lanes hit the right rows: [640, 128].
    wf1 = jnp.transpose(p["fc1_w"].reshape(120, 16, 5, 5), (2, 3, 1, 0)).reshape(5, 80, 120)
    wf1p = (jnp.zeros((5, 128, 128), f32).at[:, :80, :120].set(wf1)
            .reshape(640, 128).astype(bf16))
    bf1p = jnp.zeros((1, 128), f32).at[0, :120].set(p["fc1_b"])
    wf2p = jnp.zeros((128, 128), f32).at[:120, :84].set(p["fc2_w"].T).astype(bf16)
    bf2p = jnp.zeros((1, 128), f32).at[0, :84].set(p["fc2_b"])
    wf3p = jnp.zeros((128, 128), f32).at[:84, :10].set(p["fc3_w"].T).astype(bf16)
    bf3p = jnp.zeros((1, 128), f32).at[0, :10].set(p["fc3_b"])
    return (w1p, b1p, w2p, b2p, wf1p, bf1p, wf2p, bf2p, wf3p, bf3p)


def net_forward_pallas(x_nchw, packed, tb=8):
    (w1p, b1p, w2p, b2p, wf1p, bf1p, wf2p, bf2p, wf3p, bf3p) = packed
    b = x_nchw.shape[0]
    bp = ((b + tb - 1) // tb) * tb
    xf = _prep_input(x_nchw)
    if bp != b:
        xf = jnp.pad(xf, ((0, bp - b), (0, 0), (0, 0)))

    const2 = lambda g: (0, 0)
    const3 = lambda g: (0, 0, 0)
    out = pl.pallas_call(
        functools.partial(_net_kernel, tb=tb),
        grid=(bp // tb,),
        in_specs=[
            pl.BlockSpec((tb, 896, 80), lambda g: (g, 0, 0)),   # im2col input
            pl.BlockSpec((80, 128), const2),                    # conv1 w
            pl.BlockSpec((1, 128), const2),                     # conv1 b
            pl.BlockSpec((5, 32, 128), const3),                 # conv2 w
            pl.BlockSpec((1, 128), const2),                     # conv2 b
            pl.BlockSpec((640, 128), const2),                   # fc1 w
            pl.BlockSpec((1, 128), const2),                     # fc1 b
            pl.BlockSpec((128, 128), const2),                   # fc2 w
            pl.BlockSpec((1, 128), const2),                     # fc2 b
            pl.BlockSpec((128, 128), const2),                   # fc3 w
            pl.BlockSpec((1, 128), const2),                     # fc3 b
        ],
        out_specs=pl.BlockSpec((tb, 128), lambda g: (g, 0)),
        out_shape=jax.ShapeDtypeStruct((bp, 128), jnp.float32),
        scratch_shapes=[
            pltpu.VMEM((904, 128), jnp.float32),    # conv1 out (28x32 rows + pad)
            pltpu.VMEM((224, 32), jnp.float32),     # pooled1, conv2 taps in lanes
            pltpu.VMEM((160, 128), jnp.float32),    # conv2 out (10x16 rows)
            pltpu.VMEM((tb, 1, 640), jnp.float32),  # per-image fc features
        ],
        compiler_params=pltpu.CompilerParams(
            dimension_semantics=("parallel",)),     # tiles across v7x's 2 TCs
    )(xf, w1p, b1p, w2p, b2p, wf1p, bf1p, wf2p, bf2p, wf3p, bf3p)
    return out[:b, :10]                             # drop batch/lane padding


# ---------------------------------------------------------------------------
# Pure-JAX reference (independent of the packing) for a correctness check
# ---------------------------------------------------------------------------
def net_forward_reference(x_nchw, p):
    hi = jax.lax.Precision.HIGHEST
    y = jax.lax.conv_general_dilated(
        x_nchw, p["conv1_w"], (1, 1), "VALID",
        dimension_numbers=("NCHW", "OIHW", "NCHW"), precision=hi)
    y = jnp.maximum(y + p["conv1_b"][None, :, None, None], 0.0)
    y = jax.lax.reduce_window(y, -jnp.inf, jax.lax.max,
                              (1, 1, 2, 2), (1, 1, 2, 2), "VALID")
    y = jax.lax.conv_general_dilated(
        y, p["conv2_w"], (1, 1), "VALID",
        dimension_numbers=("NCHW", "OIHW", "NCHW"), precision=hi)
    y = jnp.maximum(y + p["conv2_b"][None, :, None, None], 0.0)
    y = jax.lax.reduce_window(y, -jnp.inf, jax.lax.max,
                              (1, 1, 2, 2), (1, 1, 2, 2), "VALID")
    y = y.reshape(y.shape[0], 16 * 5 * 5)                 # PyTorch view(-1,400)
    y = jnp.maximum(jnp.dot(y, p["fc1_w"].T, precision=hi) + p["fc1_b"], 0.0)
    y = jnp.maximum(jnp.dot(y, p["fc2_w"].T, precision=hi) + p["fc2_b"], 0.0)
    return jnp.dot(y, p["fc3_w"].T, precision=hi) + p["fc3_b"]


# ---------------------------------------------------------------------------
# Deterministic PyTorch-like init (uniform(-1/sqrt(fan_in), +1/sqrt(fan_in)))
# ---------------------------------------------------------------------------
def init_params(key):
    ks = jax.random.split(key, 10)

    def u(k, shape, fan_in):
        bound = 1.0 / (fan_in ** 0.5)
        return jax.random.uniform(k, shape, jnp.float32, -bound, bound)

    return {
        "conv1_w": u(ks[0], (6, 3, 5, 5), 75),    "conv1_b": u(ks[1], (6,), 75),
        "conv2_w": u(ks[2], (16, 6, 5, 5), 150),  "conv2_b": u(ks[3], (16,), 150),
        "fc1_w":   u(ks[4], (120, 400), 400),     "fc1_b":   u(ks[5], (120,), 400),
        "fc2_w":   u(ks[6], (84, 120), 120),      "fc2_b":   u(ks[7], (84,), 120),
        "fc3_w":   u(ks[8], (10, 84), 84),        "fc3_b":   u(ks[9], (10,), 84),
    }


if __name__ == "__main__":
    key = jax.random.PRNGKey(0)
    kx, kp = jax.random.split(key)

    # Spatial size is fixed by the module (16*5*5 flatten => 32x32 input).
    # B=10 with TB=8 exercises batch padding and a 2-step grid.
    x = jax.random.normal(kx, (10, 3, 32, 32), jnp.float32)   # NCHW, like PyTorch
    params = init_params(kp)
    packed = pack_params(params)

    fwd = jax.jit(net_forward_pallas, static_argnames=("tb",))
    out = jax.block_until_ready(fwd(x, packed))
    assert out.shape == (10, 10) and out.dtype == jnp.float32

    ref = net_forward_reference(x, params)
    # bf16 matmul operands -> relaxed tolerance vs the f32 reference.
    assert jnp.allclose(out, ref, rtol=3e-2, atol=3e-2), (
        "mismatch vs JAX reference, max abs err = "
        f"{jnp.max(jnp.abs(out - ref))}")

    print("KERNEL_OK")
</pallas_src>

<mosaic_0001>
module attributes {stable_mosaic.version = 11 : i64} {
  func.func @_net_kernel(%arg0: i32, %arg1: memref<8x896x80xbf16, #tpu.memory_space<vmem>>, %arg2: memref<80x128xbf16, #tpu.memory_space<vmem>>, %arg3: memref<1x128xf32, #tpu.memory_space<vmem>>, %arg4: memref<5x32x128xbf16, #tpu.memory_space<vmem>>, %arg5: memref<1x128xf32, #tpu.memory_space<vmem>>, %arg6: memref<640x128xbf16, #tpu.memory_space<vmem>>, %arg7: memref<1x128xf32, #tpu.memory_space<vmem>>, %arg8: memref<128x128xbf16, #tpu.memory_space<vmem>>, %arg9: memref<1x128xf32, #tpu.memory_space<vmem>>, %arg10: memref<128x128xbf16, #tpu.memory_space<vmem>>, %arg11: memref<1x128xf32, #tpu.memory_space<vmem>>, %arg12: memref<8x128xf32, #tpu.memory_space<vmem>>, %arg13: memref<904x128xf32, #tpu.memory_space<vmem>>, %arg14: memref<224x32xf32, #tpu.memory_space<vmem>>, %arg15: memref<160x128xf32, #tpu.memory_space<vmem>>, %arg16: memref<8x1x640xf32, #tpu.memory_space<vmem>>) attributes {dimension_semantics = [#tpu.dimension_semantics<parallel>], iteration_bounds = array<i64: 2>, scalar_prefetch = 0 : i64, scratch_operands = 4 : i64, tpu.core_type = #tpu.core_type<tc>, window_params = [{transform_indices = @transform_0, window_bounds = array<i64: 8, 896, 80>}, {pipeline_mode = #tpu.pipeline_mode<synchronous>, transform_indices = @transform_1, window_bounds = array<i64: 80, 128>}, {pipeline_mode = #tpu.pipeline_mode<synchronous>, transform_indices = @transform_2, window_bounds = array<i64: 1, 128>}, {pipeline_mode = #tpu.pipeline_mode<synchronous>, transform_indices = @transform_3, window_bounds = array<i64: 5, 32, 128>}, {pipeline_mode = #tpu.pipeline_mode<synchronous>, transform_indices = @transform_4, window_bounds = array<i64: 1, 128>}, {pipeline_mode = #tpu.pipeline_mode<synchronous>, transform_indices = @transform_5, window_bounds = array<i64: 640, 128>}, {pipeline_mode = #tpu.pipeline_mode<synchronous>, transform_indices = @transform_6, window_bounds = array<i64: 1, 128>}, {pipeline_mode = #tpu.pipeline_mode<synchronous>, transform_indices = @transform_7, window_bounds = array<i64: 128, 128>}, {pipeline_mode = #tpu.pipeline_mode<synchronous>, transform_indices = @transform_8, window_bounds = array<i64: 1, 128>}, {pipeline_mode = #tpu.pipeline_mode<synchronous>, transform_indices = @transform_9, window_bounds = array<i64: 128, 128>}, {pipeline_mode = #tpu.pipeline_mode<synchronous>, transform_indices = @transform_10, window_bounds = array<i64: 1, 128>}, {transform_indices = @transform_11, window_bounds = array<i64: 8, 128>}]} {
    %0 = tpu.iota {dimensions = array<i32: 0>} : vector<8x16xi32>
    %1 = tpu.iota {dimensions = array<i32: 1>} : vector<8x16xi32>
    %c2_i32 = arith.constant 2 : i32
    %2 = vector.broadcast %c2_i32 : i32 to vector<8x16xi32>
    %3 = arith.muli %2, %0 : vector<8x16xi32>
    %4 = arith.cmpi eq, %1, %3 : vector<8x16xi32>
    %c5_i32 = arith.constant 5 : i32
    %5 = vector.broadcast %c5_i32 : i32 to vector<8x16xi32>
    %6 = arith.cmpi slt, %0, %5 : vector<8x16xi32>
    %7 = arith.andi %4, %6 : vector<8x16xi1>
    %8 = arith.extui %7 : vector<8x16xi1> to vector<8x16xi32>
    %9 = arith.sitofp %8 : vector<8x16xi32> to vector<8x16xf32>
    %10 = arith.truncf %9 : vector<8x16xf32> to vector<8x16xbf16>
    %c2_i32_0 = arith.constant 2 : i32
    %11 = vector.broadcast %c2_i32_0 : i32 to vector<8x16xi32>
    %12 = arith.muli %11, %0 : vector<8x16xi32>
    %c1_i32 = arith.constant 1 : i32
    %13 = vector.broadcast %c1_i32 : i32 to vector<8x16xi32>
    %14 = arith.addi %12, %13 : vector<8x16xi32>
    %15 = arith.cmpi eq, %1, %14 : vector<8x16xi32>
    %c5_i32_1 = arith.constant 5 : i32
    %16 = vector.broadcast %c5_i32_1 : i32 to vector<8x16xi32>
    %17 = arith.cmpi slt, %0, %16 : vector<8x16xi32>
    %18 = arith.andi %15, %17 : vector<8x16xi1>
    %19 = arith.extui %18 : vector<8x16xi1> to vector<8x16xi32>
    %20 = arith.sitofp %19 : vector<8x16xi32> to vector<8x16xf32>
    %21 = arith.truncf %20 : vector<8x16xf32> to vector<8x16xbf16>
    %cst = arith.constant 0.000000e+00 : f32
    %22 = vector.broadcast %cst : f32 to vector<8x128xf32>
    %c896 = arith.constant 896 : index
    %c0 = arith.constant 0 : index
    %23 = vector.load %arg13[%c896, %c0] : memref<904x128xf32, #tpu.memory_space<vmem>>, vector<8x128xf32>
    tpu.vector_store %arg13[%c896, %c0], %22 {strides = array<i32>} : memref<904x128xf32, #tpu.memory_space<vmem>>, vector<8x128xf32>,
    %c0_i32 = arith.constant 0 : i32
    %c8_i32 = arith.constant 8 : i32
    %24 = arith.addi %c0_i32, %c8_i32 : i32
    %c1_i32_2 = arith.constant 1 : i32
    scf.for %arg17 = %c0_i32 to %24 step %c1_i32_2  : i32 {
      %c1_i32_26 = arith.constant 1 : i32
      %50 = arith.muli %arg17, %c1_i32_26 : i32
      %c0_i32_27 = arith.constant 0 : i32
      %51 = arith.addi %c0_i32_27, %50 : i32
      %52 = arith.index_cast %51 : i32 to index
      %c0_28 = arith.constant 0 : index
      %c0_29 = arith.constant 0 : index
      %53 = vector.load %arg1[%52, %c0_28, %c0_29] : memref<8x896x80xbf16, #tpu.memory_space<vmem>>, vector<1x224x80xbf16>
      %54 = vector.shape_cast %53 : vector<1x224x80xbf16> to vector<224x80xbf16>
      %c0_30 = arith.constant 0 : index
      %c0_31 = arith.constant 0 : index
      %55 = vector.load %arg2[%c0_30, %c0_31] : memref<80x128xbf16, #tpu.memory_space<vmem>>, vector<80x128xbf16>
      %cst_32 = arith.constant dense<0.000000e+00> : vector<224x128xf32>
      %56 = tpu.matmul %54, %55, %cst_32 {dimension_numbers = #tpu.dot_dimension_numbers<[1], [0], [0], [1], [0, 0, 1, 1], [], []>} : vector<224x80xbf16>, vector<80x128xbf16>, vector<224x128xf32> -> vector<224x128xf32>
      %c0_33 = arith.constant 0 : index
      %c0_34 = arith.constant 0 : index
      %57 = vector.load %arg3[%c0_33, %c0_34] : memref<1x128xf32, #tpu.memory_space<vmem>>, vector<1x128xf32>
      %58 = vector.broadcast %57 : vector<1x128xf32> to vector<224x128xf32>
      %59 = arith.addf %56, %58 : vector<224x128xf32>
      %cst_35 = arith.constant 0.000000e+00 : f32
      %60 = vector.broadcast %cst_35 : f32 to vector<224x128xf32>
      %61 = arith.maximumf %59, %60 : vector<224x128xf32>
      %c0_36 = arith.constant 0 : index
      %c0_37 = arith.constant 0 : index
      %62 = vector.load %arg13[%c0_36, %c0_37] : memref<904x128xf32, #tpu.memory_space<vmem>>, vector<224x128xf32>
      tpu.vector_store %arg13[%c0_36, %c0_37], %61 {strides = array<i32>} : memref<904x128xf32, #tpu.memory_space<vmem>>, vector<224x128xf32>,
      %63 = arith.index_cast %51 : i32 to index
      %c224 = arith.constant 224 : index
      %c0_38 = arith.constant 0 : index
      %64 = vector.load %arg1[%63, %c224, %c0_38] : memref<8x896x80xbf16, #tpu.memory_space<vmem>>, vector<1x224x80xbf16>
      %65 = vector.shape_cast %64 : vector<1x224x80xbf16> to vector<224x80xbf16>
      %c0_39 = arith.constant 0 : index
      %c0_40 = arith.constant 0 : index
      %66 = vector.load %arg2[%c0_39, %c0_40] : memref<80x128xbf16, #tpu.memory_space<vmem>>, vector<80x128xbf16>
      %cst_41 = arith.constant dense<0.000000e+00> : vector<224x128xf32>
      %67 = tpu.matmul %65, %66, %cst_41 {dimension_numbers = #tpu.dot_dimension_numbers<[1], [0], [0], [1], [0, 0, 1, 1], [], []>} : vector<224x80xbf16>, vector<80x128xbf16>, vector<224x128xf32> -> vector<224x128xf32>
      %c0_42 = arith.constant 0 : index
      %c0_43 = arith.constant 0 : index
      %68 = vector.load %arg3[%c0_42, %c0_43] : memref<1x128xf32, #tpu.memory_space<vmem>>, vector<1x128xf32>
      %69 = vector.broadcast %68 : vector<1x128xf32> to vector<224x128xf32>
      %70 = arith.addf %67, %69 : vector<224x128xf32>
      %cst_44 = arith.constant 0.000000e+00 : f32
      %71 = vector.broadcast %cst_44 : f32 to vector<224x128xf32>
      %72 = arith.maximumf %70, %71 : vector<224x128xf32>
      %c224_45 = arith.constant 224 : index
      %c0_46 = arith.constant 0 : index
      %73 = vector.load %arg13[%c224_45, %c0_46] : memref<904x128xf32, #tpu.memory_space<vmem>>, vector<224x128xf32>
      tpu.vector_store %arg13[%c224_45, %c0_46], %72 {strides = array<i32>} : memref<904x128xf32, #tpu.memory_space<vmem>>, vector<224x128xf32>,
      %74 = arith.index_cast %51 : i32 to index
      %c448 = arith.constant 448 : index
      %c0_47 = arith.constant 0 : index
      %75 = vector.load %arg1[%74, %c448, %c0_47] : memref<8x896x80xbf16, #tpu.memory_space<vmem>>, vector<1x224x80xbf16>
      %76 = vector.shape_cast %75 : vector<1x224x80xbf16> to vector<224x80xbf16>
      %c0_48 = arith.constant 0 : index
      %c0_49 = arith.constant 0 : index
      %77 = vector.load %arg2[%c0_48, %c0_49] : memref<80x128xbf16, #tpu.memory_space<vmem>>, vector<80x128xbf16>
      %cst_50 = arith.constant dense<0.000000e+00> : vector<224x128xf32>
      %78 = tpu.matmul %76, %77, %cst_50 {dimension_numbers = #tpu.dot_dimension_numbers<[1], [0], [0], [1], [0, 0, 1, 1], [], []>} : vector<224x80xbf16>, vector<80x128xbf16>, vector<224x128xf32> -> vector<224x128xf32>
      %c0_51 = arith.constant 0 : index
      %c0_52 = arith.constant 0 : index
      %79 = vector.load %arg3[%c0_51, %c0_52] : memref<1x128xf32, #tpu.memory_space<vmem>>, vector<1x128xf32>
      %80 = vector.broadcast %79 : vector<1x128xf32> to vector<224x128xf32>
      %81 = arith.addf %78, %80 : vector<224x128xf32>
      %cst_53 = arith.constant 0.000000e+00 : f32
      %82 = vector.broadcast %cst_53 : f32 to vector<224x128xf32>
      %83 = arith.maximumf %81, %82 : vector<224x128xf32>
      %c448_54 = arith.constant 448 : index
      %c0_55 = arith.constant 0 : index
      %84 = vector.load %arg13[%c448_54, %c0_55] : memref<904x128xf32, #tpu.memory_space<vmem>>, vector<224x128xf32>
      tpu.vector_store %arg13[%c448_54, %c0_55], %83 {strides = array<i32>} : memref<904x128xf32, #tpu.memory_space<vmem>>, vector<224x128xf32>,
      %85 = arith.index_cast %51 : i32 to index
      %c672 = arith.constant 672 : index
      %c0_56 = arith.constant 0 : index
      %86 = vector.load %arg1[%85, %c672, %c0_56] : memref<8x896x80xbf16, #tpu.memory_space<vmem>>, vector<1x224x80xbf16>
      %87 = vector.shape_cast %86 : vector<1x224x80xbf16> to vector<224x80xbf16>
      %c0_57 = arith.constant 0 : index
      %c0_58 = arith.constant 0 : index
      %88 = vector.load %arg2[%c0_57, %c0_58] : memref<80x128xbf16, #tpu.memory_space<vmem>>, vector<80x128xbf16>
      %cst_59 = arith.constant dense<0.000000e+00> : vector<224x128xf32>
      %89 = tpu.matmul %87, %88, %cst_59 {dimension_numbers = #tpu.dot_dimension_numbers<[1], [0], [0], [1], [0, 0, 1, 1], [], []>} : vector<224x80xbf16>, vector<80x128xbf16>, vector<224x128xf32> -> vector<224x128xf32>
      %c0_60 = arith.constant 0 : index
      %c0_61 = arith.constant 0 : index
      %90 = vector.load %arg3[%c0_60, %c0_61] : memref<1x128xf32, #tpu.memory_space<vmem>>, vector<1x128xf32>
      %91 = vector.broadcast %90 : vector<1x128xf32> to vector<224x128xf32>
      %92 = arith.addf %89, %91 : vector<224x128xf32>
      %cst_62 = arith.constant 0.000000e+00 : f32
      %93 = vector.broadcast %cst_62 : f32 to vector<224x128xf32>
      %94 = arith.maximumf %92, %93 : vector<224x128xf32>
      %c672_63 = arith.constant 672 : index
      %c0_64 = arith.constant 0 : index
      %95 = vector.load %arg13[%c672_63, %c0_64] : memref<904x128xf32, #tpu.memory_space<vmem>>, vector<224x128xf32>
      tpu.vector_store %arg13[%c672_63, %c0_64], %94 {strides = array<i32>} : memref<904x128xf32, #tpu.memory_space<vmem>>, vector<224x128xf32>,
      %c0_65 = arith.constant 0 : index
      %c0_66 = arith.constant 0 : index
      %96 = vector.load %arg13[%c0_65, %c0_66] : memref<904x128xf32, #tpu.memory_space<vmem>>, vector<20x128xf32>
      %c16 = arith.constant 16 : index
      %c0_67 = arith.constant 0 : index
      %97 = vector.load %arg13[%c16, %c0_67] : memref<904x128xf32, #tpu.memory_space<vmem>>, vector<20x128xf32>
      %98 = arith.maximumf %96, %97 : vector<20x128xf32>
      %c32 = arith.constant 32 : index
      %c0_68 = arith.constant 0 : index
      %99 = vector.load %arg13[%c32, %c0_68] : memref<904x128xf32, #tpu.memory_space<vmem>>, vector<20x128xf32>
      %c48 = arith.constant 48 : index
      %c0_69 = arith.constant 0 : index
      %100 = vector.load %arg13[%c48, %c0_69] : memref<904x128xf32, #tpu.memory_space<vmem>>, vector<20x128xf32>
      %101 = arith.maximumf %99, %100 : vector<20x128xf32>
      %102 = arith.maximumf %98, %101 : vector<20x128xf32>
      %103 = vector.extract_strided_slice %102 {offsets = [0, 0], sizes = [16, 128], strides = [1, 1]} : vector<20x128xf32> to vector<16x128xf32>
      %104 = vector.extract_strided_slice %102 {offsets = [1, 0], sizes = [16, 128], strides = [1, 1]} : vector<20x128xf32> to vector<16x128xf32>
      %cst_70 = arith.constant 0.000000e+00 : f32
      %105 = vector.broadcast %cst_70 : f32 to vector<16x6xf32>
      %106 = vector.extract_strided_slice %104 {offsets = [0, 0], sizes = [16, 122], strides = [1, 1]} : vector<16x128xf32> to vector<16x122xf32>
      %107 = tpu.concatenate %105, %106 in 1 : vector<16x6xf32>, vector<16x122xf32> -> vector<16x128xf32>
      %108 = arith.addf %103, %107 : vector<16x128xf32>
      %109 = vector.extract_strided_slice %102 {offsets = [2, 0], sizes = [16, 128], strides = [1, 1]} : vector<20x128xf32> to vector<16x128xf32>
      %cst_71 = arith.constant 0.000000e+00 : f32
      %110 = vector.broadcast %cst_71 : f32 to vector<16x12xf32>
      %111 = vector.extract_strided_slice %109 {offsets = [0, 0], sizes = [16, 116], strides = [1, 1]} : vector<16x128xf32> to vector<16x116xf32>
      %112 = tpu.concatenate %110, %111 in 1 : vector<16x12xf32>, vector<16x116xf32> -> vector<16x128xf32>
      %113 = arith.addf %108, %112 : vector<16x128xf32>
      %114 = vector.extract_strided_slice %102 {offsets = [3, 0], sizes = [16, 128], strides = [1, 1]} : vector<20x128xf32> to vector<16x128xf32>
      %cst_72 = arith.constant 0.000000e+00 : f32
      %115 = vector.broadcast %cst_72 : f32 to vector<16x18xf32>
      %116 = vector.extract_strided_slice %114 {offsets = [0, 0], sizes = [16, 110], strides = [1, 1]} : vector<16x128xf32> to vector<16x110xf32>
      %117 = tpu.concatenate %115, %116 in 1 : vector<16x18xf32>, vector<16x110xf32> -> vector<16x128xf32>
      %118 = arith.addf %113, %117 : vector<16x128xf32>
      %119 = vector.extract_strided_slice %102 {offsets = [4, 0], sizes = [16, 128], strides = [1, 1]} : vector<20x128xf32> to vector<16x128xf32>
      %cst_73 = arith.constant 0.000000e+00 : f32
      %120 = vector.broadcast %cst_73 : f32 to vector<16x24xf32>
      %121 = vector.extract_strided_slice %119 {offsets = [0, 0], sizes = [16, 104], strides = [1, 1]} : vector<16x128xf32> to vector<16x104xf32>
      %122 = tpu.concatenate %120, %121 in 1 : vector<16x24xf32>, vector<16x104xf32> -> vector<16x128xf32>
      %123 = arith.addf %118, %122 : vector<16x128xf32>
      %124 = vector.extract_strided_slice %123 {offsets = [0, 0], sizes = [16, 32], strides = [1, 1]} : vector<16x128xf32> to vector<16x32xf32>
      %c0_74 = arith.constant 0 : index
      %c0_75 = arith.constant 0 : index
      %125 = vector.load %arg14[%c0_74, %c0_75] : memref<224x32xf32, #tpu.memory_space<vmem>>, vector<16x32xf32>
      tpu.vector_store %arg14[%c0_74, %c0_75], %124 {strides = array<i32>} : memref<224x32xf32, #tpu.memory_space<vmem>>, vector<16x32xf32>,
      %c64 = arith.constant 64 : index
      %c0_76 = arith.constant 0 : index
      %126 = vector.load %arg13[%c64, %c0_76] : memref<904x128xf32, #tpu.memory_space<vmem>>, vector<20x128xf32>
      %c80 = arith.constant 80 : index
      %c0_77 = arith.constant 0 : index
      %127 = vector.load %arg13[%c80, %c0_77] : memref<904x128xf32, #tpu.memory_space<vmem>>, vector<20x128xf32>
      %128 = arith.maximumf %126, %127 : vector<20x128xf32>
      %c96 = arith.constant 96 : index
      %c0_78 = arith.constant 0 : index
      %129 = vector.load %arg13[%c96, %c0_78] : memref<904x128xf32, #tpu.memory_space<vmem>>, vector<20x128xf32>
      %c112 = arith.constant 112 : index
      %c0_79 = arith.constant 0 : index
      %130 = vector.load %arg13[%c112, %c0_79] : memref<904x128xf32, #tpu.memory_space<vmem>>, vector<20x128xf32>
      %131 = arith.maximumf %129, %130 : vector<20x128xf32>
      %132 = arith.maximumf %128, %131 : vector<20x128xf32>
      %133 = vector.extract_strided_slice %132 {offsets = [0, 0], sizes = [16, 128], strides = [1, 1]} : vector<20x128xf32> to vector<16x128xf32>
      %134 = vector.extract_strided_slice %132 {offsets = [1, 0], sizes = [16, 128], strides = [1, 1]} : vector<20x128xf32> to vector<16x128xf32>
      %cst_80 = arith.constant 0.000000e+00 : f32
      %135 = vector.broadcast %cst_80 : f32 to vector<16x6xf32>
      %136 = vector.extract_strided_slice %134 {offsets = [0, 0], sizes = [16, 122], strides = [1, 1]} : vector<16x128xf32> to vector<16x122xf32>
      %137 = tpu.concatenate %135, %136 in 1 : vector<16x6xf32>, vector<16x122xf32> -> vector<16x128xf32>
      %138 = arith.addf %133, %137 : vector<16x128xf32>
      %139 = vector.extract_strided_slice %132 {offsets = [2, 0], sizes = [16, 128], strides = [1, 1]} : vector<20x128xf32> to vector<16x128xf32>
      %cst_81 = arith.constant 0.000000e+00 : f32
      %140 = vector.broadcast %cst_81 : f32 to vector<16x12xf32>
      %141 = vector.extract_strided_slice %139 {offsets = [0, 0], sizes = [16, 116], strides = [1, 1]} : vector<16x128xf32> to vector<16x116xf32>
      %142 = tpu.concatenate %140, %141 in 1 : vector<16x12xf32>, vector<16x116xf32> -> vector<16x128xf32>
      %143 = arith.addf %138, %142 : vector<16x128xf32>
      %144 = vector.extract_strided_slice %132 {offsets = [3, 0], sizes = [16, 128], strides = [1, 1]} : vector<20x128xf32> to vector<16x128xf32>
      %cst_82 = arith.constant 0.000000e+00 : f32
      %145 = vector.broadcast %cst_82 : f32 to vector<16x18xf32>
      %146 = vector.extract_strided_slice %144 {offsets = [0, 0], sizes = [16, 110], strides = [1, 1]} : vector<16x128xf32> to vector<16x110xf32>
      %147 = tpu.concatenate %145, %146 in 1 : vector<16x18xf32>, vector<16x110xf32> -> vector<16x128xf32>
      %148 = arith.addf %143, %147 : vector<16x128xf32>
      %149 = vector.extract_strided_slice %132 {offsets = [4, 0], sizes = [16, 128], strides = [1, 1]} : vector<20x128xf32> to vector<16x128xf32>
      %cst_83 = arith.constant 0.000000e+00 : f32
      %150 = vector.broadcast %cst_83 : f32 to vector<16x24xf32>
      %151 = vector.extract_strided_slice %149 {offsets = [0, 0], sizes = [16, 104], strides = [1, 1]} : vector<16x128xf32> to vector<16x104xf32>
      %152 = tpu.concatenate %150, %151 in 1 : vector<16x24xf32>, vector<16x104xf32> -> vector<16x128xf32>
      %153 = arith.addf %148, %152 : vector<16x128xf32>
      %154 = vector.extract_strided_slice %153 {offsets = [0, 0], sizes = [16, 32], strides = [1, 1]} : vector<16x128xf32> to vector<16x32xf32>
      %c16_84 = arith.constant 16 : index
      %c0_85 = arith.constant 0 : index
      %155 = vector.load %arg14[%c16_84, %c0_85] : memref<224x32xf32, #tpu.memory_space<vmem>>, vector<16x32xf32>
      tpu.vector_store %arg14[%c16_84, %c0_85], %154 {strides = array<i32>} : memref<224x32xf32, #tpu.memory_space<vmem>>, vector<16x32xf32>,
      %c128 = arith.constant 128 : index
      %c0_86 = arith.constant 0 : index
      %156 = vector.load %arg13[%c128, %c0_86] : memref<904x128xf32, #tpu.memory_space<vmem>>, vector<20x128xf32>
      %c144 = arith.constant 144 : index
      %c0_87 = arith.constant 0 : index
      %157 = vector.load %arg13[%c144, %c0_87] : memref<904x128xf32, #tpu.memory_space<vmem>>, vector<20x128xf32>
      %158 = arith.maximumf %156, %157 : vector<20x128xf32>
      %c160 = arith.constant 160 : index
      %c0_88 = arith.constant 0 : index
      %159 = vector.load %arg13[%c160, %c0_88] : memref<904x128xf32, #tpu.memory_space<vmem>>, vector<20x128xf32>
      %c176 = arith.constant 176 : index
      %c0_89 = arith.constant 0 : index
      %160 = vector.load %arg13[%c176, %c0_89] : memref<904x128xf32, #tpu.memory_space<vmem>>, vector<20x128xf32>
      %161 = arith.maximumf %159, %160 : vector<20x128xf32>
      %162 = arith.maximumf %158, %161 : vector<20x128xf32>
      %163 = vector.extract_strided_slice %162 {offsets = [0, 0], sizes = [16, 128], strides = [1, 1]} : vector<20x128xf32> to vector<16x128xf32>
      %164 = vector.extract_strided_slice %162 {offsets = [1, 0], sizes = [16, 128], strides = [1, 1]} : vector<20x128xf32> to vector<16x128xf32>
      %cst_90 = arith.constant 0.000000e+00 : f32
      %165 = vector.broadcast %cst_90 : f32 to vector<16x6xf32>
      %166 = vector.extract_strided_slice %164 {offsets = [0, 0], sizes = [16, 122], strides = [1, 1]} : vector<16x128xf32> to vector<16x122xf32>
      %167 = tpu.concatenate %165, %166 in 1 : vector<16x6xf32>, vector<16x122xf32> -> vector<16x128xf32>
      %168 = arith.addf %163, %167 : vector<16x128xf32>
      %169 = vector.extract_strided_slice %162 {offsets = [2, 0], sizes = [16, 128], strides = [1, 1]} : vector<20x128xf32> to vector<16x128xf32>
      %cst_91 = arith.constant 0.000000e+00 : f32
      %170 = vector.broadcast %cst_91 : f32 to vector<16x12xf32>
      %171 = vector.extract_strided_slice %169 {offsets = [0, 0], sizes = [16, 116], strides = [1, 1]} : vector<16x128xf32> to vector<16x116xf32>
      %172 = tpu.concatenate %170, %171 in 1 : vector<16x12xf32>, vector<16x116xf32> -> vector<16x128xf32>
      %173 = arith.addf %168, %172 : vector<16x128xf32>
      %174 = vector.extract_strided_slice %162 {offsets = [3, 0], sizes = [16, 128], strides = [1, 1]} : vector<20x128xf32> to vector<16x128xf32>
      %cst_92 = arith.constant 0.000000e+00 : f32
      %175 = vector.broadcast %cst_92 : f32 to vector<16x18xf32>
      %176 = vector.extract_strided_slice %174 {offsets = [0, 0], sizes = [16, 110], strides = [1, 1]} : vector<16x128xf32> to vector<16x110xf32>
      %177 = tpu.concatenate %175, %176 in 1 : vector<16x18xf32>, vector<16x110xf32> -> vector<16x128xf32>
      %178 = arith.addf %173, %177 : vector<16x128xf32>
      %179 = vector.extract_strided_slice %162 {offsets = [4, 0], sizes = [16, 128], strides = [1, 1]} : vector<20x128xf32> to vector<16x128xf32>
      %cst_93 = arith.constant 0.000000e+00 : f32
      %180 = vector.broadcast %cst_93 : f32 to vector<16x24xf32>
      %181 = vector.extract_strided_slice %179 {offsets = [0, 0], sizes = [16, 104], strides = [1, 1]} : vector<16x128xf32> to vector<16x104xf32>
      %182 = tpu.concatenate %180, %181 in 1 : vector<16x24xf32>, vector<16x104xf32> -> vector<16x128xf32>
      %183 = arith.addf %178, %182 : vector<16x128xf32>
      %184 = vector.extract_strided_slice %183 {offsets = [0, 0], sizes = [16, 32], strides = [1, 1]} : vector<16x128xf32> to vector<16x32xf32>
      %c32_94 = arith.constant 32 : index
      %c0_95 = arith.constant 0 : index
      %185 = vector.load %arg14[%c32_94, %c0_95] : memref<224x32xf32, #tpu.memory_space<vmem>>, vector<16x32xf32>
      tpu.vector_store %arg14[%c32_94, %c0_95], %184 {strides = array<i32>} : memref<224x32xf32, #tpu.memory_space<vmem>>, vector<16x32xf32>,
      %c192 = arith.constant 192 : index
      %c0_96 = arith.constant 0 : index
      %186 = vector.load %arg13[%c192, %c0_96] : memref<904x128xf32, #tpu.memory_space<vmem>>, vector<20x128xf32>
      %c208 = arith.constant 208 : index
      %c0_97 = arith.constant 0 : index
      %187 = vector.load %arg13[%c208, %c0_97] : memref<904x128xf32, #tpu.memory_space<vmem>>, vector<20x128xf32>
      %188 = arith.maximumf %186, %187 : vector<20x128xf32>
      %c224_98 = arith.constant 224 : index
      %c0_99 = arith.constant 0 : index
      %189 = vector.load %arg13[%c224_98, %c0_99] : memref<904x128xf32, #tpu.memory_space<vmem>>, vector<20x128xf32>
      %c240 = arith.constant 240 : index
      %c0_100 = arith.constant 0 : index
      %190 = vector.load %arg13[%c240, %c0_100] : memref<904x128xf32, #tpu.memory_space<vmem>>, vector<20x128xf32>
      %191 = arith.maximumf %189, %190 : vector<20x128xf32>
      %192 = arith.maximumf %188, %191 : vector<20x128xf32>
      %193 = vector.extract_strided_slice %192 {offsets = [0, 0], sizes = [16, 128], strides = [1, 1]} : vector<20x128xf32> to vector<16x128xf32>
      %194 = vector.extract_strided_slice %192 {offsets = [1, 0], sizes = [16, 128], strides = [1, 1]} : vector<20x128xf32> to vector<16x128xf32>
      %cst_101 = arith.constant 0.000000e+00 : f32
      %195 = vector.broadcast %cst_101 : f32 to vector<16x6xf32>
      %196 = vector.extract_strided_slice %194 {offsets = [0, 0], sizes = [16, 122], strides = [1, 1]} : vector<16x128xf32> to vector<16x122xf32>
      %197 = tpu.concatenate %195, %196 in 1 : vector<16x6xf32>, vector<16x122xf32> -> vector<16x128xf32>
      %198 = arith.addf %193, %197 : vector<16x128xf32>
      %199 = vector.extract_strided_slice %192 {offsets = [2, 0], sizes = [16, 128], strides = [1, 1]} : vector<20x128xf32> to vector<16x128xf32>
      %cst_102 = arith.constant 0.000000e+00 : f32
      %200 = vector.broadcast %cst_102 : f32 to vector<16x12xf32>
      %201 = vector.extract_strided_slice %199 {offsets = [0, 0], sizes = [16, 116], strides = [1, 1]} : vector<16x128xf32> to vector<16x116xf32>
      %202 = tpu.concatenate %200, %201 in 1 : vector<16x12xf32>, vector<16x116xf32> -> vector<16x128xf32>
      %203 = arith.addf %198, %202 : vector<16x128xf32>
      %204 = vector.extract_strided_slice %192 {offsets = [3, 0], sizes = [16, 128], strides = [1, 1]} : vector<20x128xf32> to vector<16x128xf32>
      %cst_103 = arith.constant 0.000000e+00 : f32
      %205 = vector.broadcast %cst_103 : f32 to vector<16x18xf32>
      %206 = vector.extract_strided_slice %204 {offsets = [0, 0], sizes = [16, 110], strides = [1, 1]} : vector<16x128xf32> to vector<16x110xf32>
      %207 = tpu.concatenate %205, %206 in 1 : vector<16x18xf32>, vector<16x110xf32> -> vector<16x128xf32>
      %208 = arith.addf %203, %207 : vector<16x128xf32>
      %209 = vector.extract_strided_slice %192 {offsets = [4, 0], sizes = [16, 128], strides = [1, 1]} : vector<20x128xf32> to vector<16x128xf32>
      %cst_104 = arith.constant 0.000000e+00 : f32
      %210 = vector.broadcast %cst_104 : f32 to vector<16x24xf32>
      %211 = vector.extract_strided_slice %209 {offsets = [0, 0], sizes = [16, 104], strides = [1, 1]} : vector<16x128xf32> to vector<16x104xf32>
      %212 = tpu.concatenate %210, %211 in 1 : vector<16x24xf32>, vector<16x104xf32> -> vector<16x128xf32>
      %213 = arith.addf %208, %212 : vector<16x128xf32>
      %214 = vector.extract_strided_slice %213 {offsets = [0, 0], sizes = [16, 32], strides = [1, 1]} : vector<16x128xf32> to vector<16x32xf32>
      %c48_105 = arith.constant 48 : index
      %c0_106 = arith.constant 0 : index
      %215 = vector.load %arg14[%c48_105, %c0_106] : memref<224x32xf32, #tpu.memory_space<vmem>>, vector<16x32xf32>
      tpu.vector_store %arg14[%c48_105, %c0_106], %214 {strides = array<i32>} : memref<224x32xf32, #tpu.memory_space<vmem>>, vector<16x32xf32>,
      %c256 = arith.constant 256 : index
      %c0_107 = arith.constant 0 : index
      %216 = vector.load %arg13[%c256, %c0_107] : memref<904x128xf32, #tpu.memory_space<vmem>>, vector<20x128xf32>
      %c272 = arith.constant 272 : index
      %c0_108 = arith.constant 0 : index
      %217 = vector.load %arg13[%c272, %c0_108] : memref<904x128xf32, #tpu.memory_space<vmem>>, vector<20x128xf32>
      %218 = arith.maximumf %216, %217 : vector<20x128xf32>
      %c288 = arith.constant 288 : index
      %c0_109 = arith.constant 0 : index
      %219 = vector.load %arg13[%c288, %c0_109] : memref<904x128xf32, #tpu.memory_space<vmem>>, vector<20x128xf32>
      %c304 = arith.constant 304 : index
      %c0_110 = arith.constant 0 : index
      %220 = vector.load %arg13[%c304, %c0_110] : memref<904x128xf32, #tpu.memory_space<vmem>>, vector<20x128xf32>
      %221 = arith.maximumf %219, %220 : vector<20x128xf32>
      %222 = arith.maximumf %218, %221 : vector<20x128xf32>
      %223 = vector.extract_strided_slice %222 {offsets = [0, 0], sizes = [16, 128], strides = [1, 1]} : vector<20x128xf32> to vector<16x128xf32>
      %224 = vector.extract_strided_slice %222 {offsets = [1, 0], sizes = [16, 128], strides = [1, 1]} : vector<20x128xf32> to vector<16x128xf32>
      %cst_111 = arith.constant 0.000000e+00 : f32
      %225 = vector.broadcast %cst_111 : f32 to vector<16x6xf32>
      %226 = vector.extract_strided_slice %224 {offsets = [0, 0], sizes = [16, 122], strides = [1, 1]} : vector<16x128xf32> to vector<16x122xf32>
      %227 = tpu.concatenate %225, %226 in 1 : vector<16x6xf32>, vector<16x122xf32> -> vector<16x128xf32>
      %228 = arith.addf %223, %227 : vector<16x128xf32>
      %229 = vector.extract_strided_slice %222 {offsets = [2, 0], sizes = [16, 128], strides = [1, 1]} : vector<20x128xf32> to vector<16x128xf32>
      %cst_112 = arith.constant 0.000000e+00 : f32
      %230 = vector.broadcast %cst_112 : f32 to vector<16x12xf32>
      %231 = vector.extract_strided_slice %229 {offsets = [0, 0], sizes = [16, 116], strides = [1, 1]} : vector<16x128xf32> to vector<16x116xf32>
      %232 = tpu.concatenate %230, %231 in 1 : vector<16x12xf32>, vector<16x116xf32> -> vector<16x128xf32>
      %233 = arith.addf %228, %232 : vector<16x128xf32>
      %234 = vector.extract_strided_slice %222 {offsets = [3, 0], sizes = [16, 128], strides = [1, 1]} : vector<20x128xf32> to vector<16x128xf32>
      %cst_113 = arith.constant 0.000000e+00 : f32
      %235 = vector.broadcast %cst_113 : f32 to vector<16x18xf32>
      %236 = vector.extract_strided_slice %234 {offsets = [0, 0], sizes = [16, 110], strides = [1, 1]} : vector<16x128xf32> to vector<16x110xf32>
      %237 = tpu.concatenate %235, %236 in 1 : vector<16x18xf32>, vector<16x110xf32> -> vector<16x128xf32>
      %238 = arith.addf %233, %237 : vector<16x128xf32>
      %239 = vector.extract_strided_slice %222 {offsets = [4, 0], sizes = [16, 128], strides = [1, 1]} : vector<20x128xf32> to vector<16x128xf32>
      %cst_114 = arith.constant 0.000000e+00 : f32
      %240 = vector.broadcast %cst_114 : f32 to vector<16x24xf32>
      %241 = vector.extract_strided_slice %239 {offsets = [0, 0], sizes = [16, 104], strides = [1, 1]} : vector<16x128xf32> to vector<16x104xf32>
      %242 = tpu.concatenate %240, %241 in 1 : vector<16x24xf32>, vector<16x104xf32> -> vector<16x128xf32>
      %243 = arith.addf %238, %242 : vector<16x128xf32>
      %244 = vector.extract_strided_slice %243 {offsets = [0, 0], sizes = [16, 32], strides = [1, 1]} : vector<16x128xf32> to vector<16x32xf32>
      %c64_115 = arith.constant 64 : index
      %c0_116 = arith.constant 0 : index
      %245 = vector.load %arg14[%c64_115, %c0_116] : memref<224x32xf32, #tpu.memory_space<vmem>>, vector<16x32xf32>
      tpu.vector_store %arg14[%c64_115, %c0_116], %244 {strides = array<i32>} : memref<224x32xf32, #tpu.memory_space<vmem>>, vector<16x32xf32>,
      %c320 = arith.constant 320 : index
      %c0_117 = arith.constant 0 : index
      %246 = vector.load %arg13[%c320, %c0_117] : memref<904x128xf32, #tpu.memory_space<vmem>>, vector<20x128xf32>
      %c336 = arith.constant 336 : index
      %c0_118 = arith.constant 0 : index
      %247 = vector.load %arg13[%c336, %c0_118] : memref<904x128xf32, #tpu.memory_space<vmem>>, vector<20x128xf32>
      %248 = arith.maximumf %246, %247 : vector<20x128xf32>
      %c352 = arith.constant 352 : index
      %c0_119 = arith.constant 0 : index
      %249 = vector.load %arg13[%c352, %c0_119] : memref<904x128xf32, #tpu.memory_space<vmem>>, vector<20x128xf32>
      %c368 = arith.constant 368 : index
      %c0_120 = arith.constant 0 : index
      %250 = vector.load %arg13[%c368, %c0_120] : memref<904x128xf32, #tpu.memory_space<vmem>>, vector<20x128xf32>
      %251 = arith.maximumf %249, %250 : vector<20x128xf32>
      %252 = arith.maximumf %248, %251 : vector<20x128xf32>
      %253 = vector.extract_strided_slice %252 {offsets = [0, 0], sizes = [16, 128], strides = [1, 1]} : vector<20x128xf32> to vector<16x128xf32>
      %254 = vector.extract_strided_slice %252 {offsets = [1, 0], sizes = [16, 128], strides = [1, 1]} : vector<20x128xf32> to vector<16x128xf32>
      %cst_121 = arith.constant 0.000000e+00 : f32
      %255 = vector.broadcast %cst_121 : f32 to vector<16x6xf32>
      %256 = vector.extract_strided_slice %254 {offsets = [0, 0], sizes = [16, 122], strides = [1, 1]} : vector<16x128xf32> to vector<16x122xf32>
      %257 = tpu.concatenate %255, %256 in 1 : vector<16x6xf32>, vector<16x122xf32> -> vector<16x128xf32>
      %258 = arith.addf %253, %257 : vector<16x128xf32>
      %259 = vector.extract_strided_slice %252 {offsets = [2, 0], sizes = [16, 128], strides = [1, 1]} : vector<20x128xf32> to vector<16x128xf32>
      %cst_122 = arith.constant 0.000000e+00 : f32
      %260 = vector.broadcast %cst_122 : f32 to vector<16x12xf32>
      %261 = vector.extract_strided_slice %259 {offsets = [0, 0], sizes = [16, 116], strides = [1, 1]} : vector<16x128xf32> to vector<16x116xf32>
      %262 = tpu.concatenate %260, %261 in 1 : vector<16x12xf32>, vector<16x116xf32> -> vector<16x128xf32>
      %263 = arith.addf %258, %262 : vector<16x128xf32>
      %264 = vector.extract_strided_slice %252 {offsets = [3, 0], sizes = [16, 128], strides = [1, 1]} : vector<20x128xf32> to vector<16x128xf32>
      %cst_123 = arith.constant 0.000000e+00 : f32
      %265 = vector.broadcast %cst_123 : f32 to vector<16x18xf32>
      %266 = vector.extract_strided_slice %264 {offsets = [0, 0], sizes = [16, 110], strides = [1, 1]} : vector<16x128xf32> to vector<16x110xf32>
      %267 = tpu.concatenate %265, %266 in 1 : vector<16x18xf32>, vector<16x110xf32> -> vector<16x128xf32>
      %268 = arith.addf %263, %267 : vector<16x128xf32>
      %269 = vector.extract_strided_slice %252 {offsets = [4, 0], sizes = [16, 128], strides = [1, 1]} : vector<20x128xf32> to vector<16x128xf32>
      %cst_124 = arith.constant 0.000000e+00 : f32
      %270 = vector.broadcast %cst_124 : f32 to vector<16x24xf32>
      %271 = vector.extract_strided_slice %269 {offsets = [0, 0], sizes = [16, 104], strides = [1, 1]} : vector<16x128xf32> to vector<16x104xf32>
      %272 = tpu.concatenate %270, %271 in 1 : vector<16x24xf32>, vector<16x104xf32> -> vector<16x128xf32>
      %273 = arith.addf %268, %272 : vector<16x128xf32>
      %274 = vector.extract_strided_slice %273 {offsets = [0, 0], sizes = [16, 32], strides = [1, 1]} : vector<16x128xf32> to vector<16x32xf32>
      %c80_125 = arith.constant 80 : index
      %c0_126 = arith.constant 0 : index
      %275 = vector.load %arg14[%c80_125, %c0_126] : memref<224x32xf32, #tpu.memory_space<vmem>>, vector<16x32xf32>
      tpu.vector_store %arg14[%c80_125, %c0_126], %274 {strides = array<i32>} : memref<224x32xf32, #tpu.memory_space<vmem>>, vector<16x32xf32>,
      %c384 = arith.constant 384 : index
      %c0_127 = arith.constant 0 : index
      %276 = vector.load %arg13[%c384, %c0_127] : memref<904x128xf32, #tpu.memory_space<vmem>>, vector<20x128xf32>
      %c400 = arith.constant 400 : index
      %c0_128 = arith.constant 0 : index
      %277 = vector.load %arg13[%c400, %c0_128] : memref<904x128xf32, #tpu.memory_space<vmem>>, vector<20x128xf32>
      %278 = arith.maximumf %276, %277 : vector<20x128xf32>
      %c416 = arith.constant 416 : index
      %c0_129 = arith.constant 0 : index
      %279 = vector.load %arg13[%c416, %c0_129] : memref<904x128xf32, #tpu.memory_space<vmem>>, vector<20x128xf32>
      %c432 = arith.constant 432 : index
      %c0_130 = arith.constant 0 : index
      %280 = vector.load %arg13[%c432, %c0_130] : memref<904x128xf32, #tpu.memory_space<vmem>>, vector<20x128xf32>
      %281 = arith.maximumf %279, %280 : vector<20x128xf32>
      %282 = arith.maximumf %278, %281 : vector<20x128xf32>
      %283 = vector.extract_strided_slice %282 {offsets = [0, 0], sizes = [16, 128], strides = [1, 1]} : vector<20x128xf32> to vector<16x128xf32>
      %284 = vector.extract_strided_slice %282 {offsets = [1, 0], sizes = [16, 128], strides = [1, 1]} : vector<20x128xf32> to vector<16x128xf32>
      %cst_131 = arith.constant 0.000000e+00 : f32
      %285 = vector.broadcast %cst_131 : f32 to vector<16x6xf32>
      %286 = vector.extract_strided_slice %284 {offsets = [0, 0], sizes = [16, 122], strides = [1, 1]} : vector<16x128xf32> to vector<16x122xf32>
      %287 = tpu.concatenate %285, %286 in 1 : vector<16x6xf32>, vector<16x122xf32> -> vector<16x128xf32>
      %288 = arith.addf %283, %287 : vector<16x128xf32>
      %289 = vector.extract_strided_slice %282 {offsets = [2, 0], sizes = [16, 128], strides = [1, 1]} : vector<20x128xf32> to vector<16x128xf32>
      %cst_132 = arith.constant 0.000000e+00 : f32
      %290 = vector.broadcast %cst_132 : f32 to vector<16x12xf32>
      %291 = vector.extract_strided_slice %289 {offsets = [0, 0], sizes = [16, 116], strides = [1, 1]} : vector<16x128xf32> to vector<16x116xf32>
      %292 = tpu.concatenate %290, %291 in 1 : vector<16x12xf32>, vector<16x116xf32> -> vector<16x128xf32>
      %293 = arith.addf %288, %292 : vector<16x128xf32>
      %294 = vector.extract_strided_slice %282 {offsets = [3, 0], sizes = [16, 128], strides = [1, 1]} : vector<20x128xf32> to vector<16x128xf32>
      %cst_133 = arith.constant 0.000000e+00 : f32
      %295 = vector.broadcast %cst_133 : f32 to vector<16x18xf32>
      %296 = vector.extract_strided_slice %294 {offsets = [0, 0], sizes = [16, 110], strides = [1, 1]} : vector<16x128xf32> to vector<16x110xf32>
      %297 = tpu.concatenate %295, %296 in 1 : vector<16x18xf32>, vector<16x110xf32> -> vector<16x128xf32>
      %298 = arith.addf %293, %297 : vector<16x128xf32>
      %299 = vector.extract_strided_slice %282 {offsets = [4, 0], sizes = [16, 128], strides = [1, 1]} : vector<20x128xf32> to vector<16x128xf32>
      %cst_134 = arith.constant 0.000000e+00 : f32
      %300 = vector.broadcast %cst_134 : f32 to vector<16x24xf32>
      %301 = vector.extract_strided_slice %299 {offsets = [0, 0], sizes = [16, 104], strides = [1, 1]} : vector<16x128xf32> to vector<16x104xf32>
      %302 = tpu.concatenate %300, %301 in 1 : vector<16x24xf32>, vector<16x104xf32> -> vector<16x128xf32>
      %303 = arith.addf %298, %302 : vector<16x128xf32>
      %304 = vector.extract_strided_slice %303 {offsets = [0, 0], sizes = [16, 32], strides = [1, 1]} : vector<16x128xf32> to vector<16x32xf32>
      %c96_135 = arith.constant 96 : index
      %c0_136 = arith.constant 0 : index
      %305 = vector.load %arg14[%c96_135, %c0_136] : memref<224x32xf32, #tpu.memory_space<vmem>>, vector<16x32xf32>
      tpu.vector_store %arg14[%c96_135, %c0_136], %304 {strides = array<i32>} : memref<224x32xf32, #tpu.memory_space<vmem>>, vector<16x32xf32>,
      %c448_137 = arith.constant 448 : index
      %c0_138 = arith.constant 0 : index
      %306 = vector.load %arg13[%c448_137, %c0_138] : memref<904x128xf32, #tpu.memory_space<vmem>>, vector<20x128xf32>
      %c464 = arith.constant 464 : index
      %c0_139 = arith.constant 0 : index
      %307 = vector.load %arg13[%c464, %c0_139] : memref<904x128xf32, #tpu.memory_space<vmem>>, vector<20x128xf32>
      %308 = arith.maximumf %306, %307 : vector<20x128xf32>
      %c480 = arith.constant 480 : index
      %c0_140 = arith.constant 0 : index
      %309 = vector.load %arg13[%c480, %c0_140] : memref<904x128xf32, #tpu.memory_space<vmem>>, vector<20x128xf32>
      %c496 = arith.constant 496 : index
      %c0_141 = arith.constant 0 : index
      %310 = vector.load %arg13[%c496, %c0_141] : memref<904x128xf32, #tpu.memory_space<vmem>>, vector<20x128xf32>
      %311 = arith.maximumf %309, %310 : vector<20x128xf32>
      %312 = arith.maximumf %308, %311 : vector<20x128xf32>
      %313 = vector.extract_strided_slice %312 {offsets = [0, 0], sizes = [16, 128], strides = [1, 1]} : vector<20x128xf32> to vector<16x128xf32>
      %314 = vector.extract_strided_slice %312 {offsets = [1, 0], sizes = [16, 128], strides = [1, 1]} : vector<20x128xf32> to vector<16x128xf32>
      %cst_142 = arith.constant 0.000000e+00 : f32
      %315 = vector.broadcast %cst_142 : f32 to vector<16x6xf32>
      %316 = vector.extract_strided_slice %314 {offsets = [0, 0], sizes = [16, 122], strides = [1, 1]} : vector<16x128xf32> to vector<16x122xf32>
      %317 = tpu.concatenate %315, %316 in 1 : vector<16x6xf32>, vector<16x122xf32> -> vector<16x128xf32>
      %318 = arith.addf %313, %317 : vector<16x128xf32>
      %319 = vector.extract_strided_slice %312 {offsets = [2, 0], sizes = [16, 128], strides = [1, 1]} : vector<20x128xf32> to vector<16x128xf32>
      %cst_143 = arith.constant 0.000000e+00 : f32
      %320 = vector.broadcast %cst_143 : f32 to vector<16x12xf32>
      %321 = vector.extract_strided_slice %319 {offsets = [0, 0], sizes = [16, 116], strides = [1, 1]} : vector<16x128xf32> to vector<16x116xf32>
      %322 = tpu.concatenate %320, %321 in 1 : vector<16x12xf32>, vector<16x116xf32> -> vector<16x128xf32>
      %323 = arith.addf %318, %322 : vector<16x128xf32>
      %324 = vector.extract_strided_slice %312 {offsets = [3, 0], sizes = [16, 128], strides = [1, 1]} : vector<20x128xf32> to vector<16x128xf32>
      %cst_144 = arith.constant 0.000000e+00 : f32
      %325 = vector.broadcast %cst_144 : f32 to vector<16x18xf32>
      %326 = vector.extract_strided_slice %324 {offsets = [0, 0], sizes = [16, 110], strides = [1, 1]} : vector<16x128xf32> to vector<16x110xf32>
      %327 = tpu.concatenate %325, %326 in 1 : vector<16x18xf32>, vector<16x110xf32> -> vector<16x128xf32>
      %328 = arith.addf %323, %327 : vector<16x128xf32>
      %329 = vector.extract_strided_slice %312 {offsets = [4, 0], sizes = [16, 128], strides = [1, 1]} : vector<20x128xf32> to vector<16x128xf32>
      %cst_145 = arith.constant 0.000000e+00 : f32
      %330 = vector.broadcast %cst_145 : f32 to vector<16x24xf32>
      %331 = vector.extract_strided_slice %329 {offsets = [0, 0], sizes = [16, 104], strides = [1, 1]} : vector<16x128xf32> to vector<16x104xf32>
      %332 = tpu.concatenate %330, %331 in 1 : vector<16x24xf32>, vector<16x104xf32> -> vector<16x128xf32>
      %333 = arith.addf %328, %332 : vector<16x128xf32>
      %334 = vector.extract_strided_slice %333 {offsets = [0, 0], sizes = [16, 32], strides = [1, 1]} : vector<16x128xf32> to vector<16x32xf32>
      %c112_146 = arith.constant 112 : index
      %c0_147 = arith.constant 0 : index
      %335 = vector.load %arg14[%c112_146, %c0_147] : memref<224x32xf32, #tpu.memory_space<vmem>>, vector<16x32xf32>
      tpu.vector_store %arg14[%c112_146, %c0_147], %334 {strides = array<i32>} : memref<224x32xf32, #tpu.memory_space<vmem>>, vector<16x32xf32>,
      %c512 = arith.constant 512 : index
      %c0_148 = arith.constant 0 : index
      %336 = vector.load %arg13[%c512, %c0_148] : memref<904x128xf32, #tpu.memory_space<vmem>>, vector<20x128xf32>
      %c528 = arith.constant 528 : index
      %c0_149 = arith.constant 0 : index
      %337 = vector.load %arg13[%c528, %c0_149] : memref<904x128xf32, #tpu.memory_space<vmem>>, vector<20x128xf32>
      %338 = arith.maximumf %336, %337 : vector<20x128xf32>
      %c544 = arith.constant 544 : index
      %c0_150 = arith.constant 0 : index
      %339 = vector.load %arg13[%c544, %c0_150] : memref<904x128xf32, #tpu.memory_space<vmem>>, vector<20x128xf32>
      %c560 = arith.constant 560 : index
      %c0_151 = arith.constant 0 : index
      %340 = vector.load %arg13[%c560, %c0_151] : memref<904x128xf32, #tpu.memory_space<vmem>>, vector<20x128xf32>
      %341 = arith.maximumf %339, %340 : vector<20x128xf32>
      %342 = arith.maximumf %338, %341 : vector<20x128xf32>
      %343 = vector.extract_strided_slice %342 {offsets = [0, 0], sizes = [16, 128], strides = [1, 1]} : vector<20x128xf32> to vector<16x128xf32>
      %344 = vector.extract_strided_slice %342 {offsets = [1, 0], sizes = [16, 128], strides = [1, 1]} : vector<20x128xf32> to vector<16x128xf32>
      %cst_152 = arith.constant 0.000000e+00 : f32
      %345 = vector.broadcast %cst_152 : f32 to vector<16x6xf32>
      %346 = vector.extract_strided_slice %344 {offsets = [0, 0], sizes = [16, 122], strides = [1, 1]} : vector<16x128xf32> to vector<16x122xf32>
      %347 = tpu.concatenate %345, %346 in 1 : vector<16x6xf32>, vector<16x122xf32> -> vector<16x128xf32>
      %348 = arith.addf %343, %347 : vector<16x128xf32>
      %349 = vector.extract_strided_slice %342 {offsets = [2, 0], sizes = [16, 128], strides = [1, 1]} : vector<20x128xf32> to vector<16x128xf32>
      %cst_153 = arith.constant 0.000000e+00 : f32
      %350 = vector.broadcast %cst_153 : f32 to vector<16x12xf32>
      %351 = vector.extract_strided_slice %349 {offsets = [0, 0], sizes = [16, 116], strides = [1, 1]} : vector<16x128xf32> to vector<16x116xf32>
      %352 = tpu.concatenate %350, %351 in 1 : vector<16x12xf32>, vector<16x116xf32> -> vector<16x128xf32>
      %353 = arith.addf %348, %352 : vector<16x128xf32>
      %354 = vector.extract_strided_slice %342 {offsets = [3, 0], sizes = [16, 128], strides = [1, 1]} : vector<20x128xf32> to vector<16x128xf32>
      %cst_154 = arith.constant 0.000000e+00 : f32
      %355 = vector.broadcast %cst_154 : f32 to vector<16x18xf32>
      %356 = vector.extract_strided_slice %354 {offsets = [0, 0], sizes = [16, 110], strides = [1, 1]} : vector<16x128xf32> to vector<16x110xf32>
      %357 = tpu.concatenate %355, %356 in 1 : vector<16x18xf32>, vector<16x110xf32> -> vector<16x128xf32>
      %358 = arith.addf %353, %357 : vector<16x128xf32>
      %359 = vector.extract_strided_slice %342 {offsets = [4, 0], sizes = [16, 128], strides = [1, 1]} : vector<20x128xf32> to vector<16x128xf32>
      %cst_155 = arith.constant 0.000000e+00 : f32
      %360 = vector.broadcast %cst_155 : f32 to vector<16x24xf32>
      %361 = vector.extract_strided_slice %359 {offsets = [0, 0], sizes = [16, 104], strides = [1, 1]} : vector<16x128xf32> to vector<16x104xf32>
      %362 = tpu.concatenate %360, %361 in 1 : vector<16x24xf32>, vector<16x104xf32> -> vector<16x128xf32>
      %363 = arith.addf %358, %362 : vector<16x128xf32>
      %364 = vector.extract_strided_slice %363 {offsets = [0, 0], sizes = [16, 32], strides = [1, 1]} : vector<16x128xf32> to vector<16x32xf32>
      %c128_156 = arith.constant 128 : index
      %c0_157 = arith.constant 0 : index
      %365 = vector.load %arg14[%c128_156, %c0_157] : memref<224x32xf32, #tpu.memory_space<vmem>>, vector<16x32xf32>
      tpu.vector_store %arg14[%c128_156, %c0_157], %364 {strides = array<i32>} : memref<224x32xf32, #tpu.memory_space<vmem>>, vector<16x32xf32>,
      %c576 = arith.constant 576 : index
      %c0_158 = arith.constant 0 : index
      %366 = vector.load %arg13[%c576, %c0_158] : memref<904x128xf32, #tpu.memory_space<vmem>>, vector<20x128xf32>
      %c592 = arith.constant 592 : index
      %c0_159 = arith.constant 0 : index
      %367 = vector.load %arg13[%c592, %c0_159] : memref<904x128xf32, #tpu.memory_space<vmem>>, vector<20x128xf32>
      %368 = arith.maximumf %366, %367 : vector<20x128xf32>
      %c608 = arith.constant 608 : index
      %c0_160 = arith.constant 0 : index
      %369 = vector.load %arg13[%c608, %c0_160] : memref<904x128xf32, #tpu.memory_space<vmem>>, vector<20x128xf32>
      %c624 = arith.constant 624 : index
      %c0_161 = arith.constant 0 : index
      %370 = vector.load %arg13[%c624, %c0_161] : memref<904x128xf32, #tpu.memory_space<vmem>>, vector<20x128xf32>
      %371 = arith.maximumf %369, %370 : vector<20x128xf32>
      %372 = arith.maximumf %368, %371 : vector<20x128xf32>
      %373 = vector.extract_strided_slice %372 {offsets = [0, 0], sizes = [16, 128], strides = [1, 1]} : vector<20x128xf32> to vector<16x128xf32>
      %374 = vector.extract_strided_slice %372 {offsets = [1, 0], sizes = [16, 128], strides = [1, 1]} : vector<20x128xf32> to vector<16x128xf32>
      %cst_162 = arith.constant 0.000000e+00 : f32
      %375 = vector.broadcast %cst_162 : f32 to vector<16x6xf32>
      %376 = vector.extract_strided_slice %374 {offsets = [0, 0], sizes = [16, 122], strides = [1, 1]} : vector<16x128xf32> to vector<16x122xf32>
      %377 = tpu.concatenate %375, %376 in 1 : vector<16x6xf32>, vector<16x122xf32> -> vector<16x128xf32>
      %378 = arith.addf %373, %377 : vector<16x128xf32>
      %379 = vector.extract_strided_slice %372 {offsets = [2, 0], sizes = [16, 128], strides = [1, 1]} : vector<20x128xf32> to vector<16x128xf32>
      %cst_163 = arith.constant 0.000000e+00 : f32
      %380 = vector.broadcast %cst_163 : f32 to vector<16x12xf32>
      %381 = vector.extract_strided_slice %379 {offsets = [0, 0], sizes = [16, 116], strides = [1, 1]} : vector<16x128xf32> to vector<16x116xf32>
      %382 = tpu.concatenate %380, %381 in 1 : vector<16x12xf32>, vector<16x116xf32> -> vector<16x128xf32>
      %383 = arith.addf %378, %382 : vector<16x128xf32>
      %384 = vector.extract_strided_slice %372 {offsets = [3, 0], sizes = [16, 128], strides = [1, 1]} : vector<20x128xf32> to vector<16x128xf32>
      %cst_164 = arith.constant 0.000000e+00 : f32
      %385 = vector.broadcast %cst_164 : f32 to vector<16x18xf32>
      %386 = vector.extract_strided_slice %384 {offsets = [0, 0], sizes = [16, 110], strides = [1, 1]} : vector<16x128xf32> to vector<16x110xf32>
      %387 = tpu.concatenate %385, %386 in 1 : vector<16x18xf32>, vector<16x110xf32> -> vector<16x128xf32>
      %388 = arith.addf %383, %387 : vector<16x128xf32>
      %389 = vector.extract_strided_slice %372 {offsets = [4, 0], sizes = [16, 128], strides = [1, 1]} : vector<20x128xf32> to vector<16x128xf32>
      %cst_165 = arith.constant 0.000000e+00 : f32
      %390 = vector.broadcast %cst_165 : f32 to vector<16x24xf32>
      %391 = vector.extract_strided_slice %389 {offsets = [0, 0], sizes = [16, 104], strides = [1, 1]} : vector<16x128xf32> to vector<16x104xf32>
      %392 = tpu.concatenate %390, %391 in 1 : vector<16x24xf32>, vector<16x104xf32> -> vector<16x128xf32>
      %393 = arith.addf %388, %392 : vector<16x128xf32>
      %394 = vector.extract_strided_slice %393 {offsets = [0, 0], sizes = [16, 32], strides = [1, 1]} : vector<16x128xf32> to vector<16x32xf32>
      %c144_166 = arith.constant 144 : index
      %c0_167 = arith.constant 0 : index
      %395 = vector.load %arg14[%c144_166, %c0_167] : memref<224x32xf32, #tpu.memory_space<vmem>>, vector<16x32xf32>
      tpu.vector_store %arg14[%c144_166, %c0_167], %394 {strides = array<i32>} : memref<224x32xf32, #tpu.memory_space<vmem>>, vector<16x32xf32>,
      %c640 = arith.constant 640 : index
      %c0_168 = arith.constant 0 : index
      %396 = vector.load %arg13[%c640, %c0_168] : memref<904x128xf32, #tpu.memory_space<vmem>>, vector<20x128xf32>
      %c656 = arith.constant 656 : index
      %c0_169 = arith.constant 0 : index
      %397 = vector.load %arg13[%c656, %c0_169] : memref<904x128xf32, #tpu.memory_space<vmem>>, vector<20x128xf32>
      %398 = arith.maximumf %396, %397 : vector<20x128xf32>
      %c672_170 = arith.constant 672 : index
      %c0_171 = arith.constant 0 : index
      %399 = vector.load %arg13[%c672_170, %c0_171] : memref<904x128xf32, #tpu.memory_space<vmem>>, vector<20x128xf32>
      %c688 = arith.constant 688 : index
      %c0_172 = arith.constant 0 : index
      %400 = vector.load %arg13[%c688, %c0_172] : memref<904x128xf32, #tpu.memory_space<vmem>>, vector<20x128xf32>
      %401 = arith.maximumf %399, %400 : vector<20x128xf32>
      %402 = arith.maximumf %398, %401 : vector<20x128xf32>
      %403 = vector.extract_strided_slice %402 {offsets = [0, 0], sizes = [16, 128], strides = [1, 1]} : vector<20x128xf32> to vector<16x128xf32>
      %404 = vector.extract_strided_slice %402 {offsets = [1, 0], sizes = [16, 128], strides = [1, 1]} : vector<20x128xf32> to vector<16x128xf32>
      %cst_173 = arith.constant 0.000000e+00 : f32
      %405 = vector.broadcast %cst_173 : f32 to vector<16x6xf32>
      %406 = vector.extract_strided_slice %404 {offsets = [0, 0], sizes = [16, 122], strides = [1, 1]} : vector<16x128xf32> to vector<16x122xf32>
      %407 = tpu.concatenate %405, %406 in 1 : vector<16x6xf32>, vector<16x122xf32> -> vector<16x128xf32>
      %408 = arith.addf %403, %407 : vector<16x128xf32>
      %409 = vector.extract_strided_slice %402 {offsets = [2, 0], sizes = [16, 128], strides = [1, 1]} : vector<20x128xf32> to vector<16x128xf32>
      %cst_174 = arith.constant 0.000000e+00 : f32
      %410 = vector.broadcast %cst_174 : f32 to vector<16x12xf32>
      %411 = vector.extract_strided_slice %409 {offsets = [0, 0], sizes = [16, 116], strides = [1, 1]} : vector<16x128xf32> to vector<16x116xf32>
      %412 = tpu.concatenate %410, %411 in 1 : vector<16x12xf32>, vector<16x116xf32> -> vector<16x128xf32>
      %413 = arith.addf %408, %412 : vector<16x128xf32>
      %414 = vector.extract_strided_slice %402 {offsets = [3, 0], sizes = [16, 128], strides = [1, 1]} : vector<20x128xf32> to vector<16x128xf32>
      %cst_175 = arith.constant 0.000000e+00 : f32
      %415 = vector.broadcast %cst_175 : f32 to vector<16x18xf32>
      %416 = vector.extract_strided_slice %414 {offsets = [0, 0], sizes = [16, 110], strides = [1, 1]} : vector<16x128xf32> to vector<16x110xf32>
      %417 = tpu.concatenate %415, %416 in 1 : vector<16x18xf32>, vector<16x110xf32> -> vector<16x128xf32>
      %418 = arith.addf %413, %417 : vector<16x128xf32>
      %419 = vector.extract_strided_slice %402 {offsets = [4, 0], sizes = [16, 128], strides = [1, 1]} : vector<20x128xf32> to vector<16x128xf32>
      %cst_176 = arith.constant 0.000000e+00 : f32
      %420 = vector.broadcast %cst_176 : f32 to vector<16x24xf32>
      %421 = vector.extract_strided_slice %419 {offsets = [0, 0], sizes = [16, 104], strides = [1, 1]} : vector<16x128xf32> to vector<16x104xf32>
      %422 = tpu.concatenate %420, %421 in 1 : vector<16x24xf32>, vector<16x104xf32> -> vector<16x128xf32>
      %423 = arith.addf %418, %422 : vector<16x128xf32>
      %424 = vector.extract_strided_slice %423 {offsets = [0, 0], sizes = [16, 32], strides = [1, 1]} : vector<16x128xf32> to vector<16x32xf32>
      %c160_177 = arith.constant 160 : index
      %c0_178 = arith.constant 0 : index
      %425 = vector.load %arg14[%c160_177, %c0_178] : memref<224x32xf32, #tpu.memory_space<vmem>>, vector<16x32xf32>
      tpu.vector_store %arg14[%c160_177, %c0_178], %424 {strides = array<i32>} : memref<224x32xf32, #tpu.memory_space<vmem>>, vector<16x32xf32>,
      %c704 = arith.constant 704 : index
      %c0_179 = arith.constant 0 : index
      %426 = vector.load %arg13[%c704, %c0_179] : memref<904x128xf32, #tpu.memory_space<vmem>>, vector<20x128xf32>
      %c720 = arith.constant 720 : index
      %c0_180 = arith.constant 0 : index
      %427 = vector.load %arg13[%c720, %c0_180] : memref<904x128xf32, #tpu.memory_space<vmem>>, vector<20x128xf32>
      %428 = arith.maximumf %426, %427 : vector<20x128xf32>
      %c736 = arith.constant 736 : index
      %c0_181 = arith.constant 0 : index
      %429 = vector.load %arg13[%c736, %c0_181] : memref<904x128xf32, #tpu.memory_space<vmem>>, vector<20x128xf32>
      %c752 = arith.constant 752 : index
      %c0_182 = arith.constant 0 : index
      %430 = vector.load %arg13[%c752, %c0_182] : memref<904x128xf32, #tpu.memory_space<vmem>>, vector<20x128xf32>
      %431 = arith.maximumf %429, %430 : vector<20x128xf32>
      %432 = arith.maximumf %428, %431 : vector<20x128xf32>
      %433 = vector.extract_strided_slice %432 {offsets = [0, 0], sizes = [16, 128], strides = [1, 1]} : vector<20x128xf32> to vector<16x128xf32>
      %434 = vector.extract_strided_slice %432 {offsets = [1, 0], sizes = [16, 128], strides = [1, 1]} : vector<20x128xf32> to vector<16x128xf32>
      %cst_183 = arith.constant 0.000000e+00 : f32
      %435 = vector.broadcast %cst_183 : f32 to vector<16x6xf32>
      %436 = vector.extract_strided_slice %434 {offsets = [0, 0], sizes = [16, 122], strides = [1, 1]} : vector<16x128xf32> to vector<16x122xf32>
      %437 = tpu.concatenate %435, %436 in 1 : vector<16x6xf32>, vector<16x122xf32> -> vector<16x128xf32>
      %438 = arith.addf %433, %437 : vector<16x128xf32>
      %439 = vector.extract_strided_slice %432 {offsets = [2, 0], sizes = [16, 128], strides = [1, 1]} : vector<20x128xf32> to vector<16x128xf32>
      %cst_184 = arith.constant 0.000000e+00 : f32
      %440 = vector.broadcast %cst_184 : f32 to vector<16x12xf32>
      %441 = vector.extract_strided_slice %439 {offsets = [0, 0], sizes = [16, 116], strides = [1, 1]} : vector<16x128xf32> to vector<16x116xf32>
      %442 = tpu.concatenate %440, %441 in 1 : vector<16x12xf32>, vector<16x116xf32> -> vector<16x128xf32>
      %443 = arith.addf %438, %442 : vector<16x128xf32>
      %444 = vector.extract_strided_slice %432 {offsets = [3, 0], sizes = [16, 128], strides = [1, 1]} : vector<20x128xf32> to vector<16x128xf32>
      %cst_185 = arith.constant 0.000000e+00 : f32
      %445 = vector.broadcast %cst_185 : f32 to vector<16x18xf32>
      %446 = vector.extract_strided_slice %444 {offsets = [0, 0], sizes = [16, 110], strides = [1, 1]} : vector<16x128xf32> to vector<16x110xf32>
      %447 = tpu.concatenate %445, %446 in 1 : vector<16x18xf32>, vector<16x110xf32> -> vector<16x128xf32>
      %448 = arith.addf %443, %447 : vector<16x128xf32>
      %449 = vector.extract_strided_slice %432 {offsets = [4, 0], sizes = [16, 128], strides = [1, 1]} : vector<20x128xf32> to vector<16x128xf32>
      %cst_186 = arith.constant 0.000000e+00 : f32
      %450 = vector.broadcast %cst_186 : f32 to vector<16x24xf32>
      %451 = vector.extract_strided_slice %449 {offsets = [0, 0], sizes = [16, 104], strides = [1, 1]} : vector<16x128xf32> to vector<16x104xf32>
      %452 = tpu.concatenate %450, %451 in 1 : vector<16x24xf32>, vector<16x104xf32> -> vector<16x128xf32>
      %453 = arith.addf %448, %452 : vector<16x128xf32>
      %454 = vector.extract_strided_slice %453 {offsets = [0, 0], sizes = [16, 32], strides = [1, 1]} : vector<16x128xf32> to vector<16x32xf32>
      %c176_187 = arith.constant 176 : index
      %c0_188 = arith.constant 0 : index
      %455 = vector.load %arg14[%c176_187, %c0_188] : memref<224x32xf32, #tpu.memory_space<vmem>>, vector<16x32xf32>
      tpu.vector_store %arg14[%c176_187, %c0_188], %454 {strides = array<i32>} : memref<224x32xf32, #tpu.memory_space<vmem>>, vector<16x32xf32>,
      %c768 = arith.constant 768 : index
      %c0_189 = arith.constant 0 : index
      %456 = vector.load %arg13[%c768, %c0_189] : memref<904x128xf32, #tpu.memory_space<vmem>>, vector<20x128xf32>
      %c784 = arith.constant 784 : index
      %c0_190 = arith.constant 0 : index
      %457 = vector.load %arg13[%c784, %c0_190] : memref<904x128xf32, #tpu.memory_space<vmem>>, vector<20x128xf32>
      %458 = arith.maximumf %456, %457 : vector<20x128xf32>
      %c800 = arith.constant 800 : index
      %c0_191 = arith.constant 0 : index
      %459 = vector.load %arg13[%c800, %c0_191] : memref<904x128xf32, #tpu.memory_space<vmem>>, vector<20x128xf32>
      %c816 = arith.constant 816 : index
      %c0_192 = arith.constant 0 : index
      %460 = vector.load %arg13[%c816, %c0_192] : memref<904x128xf32, #tpu.memory_space<vmem>>, vector<20x128xf32>
      %461 = arith.maximumf %459, %460 : vector<20x128xf32>
      %462 = arith.maximumf %458, %461 : vector<20x128xf32>
      %463 = vector.extract_strided_slice %462 {offsets = [0, 0], sizes = [16, 128], strides = [1, 1]} : vector<20x128xf32> to vector<16x128xf32>
      %464 = vector.extract_strided_slice %462 {offsets = [1, 0], sizes = [16, 128], strides = [1, 1]} : vector<20x128xf32> to vector<16x128xf32>
      %cst_193 = arith.constant 0.000000e+00 : f32
      %465 = vector.broadcast %cst_193 : f32 to vector<16x6xf32>
      %466 = vector.extract_strided_slice %464 {offsets = [0, 0], sizes = [16, 122], strides = [1, 1]} : vector<16x128xf32> to vector<16x122xf32>
      %467 = tpu.concatenate %465, %466 in 1 : vector<16x6xf32>, vector<16x122xf32> -> vector<16x128xf32>
      %468 = arith.addf %463, %467 : vector<16x128xf32>
      %469 = vector.extract_strided_slice %462 {offsets = [2, 0], sizes = [16, 128], strides = [1, 1]} : vector<20x128xf32> to vector<16x128xf32>
      %cst_194 = arith.constant 0.000000e+00 : f32
      %470 = vector.broadcast %cst_194 : f32 to vector<16x12xf32>
      %471 = vector.extract_strided_slice %469 {offsets = [0, 0], sizes = [16, 116], strides = [1, 1]} : vector<16x128xf32> to vector<16x116xf32>
      %472 = tpu.concatenate %470, %471 in 1 : vector<16x12xf32>, vector<16x116xf32> -> vector<16x128xf32>
      %473 = arith.addf %468, %472 : vector<16x128xf32>
      %474 = vector.extract_strided_slice %462 {offsets = [3, 0], sizes = [16, 128], strides = [1, 1]} : vector<20x128xf32> to vector<16x128xf32>
      %cst_195 = arith.constant 0.000000e+00 : f32
      %475 = vector.broadcast %cst_195 : f32 to vector<16x18xf32>
      %476 = vector.extract_strided_slice %474 {offsets = [0, 0], sizes = [16, 110], strides = [1, 1]} : vector<16x128xf32> to vector<16x110xf32>
      %477 = tpu.concatenate %475, %476 in 1 : vector<16x18xf32>, vector<16x110xf32> -> vector<16x128xf32>
      %478 = arith.addf %473, %477 : vector<16x128xf32>
      %479 = vector.extract_strided_slice %462 {offsets = [4, 0], sizes = [16, 128], strides = [1, 1]} : vector<20x128xf32> to vector<16x128xf32>
      %cst_196 = arith.constant 0.000000e+00 : f32
      %480 = vector.broadcast %cst_196 : f32 to vector<16x24xf32>
      %481 = vector.extract_strided_slice %479 {offsets = [0, 0], sizes = [16, 104], strides = [1, 1]} : vector<16x128xf32> to vector<16x104xf32>
      %482 = tpu.concatenate %480, %481 in 1 : vector<16x24xf32>, vector<16x104xf32> -> vector<16x128xf32>
      %483 = arith.addf %478, %482 : vector<16x128xf32>
      %484 = vector.extract_strided_slice %483 {offsets = [0, 0], sizes = [16, 32], strides = [1, 1]} : vector<16x128xf32> to vector<16x32xf32>
      %c192_197 = arith.constant 192 : index
      %c0_198 = arith.constant 0 : index
      %485 = vector.load %arg14[%c192_197, %c0_198] : memref<224x32xf32, #tpu.memory_space<vmem>>, vector<16x32xf32>
      tpu.vector_store %arg14[%c192_197, %c0_198], %484 {strides = array<i32>} : memref<224x32xf32, #tpu.memory_space<vmem>>, vector<16x32xf32>,
      %c832 = arith.constant 832 : index
      %c0_199 = arith.constant 0 : index
      %486 = vector.load %arg13[%c832, %c0_199] : memref<904x128xf32, #tpu.memory_space<vmem>>, vector<20x128xf32>
      %c848 = arith.constant 848 : index
      %c0_200 = arith.constant 0 : index
      %487 = vector.load %arg13[%c848, %c0_200] : memref<904x128xf32, #tpu.memory_space<vmem>>, vector<20x128xf32>
      %488 = arith.maximumf %486, %487 : vector<20x128xf32>
      %c864 = arith.constant 864 : index
      %c0_201 = arith.constant 0 : index
      %489 = vector.load %arg13[%c864, %c0_201] : memref<904x128xf32, #tpu.memory_space<vmem>>, vector<20x128xf32>
      %c880 = arith.constant 880 : index
      %c0_202 = arith.constant 0 : index
      %490 = vector.load %arg13[%c880, %c0_202] : memref<904x128xf32, #tpu.memory_space<vmem>>, vector<20x128xf32>
      %491 = arith.maximumf %489, %490 : vector<20x128xf32>
      %492 = arith.maximumf %488, %491 : vector<20x128xf32>
      %493 = vector.extract_strided_slice %492 {offsets = [0, 0], sizes = [16, 128], strides = [1, 1]} : vector<20x128xf32> to vector<16x128xf32>
      %494 = vector.extract_strided_slice %492 {offsets = [1, 0], sizes = [16, 128], strides = [1, 1]} : vector<20x128xf32> to vector<16x128xf32>
      %cst_203 = arith.constant 0.000000e+00 : f32
      %495 = vector.broadcast %cst_203 : f32 to vector<16x6xf32>
      %496 = vector.extract_strided_slice %494 {offsets = [0, 0], sizes = [16, 122], strides = [1, 1]} : vector<16x128xf32> to vector<16x122xf32>
      %497 = tpu.concatenate %495, %496 in 1 : vector<16x6xf32>, vector<16x122xf32> -> vector<16x128xf32>
      %498 = arith.addf %493, %497 : vector<16x128xf32>
      %499 = vector.extract_strided_slice %492 {offsets = [2, 0], sizes = [16, 128], strides = [1, 1]} : vector<20x128xf32> to vector<16x128xf32>
      %cst_204 = arith.constant 0.000000e+00 : f32
      %500 = vector.broadcast %cst_204 : f32 to vector<16x12xf32>
      %501 = vector.extract_strided_slice %499 {offsets = [0, 0], sizes = [16, 116], strides = [1, 1]} : vector<16x128xf32> to vector<16x116xf32>
      %502 = tpu.concatenate %500, %501 in 1 : vector<16x12xf32>, vector<16x116xf32> -> vector<16x128xf32>
      %503 = arith.addf %498, %502 : vector<16x128xf32>
      %504 = vector.extract_strided_slice %492 {offsets = [3, 0], sizes = [16, 128], strides = [1, 1]} : vector<20x128xf32> to vector<16x128xf32>
      %cst_205 = arith.constant 0.000000e+00 : f32
      %505 = vector.broadcast %cst_205 : f32 to vector<16x18xf32>
      %506 = vector.extract_strided_slice %504 {offsets = [0, 0], sizes = [16, 110], strides = [1, 1]} : vector<16x128xf32> to vector<16x110xf32>
      %507 = tpu.concatenate %505, %506 in 1 : vector<16x18xf32>, vector<16x110xf32> -> vector<16x128xf32>
      %508 = arith.addf %503, %507 : vector<16x128xf32>
      %509 = vector.extract_strided_slice %492 {offsets = [4, 0], sizes = [16, 128], strides = [1, 1]} : vector<20x128xf32> to vector<16x128xf32>
      %cst_206 = arith.constant 0.000000e+00 : f32
      %510 = vector.broadcast %cst_206 : f32 to vector<16x24xf32>
      %511 = vector.extract_strided_slice %509 {offsets = [0, 0], sizes = [16, 104], strides = [1, 1]} : vector<16x128xf32> to vector<16x104xf32>
      %512 = tpu.concatenate %510, %511 in 1 : vector<16x24xf32>, vector<16x104xf32> -> vector<16x128xf32>
      %513 = arith.addf %508, %512 : vector<16x128xf32>
      %514 = vector.extract_strided_slice %513 {offsets = [0, 0], sizes = [16, 32], strides = [1, 1]} : vector<16x128xf32> to vector<16x32xf32>
      %c208_207 = arith.constant 208 : index
      %c0_208 = arith.constant 0 : index
      %515 = vector.load %arg14[%c208_207, %c0_208] : memref<224x32xf32, #tpu.memory_space<vmem>>, vector<16x32xf32>
      tpu.vector_store %arg14[%c208_207, %c0_208], %514 {strides = array<i32>} : memref<224x32xf32, #tpu.memory_space<vmem>>, vector<16x32xf32>,
      %c0_209 = arith.constant 0 : index
      %c0_210 = arith.constant 0 : index
      %516 = vector.load %arg14[%c0_209, %c0_210] : memref<224x32xf32, #tpu.memory_space<vmem>>, vector<160x32xf32>
      %517 = arith.truncf %516 : vector<160x32xf32> to vector<160x32xbf16>
      %c0_211 = arith.constant 0 : index
      %c0_212 = arith.constant 0 : index
      %c0_213 = arith.constant 0 : index
      %518 = vector.load %arg4[%c0_211, %c0_212, %c0_213] : memref<5x32x128xbf16, #tpu.memory_space<vmem>>, vector<1x32x128xbf16>
      %519 = vector.shape_cast %518 : vector<1x32x128xbf16> to vector<32x128xbf16>
      %cst_214 = arith.constant dense<0.000000e+00> : vector<160x128xf32>
      %520 = tpu.matmul %517, %519, %cst_214 {dimension_numbers = #tpu.dot_dimension_numbers<[1], [0], [0], [1], [0, 0, 1, 1], [], []>} : vector<160x32xbf16>, vector<32x128xbf16>, vector<160x128xf32> -> vector<160x128xf32>
      %c16_215 = arith.constant 16 : index
      %c0_216 = arith.constant 0 : index
      %521 = vector.load %arg14[%c16_215, %c0_216] : memref<224x32xf32, #tpu.memory_space<vmem>>, vector<160x32xf32>
      %522 = arith.truncf %521 : vector<160x32xf32> to vector<160x32xbf16>
      %c1 = arith.constant 1 : index
      %c0_217 = arith.constant 0 : index
      %c0_218 = arith.constant 0 : index
      %523 = vector.load %arg4[%c1, %c0_217, %c0_218] : memref<5x32x128xbf16, #tpu.memory_space<vmem>>, vector<1x32x128xbf16>
      %524 = vector.shape_cast %523 : vector<1x32x128xbf16> to vector<32x128xbf16>
      %cst_219 = arith.constant dense<0.000000e+00> : vector<160x128xf32>
      %525 = tpu.matmul %522, %524, %cst_219 {dimension_numbers = #tpu.dot_dimension_numbers<[1], [0], [0], [1], [0, 0, 1, 1], [], []>} : vector<160x32xbf16>, vector<32x128xbf16>, vector<160x128xf32> -> vector<160x128xf32>
      %526 = arith.addf %520, %525 : vector<160x128xf32>
      %c32_220 = arith.constant 32 : index
      %c0_221 = arith.constant 0 : index
      %527 = vector.load %arg14[%c32_220, %c0_221] : memref<224x32xf32, #tpu.memory_space<vmem>>, vector<160x32xf32>
      %528 = arith.truncf %527 : vector<160x32xf32> to vector<160x32xbf16>
      %c2 = arith.constant 2 : index
      %c0_222 = arith.constant 0 : index
      %c0_223 = arith.constant 0 : index
      %529 = vector.load %arg4[%c2, %c0_222, %c0_223] : memref<5x32x128xbf16, #tpu.memory_space<vmem>>, vector<1x32x128xbf16>
      %530 = vector.shape_cast %529 : vector<1x32x128xbf16> to vector<32x128xbf16>
      %cst_224 = arith.constant dense<0.000000e+00> : vector<160x128xf32>
      %531 = tpu.matmul %528, %530, %cst_224 {dimension_numbers = #tpu.dot_dimension_numbers<[1], [0], [0], [1], [0, 0, 1, 1], [], []>} : vector<160x32xbf16>, vector<32x128xbf16>, vector<160x128xf32> -> vector<160x128xf32>
      %532 = arith.addf %526, %531 : vector<160x128xf32>
      %c48_225 = arith.constant 48 : index
      %c0_226 = arith.constant 0 : index
      %533 = vector.load %arg14[%c48_225, %c0_226] : memref<224x32xf32, #tpu.memory_space<vmem>>, vector<160x32xf32>
      %534 = arith.truncf %533 : vector<160x32xf32> to vector<160x32xbf16>
      %c3 = arith.constant 3 : index
      %c0_227 = arith.constant 0 : index
      %c0_228 = arith.constant 0 : index
      %535 = vector.load %arg4[%c3, %c0_227, %c0_228] : memref<5x32x128xbf16, #tpu.memory_space<vmem>>, vector<1x32x128xbf16>
      %536 = vector.shape_cast %535 : vector<1x32x128xbf16> to vector<32x128xbf16>
      %cst_229 = arith.constant dense<0.000000e+00> : vector<160x128xf32>
      %537 = tpu.matmul %534, %536, %cst_229 {dimension_numbers = #tpu.dot_dimension_numbers<[1], [0], [0], [1], [0, 0, 1, 1], [], []>} : vector<160x32xbf16>, vector<32x128xbf16>, vector<160x128xf32> -> vector<160x128xf32>
      %538 = arith.addf %532, %537 : vector<160x128xf32>
      %c64_230 = arith.constant 64 : index
      %c0_231 = arith.constant 0 : index
      %539 = vector.load %arg14[%c64_230, %c0_231] : memref<224x32xf32, #tpu.memory_space<vmem>>, vector<160x32xf32>
      %540 = arith.truncf %539 : vector<160x32xf32> to vector<160x32xbf16>
      %c4 = arith.constant 4 : index
      %c0_232 = arith.constant 0 : index
      %c0_233 = arith.constant 0 : index
      %541 = vector.load %arg4[%c4, %c0_232, %c0_233] : memref<5x32x128xbf16, #tpu.memory_space<vmem>>, vector<1x32x128xbf16>
      %542 = vector.shape_cast %541 : vector<1x32x128xbf16> to vector<32x128xbf16>
      %cst_234 = arith.constant dense<0.000000e+00> : vector<160x128xf32>
      %543 = tpu.matmul %540, %542, %cst_234 {dimension_numbers = #tpu.dot_dimension_numbers<[1], [0], [0], [1], [0, 0, 1, 1], [], []>} : vector<160x32xbf16>, vector<32x128xbf16>, vector<160x128xf32> -> vector<160x128xf32>
      %544 = arith.addf %538, %543 : vector<160x128xf32>
      %c0_235 = arith.constant 0 : index
      %c0_236 = arith.constant 0 : index
      %545 = vector.load %arg5[%c0_235, %c0_236] : memref<1x128xf32, #tpu.memory_space<vmem>>, vector<1x128xf32>
      %546 = vector.broadcast %545 : vector<1x128xf32> to vector<160x128xf32>
      %547 = arith.addf %544, %546 : vector<160x128xf32>
      %cst_237 = arith.constant 0.000000e+00 : f32
      %548 = vector.broadcast %cst_237 : f32 to vector<160x128xf32>
      %549 = arith.maximumf %547, %548 : vector<160x128xf32>
      %c0_238 = arith.constant 0 : index
      %c0_239 = arith.constant 0 : index
      %550 = vector.load %arg15[%c0_238, %c0_239] : memref<160x128xf32, #tpu.memory_space<vmem>>, vector<160x128xf32>
      tpu.vector_store %arg15[%c0_238, %c0_239], %549 {strides = array<i32>} : memref<160x128xf32, #tpu.memory_space<vmem>>, vector<160x128xf32>,
      %c0_240 = arith.constant 0 : index
      %c0_241 = arith.constant 0 : index
      %551 = vector.load %arg15[%c0_240, %c0_241] : memref<160x128xf32, #tpu.memory_space<vmem>>, vector<16x128xf32>
      %c16_242 = arith.constant 16 : index
      %c0_243 = arith.constant 0 : index
      %552 = vector.load %arg15[%c16_242, %c0_243] : memref<160x128xf32, #tpu.memory_space<vmem>>, vector<16x128xf32>
      %553 = arith.maximumf %551, %552 : vector<16x128xf32>
      %554 = arith.truncf %553 : vector<16x128xf32> to vector<16x128xbf16>
      %cst_244 = arith.constant dense<0.000000e+00> : vector<8x128xf32>
      %555 = tpu.matmul %10, %554, %cst_244 {dimension_numbers = #tpu.dot_dimension_numbers<[1], [0], [0], [1], [0, 0, 1, 1], [], []>} : vector<8x16xbf16>, vector<16x128xbf16>, vector<8x128xf32> -> vector<8x128xf32>
      %cst_245 = arith.constant dense<0.000000e+00> : vector<8x128xf32>
      %556 = tpu.matmul %21, %554, %cst_245 {dimension_numbers = #tpu.dot_dimension_numbers<[1], [0], [0], [1], [0, 0, 1, 1], [], []>} : vector<8x16xbf16>, vector<16x128xbf16>, vector<8x128xf32> -> vector<8x128xf32>
      %557 = arith.maximumf %555, %556 : vector<8x128xf32>
      %558 = vector.extract_strided_slice %557 {offsets = [0, 0], sizes = [1, 128], strides = [1, 1]} : vector<8x128xf32> to vector<1x128xf32>
      %559 = vector.extract_strided_slice %557 {offsets = [1, 0], sizes = [1, 128], strides = [1, 1]} : vector<8x128xf32> to vector<1x128xf32>
      %cst_246 = arith.constant 0.000000e+00 : f32
      %560 = vector.broadcast %cst_246 : f32 to vector<1x16xf32>
      %561 = vector.extract_strided_slice %559 {offsets = [0, 0], sizes = [1, 112], strides = [1, 1]} : vector<1x128xf32> to vector<1x112xf32>
      %562 = tpu.concatenate %560, %561 in 1 : vector<1x16xf32>, vector<1x112xf32> -> vector<1x128xf32>
      %563 = arith.addf %558, %562 : vector<1x128xf32>
      %564 = vector.extract_strided_slice %557 {offsets = [2, 0], sizes = [1, 128], strides = [1, 1]} : vector<8x128xf32> to vector<1x128xf32>
      %cst_247 = arith.constant 0.000000e+00 : f32
      %565 = vector.broadcast %cst_247 : f32 to vector<1x32xf32>
      %566 = vector.extract_strided_slice %564 {offsets = [0, 0], sizes = [1, 96], strides = [1, 1]} : vector<1x128xf32> to vector<1x96xf32>
      %567 = tpu.concatenate %565, %566 in 1 : vector<1x32xf32>, vector<1x96xf32> -> vector<1x128xf32>
      %568 = arith.addf %563, %567 : vector<1x128xf32>
      %569 = vector.extract_strided_slice %557 {offsets = [3, 0], sizes = [1, 128], strides = [1, 1]} : vector<8x128xf32> to vector<1x128xf32>
      %cst_248 = arith.constant 0.000000e+00 : f32
      %570 = vector.broadcast %cst_248 : f32 to vector<1x48xf32>
      %571 = vector.extract_strided_slice %569 {offsets = [0, 0], sizes = [1, 80], strides = [1, 1]} : vector<1x128xf32> to vector<1x80xf32>
      %572 = tpu.concatenate %570, %571 in 1 : vector<1x48xf32>, vector<1x80xf32> -> vector<1x128xf32>
      %573 = arith.addf %568, %572 : vector<1x128xf32>
      %574 = vector.extract_strided_slice %557 {offsets = [4, 0], sizes = [1, 128], strides = [1, 1]} : vector<8x128xf32> to vector<1x128xf32>
      %cst_249 = arith.constant 0.000000e+00 : f32
      %575 = vector.broadcast %cst_249 : f32 to vector<1x64xf32>
      %576 = vector.extract_strided_slice %574 {offsets = [0, 0], sizes = [1, 64], strides = [1, 1]} : vector<1x128xf32> to vector<1x64xf32>
      %577 = tpu.concatenate %575, %576 in 1 : vector<1x64xf32>, vector<1x64xf32> -> vector<1x128xf32>
      %578 = arith.addf %573, %577 : vector<1x128xf32>
      %c32_250 = arith.constant 32 : index
      %c0_251 = arith.constant 0 : index
      %579 = vector.load %arg15[%c32_250, %c0_251] : memref<160x128xf32, #tpu.memory_space<vmem>>, vector<16x128xf32>
      %c48_252 = arith.constant 48 : index
      %c0_253 = arith.constant 0 : index
      %580 = vector.load %arg15[%c48_252, %c0_253] : memref<160x128xf32, #tpu.memory_space<vmem>>, vector<16x128xf32>
      %581 = arith.maximumf %579, %580 : vector<16x128xf32>
      %582 = arith.truncf %581 : vector<16x128xf32> to vector<16x128xbf16>
      %cst_254 = arith.constant dense<0.000000e+00> : vector<8x128xf32>
      %583 = tpu.matmul %10, %582, %cst_254 {dimension_numbers = #tpu.dot_dimension_numbers<[1], [0], [0], [1], [0, 0, 1, 1], [], []>} : vector<8x16xbf16>, vector<16x128xbf16>, vector<8x128xf32> -> vector<8x128xf32>
      %cst_255 = arith.constant dense<0.000000e+00> : vector<8x128xf32>
      %584 = tpu.matmul %21, %582, %cst_255 {dimension_numbers = #tpu.dot_dimension_numbers<[1], [0], [0], [1], [0, 0, 1, 1], [], []>} : vector<8x16xbf16>, vector<16x128xbf16>, vector<8x128xf32> -> vector<8x128xf32>
      %585 = arith.maximumf %583, %584 : vector<8x128xf32>
      %586 = vector.extract_strided_slice %585 {offsets = [0, 0], sizes = [1, 128], strides = [1, 1]} : vector<8x128xf32> to vector<1x128xf32>
      %587 = vector.extract_strided_slice %585 {offsets = [1, 0], sizes = [1, 128], strides = [1, 1]} : vector<8x128xf32> to vector<1x128xf32>
      %cst_256 = arith.constant 0.000000e+00 : f32
      %588 = vector.broadcast %cst_256 : f32 to vector<1x16xf32>
      %589 = vector.extract_strided_slice %587 {offsets = [0, 0], sizes = [1, 112], strides = [1, 1]} : vector<1x128xf32> to vector<1x112xf32>
      %590 = tpu.concatenate %588, %589 in 1 : vector<1x16xf32>, vector<1x112xf32> -> vector<1x128xf32>
      %591 = arith.addf %586, %590 : vector<1x128xf32>
      %592 = vector.extract_strided_slice %585 {offsets = [2, 0], sizes = [1, 128], strides = [1, 1]} : vector<8x128xf32> to vector<1x128xf32>
      %cst_257 = arith.constant 0.000000e+00 : f32
      %593 = vector.broadcast %cst_257 : f32 to vector<1x32xf32>
      %594 = vector.extract_strided_slice %592 {offsets = [0, 0], sizes = [1, 96], strides = [1, 1]} : vector<1x128xf32> to vector<1x96xf32>
      %595 = tpu.concatenate %593, %594 in 1 : vector<1x32xf32>, vector<1x96xf32> -> vector<1x128xf32>
      %596 = arith.addf %591, %595 : vector<1x128xf32>
      %597 = vector.extract_strided_slice %585 {offsets = [3, 0], sizes = [1, 128], strides = [1, 1]} : vector<8x128xf32> to vector<1x128xf32>
      %cst_258 = arith.constant 0.000000e+00 : f32
      %598 = vector.broadcast %cst_258 : f32 to vector<1x48xf32>
      %599 = vector.extract_strided_slice %597 {offsets = [0, 0], sizes = [1, 80], strides = [1, 1]} : vector<1x128xf32> to vector<1x80xf32>
      %600 = tpu.concatenate %598, %599 in 1 : vector<1x48xf32>, vector<1x80xf32> -> vector<1x128xf32>
      %601 = arith.addf %596, %600 : vector<1x128xf32>
      %602 = vector.extract_strided_slice %585 {offsets = [4, 0], sizes = [1, 128], strides = [1, 1]} : vector<8x128xf32> to vector<1x128xf32>
      %cst_259 = arith.constant 0.000000e+00 : f32
      %603 = vector.broadcast %cst_259 : f32 to vector<1x64xf32>
      %604 = vector.extract_strided_slice %602 {offsets = [0, 0], sizes = [1, 64], strides = [1, 1]} : vector<1x128xf32> to vector<1x64xf32>
      %605 = tpu.concatenate %603, %604 in 1 : vector<1x64xf32>, vector<1x64xf32> -> vector<1x128xf32>
      %606 = arith.addf %601, %605 : vector<1x128xf32>
      %c64_260 = arith.constant 64 : index
      %c0_261 = arith.constant 0 : index
      %607 = vector.load %arg15[%c64_260, %c0_261] : memref<160x128xf32, #tpu.memory_space<vmem>>, vector<16x128xf32>
      %c80_262 = arith.constant 80 : index
      %c0_263 = arith.constant 0 : index
      %608 = vector.load %arg15[%c80_262, %c0_263] : memref<160x128xf32, #tpu.memory_space<vmem>>, vector<16x128xf32>
      %609 = arith.maximumf %607, %608 : vector<16x128xf32>
      %610 = arith.truncf %609 : vector<16x128xf32> to vector<16x128xbf16>
      %cst_264 = arith.constant dense<0.000000e+00> : vector<8x128xf32>
      %611 = tpu.matmul %10, %610, %cst_264 {dimension_numbers = #tpu.dot_dimension_numbers<[1], [0], [0], [1], [0, 0, 1, 1], [], []>} : vector<8x16xbf16>, vector<16x128xbf16>, vector<8x128xf32> -> vector<8x128xf32>
      %cst_265 = arith.constant dense<0.000000e+00> : vector<8x128xf32>
      %612 = tpu.matmul %21, %610, %cst_265 {dimension_numbers = #tpu.dot_dimension_numbers<[1], [0], [0], [1], [0, 0, 1, 1], [], []>} : vector<8x16xbf16>, vector<16x128xbf16>, vector<8x128xf32> -> vector<8x128xf32>
      %613 = arith.maximumf %611, %612 : vector<8x128xf32>
      %614 = vector.extract_strided_slice %613 {offsets = [0, 0], sizes = [1, 128], strides = [1, 1]} : vector<8x128xf32> to vector<1x128xf32>
      %615 = vector.extract_strided_slice %613 {offsets = [1, 0], sizes = [1, 128], strides = [1, 1]} : vector<8x128xf32> to vector<1x128xf32>
      %cst_266 = arith.constant 0.000000e+00 : f32
      %616 = vector.broadcast %cst_266 : f32 to vector<1x16xf32>
      %617 = vector.extract_strided_slice %615 {offsets = [0, 0], sizes = [1, 112], strides = [1, 1]} : vector<1x128xf32> to vector<1x112xf32>
      %618 = tpu.concatenate %616, %617 in 1 : vector<1x16xf32>, vector<1x112xf32> -> vector<1x128xf32>
      %619 = arith.addf %614, %618 : vector<1x128xf32>
      %620 = vector.extract_strided_slice %613 {offsets = [2, 0], sizes = [1, 128], strides = [1, 1]} : vector<8x128xf32> to vector<1x128xf32>
      %cst_267 = arith.constant 0.000000e+00 : f32
      %621 = vector.broadcast %cst_267 : f32 to vector<1x32xf32>
      %622 = vector.extract_strided_slice %620 {offsets = [0, 0], sizes = [1, 96], strides = [1, 1]} : vector<1x128xf32> to vector<1x96xf32>
      %623 = tpu.concatenate %621, %622 in 1 : vector<1x32xf32>, vector<1x96xf32> -> vector<1x128xf32>
      %624 = arith.addf %619, %623 : vector<1x128xf32>
      %625 = vector.extract_strided_slice %613 {offsets = [3, 0], sizes = [1, 128], strides = [1, 1]} : vector<8x128xf32> to vector<1x128xf32>
      %cst_268 = arith.constant 0.000000e+00 : f32
      %626 = vector.broadcast %cst_268 : f32 to vector<1x48xf32>
      %627 = vector.extract_strided_slice %625 {offsets = [0, 0], sizes = [1, 80], strides = [1, 1]} : vector<1x128xf32> to vector<1x80xf32>
      %628 = tpu.concatenate %626, %627 in 1 : vector<1x48xf32>, vector<1x80xf32> -> vector<1x128xf32>
      %629 = arith.addf %624, %628 : vector<1x128xf32>
      %630 = vector.extract_strided_slice %613 {offsets = [4, 0], sizes = [1, 128], strides = [1, 1]} : vector<8x128xf32> to vector<1x128xf32>
      %cst_269 = arith.constant 0.000000e+00 : f32
      %631 = vector.broadcast %cst_269 : f32 to vector<1x64xf32>
      %632 = vector.extract_strided_slice %630 {offsets = [0, 0], sizes = [1, 64], strides = [1, 1]} : vector<1x128xf32> to vector<1x64xf32>
      %633 = tpu.concatenate %631, %632 in 1 : vector<1x64xf32>, vector<1x64xf32> -> vector<1x128xf32>
      %634 = arith.addf %629, %633 : vector<1x128xf32>
      %c96_270 = arith.constant 96 : index
      %c0_271 = arith.constant 0 : index
      %635 = vector.load %arg15[%c96_270, %c0_271] : memref<160x128xf32, #tpu.memory_space<vmem>>, vector<16x128xf32>
      %c112_272 = arith.constant 112 : index
      %c0_273 = arith.constant 0 : index
      %636 = vector.load %arg15[%c112_272, %c0_273] : memref<160x128xf32, #tpu.memory_space<vmem>>, vector<16x128xf32>
      %637 = arith.maximumf %635, %636 : vector<16x128xf32>
      %638 = arith.truncf %637 : vector<16x128xf32> to vector<16x128xbf16>
      %cst_274 = arith.constant dense<0.000000e+00> : vector<8x128xf32>
      %639 = tpu.matmul %10, %638, %cst_274 {dimension_numbers = #tpu.dot_dimension_numbers<[1], [0], [0], [1], [0, 0, 1, 1], [], []>} : vector<8x16xbf16>, vector<16x128xbf16>, vector<8x128xf32> -> vector<8x128xf32>
      %cst_275 = arith.constant dense<0.000000e+00> : vector<8x128xf32>
      %640 = tpu.matmul %21, %638, %cst_275 {dimension_numbers = #tpu.dot_dimension_numbers<[1], [0], [0], [1], [0, 0, 1, 1], [], []>} : vector<8x16xbf16>, vector<16x128xbf16>, vector<8x128xf32> -> vector<8x128xf32>
      %641 = arith.maximumf %639, %640 : vector<8x128xf32>
      %642 = vector.extract_strided_slice %641 {offsets = [0, 0], sizes = [1, 128], strides = [1, 1]} : vector<8x128xf32> to vector<1x128xf32>
      %643 = vector.extract_strided_slice %641 {offsets = [1, 0], sizes = [1, 128], strides = [1, 1]} : vector<8x128xf32> to vector<1x128xf32>
      %cst_276 = arith.constant 0.000000e+00 : f32
      %644 = vector.broadcast %cst_276 : f32 to vector<1x16xf32>
      %645 = vector.extract_strided_slice %643 {offsets = [0, 0], sizes = [1, 112], strides = [1, 1]} : vector<1x128xf32> to vector<1x112xf32>
      %646 = tpu.concatenate %644, %645 in 1 : vector<1x16xf32>, vector<1x112xf32> -> vector<1x128xf32>
      %647 = arith.addf %642, %646 : vector<1x128xf32>
      %648 = vector.extract_strided_slice %641 {offsets = [2, 0], sizes = [1, 128], strides = [1, 1]} : vector<8x128xf32> to vector<1x128xf32>
      %cst_277 = arith.constant 0.000000e+00 : f32
      %649 = vector.broadcast %cst_277 : f32 to vector<1x32xf32>
      %650 = vector.extract_strided_slice %648 {offsets = [0, 0], sizes = [1, 96], strides = [1, 1]} : vector<1x128xf32> to vector<1x96xf32>
      %651 = tpu.concatenate %649, %650 in 1 : vector<1x32xf32>, vector<1x96xf32> -> vector<1x128xf32>
      %652 = arith.addf %647, %651 : vector<1x128xf32>
      %653 = vector.extract_strided_slice %641 {offsets = [3, 0], sizes = [1, 128], strides = [1, 1]} : vector<8x128xf32> to vector<1x128xf32>
      %cst_278 = arith.constant 0.000000e+00 : f32
      %654 = vector.broadcast %cst_278 : f32 to vector<1x48xf32>
      %655 = vector.extract_strided_slice %653 {offsets = [0, 0], sizes = [1, 80], strides = [1, 1]} : vector<1x128xf32> to vector<1x80xf32>
      %656 = tpu.concatenate %654, %655 in 1 : vector<1x48xf32>, vector<1x80xf32> -> vector<1x128xf32>
      %657 = arith.addf %652, %656 : vector<1x128xf32>
      %658 = vector.extract_strided_slice %641 {offsets = [4, 0], sizes = [1, 128], strides = [1, 1]} : vector<8x128xf32> to vector<1x128xf32>
      %cst_279 = arith.constant 0.000000e+00 : f32
      %659 = vector.broadcast %cst_279 : f32 to vector<1x64xf32>
      %660 = vector.extract_strided_slice %658 {offsets = [0, 0], sizes = [1, 64], strides = [1, 1]} : vector<1x128xf32> to vector<1x64xf32>
      %661 = tpu.concatenate %659, %660 in 1 : vector<1x64xf32>, vector<1x64xf32> -> vector<1x128xf32>
      %662 = arith.addf %657, %661 : vector<1x128xf32>
      %c128_280 = arith.constant 128 : index
      %c0_281 = arith.constant 0 : index
      %663 = vector.load %arg15[%c128_280, %c0_281] : memref<160x128xf32, #tpu.memory_space<vmem>>, vector<16x128xf32>
      %c144_282 = arith.constant 144 : index
      %c0_283 = arith.constant 0 : index
      %664 = vector.load %arg15[%c144_282, %c0_283] : memref<160x128xf32, #tpu.memory_space<vmem>>, vector<16x128xf32>
      %665 = arith.maximumf %663, %664 : vector<16x128xf32>
      %666 = arith.truncf %665 : vector<16x128xf32> to vector<16x128xbf16>
      %cst_284 = arith.constant dense<0.000000e+00> : vector<8x128xf32>
      %667 = tpu.matmul %10, %666, %cst_284 {dimension_numbers = #tpu.dot_dimension_numbers<[1], [0], [0], [1], [0, 0, 1, 1], [], []>} : vector<8x16xbf16>, vector<16x128xbf16>, vector<8x128xf32> -> vector<8x128xf32>
      %cst_285 = arith.constant dense<0.000000e+00> : vector<8x128xf32>
      %668 = tpu.matmul %21, %666, %cst_285 {dimension_numbers = #tpu.dot_dimension_numbers<[1], [0], [0], [1], [0, 0, 1, 1], [], []>} : vector<8x16xbf16>, vector<16x128xbf16>, vector<8x128xf32> -> vector<8x128xf32>
      %669 = arith.maximumf %667, %668 : vector<8x128xf32>
      %670 = vector.extract_strided_slice %669 {offsets = [0, 0], sizes = [1, 128], strides = [1, 1]} : vector<8x128xf32> to vector<1x128xf32>
      %671 = vector.extract_strided_slice %669 {offsets = [1, 0], sizes = [1, 128], strides = [1, 1]} : vector<8x128xf32> to vector<1x128xf32>
      %cst_286 = arith.constant 0.000000e+00 : f32
      %672 = vector.broadcast %cst_286 : f32 to vector<1x16xf32>
      %673 = vector.extract_strided_slice %671 {offsets = [0, 0], sizes = [1, 112], strides = [1, 1]} : vector<1x128xf32> to vector<1x112xf32>
      %674 = tpu.concatenate %672, %673 in 1 : vector<1x16xf32>, vector<1x112xf32> -> vector<1x128xf32>
      %675 = arith.addf %670, %674 : vector<1x128xf32>
      %676 = vector.extract_strided_slice %669 {offsets = [2, 0], sizes = [1, 128], strides = [1, 1]} : vector<8x128xf32> to vector<1x128xf32>
      %cst_287 = arith.constant 0.000000e+00 : f32
      %677 = vector.broadcast %cst_287 : f32 to vector<1x32xf32>
      %678 = vector.extract_strided_slice %676 {offsets = [0, 0], sizes = [1, 96], strides = [1, 1]} : vector<1x128xf32> to vector<1x96xf32>
      %679 = tpu.concatenate %677, %678 in 1 : vector<1x32xf32>, vector<1x96xf32> -> vector<1x128xf32>
      %680 = arith.addf %675, %679 : vector<1x128xf32>
      %681 = vector.extract_strided_slice %669 {offsets = [3, 0], sizes = [1, 128], strides = [1, 1]} : vector<8x128xf32> to vector<1x128xf32>
      %cst_288 = arith.constant 0.000000e+00 : f32
      %682 = vector.broadcast %cst_288 : f32 to vector<1x48xf32>
      %683 = vector.extract_strided_slice %681 {offsets = [0, 0], sizes = [1, 80], strides = [1, 1]} : vector<1x128xf32> to vector<1x80xf32>
      %684 = tpu.concatenate %682, %683 in 1 : vector<1x48xf32>, vector<1x80xf32> -> vector<1x128xf32>
      %685 = arith.addf %680, %684 : vector<1x128xf32>
      %686 = vector.extract_strided_slice %669 {offsets = [4, 0], sizes = [1, 128], strides = [1, 1]} : vector<8x128xf32> to vector<1x128xf32>
      %cst_289 = arith.constant 0.000000e+00 : f32
      %687 = vector.broadcast %cst_289 : f32 to vector<1x64xf32>
      %688 = vector.extract_strided_slice %686 {offsets = [0, 0], sizes = [1, 64], strides = [1, 1]} : vector<1x128xf32> to vector<1x64xf32>
      %689 = tpu.concatenate %687, %688 in 1 : vector<1x64xf32>, vector<1x64xf32> -> vector<1x128xf32>
      %690 = arith.addf %685, %689 : vector<1x128xf32>
      %691 = tpu.concatenate %578, %606, %634, %662, %690 in 1 : vector<1x128xf32>, vector<1x128xf32>, vector<1x128xf32>, vector<1x128xf32>, vector<1x128xf32> -> vector<1x640xf32>
      %692 = arith.index_cast %51 : i32 to index
      %c0_290 = arith.constant 0 : index
      %c0_291 = arith.constant 0 : index
      %693 = vector.load %arg16[%692, %c0_290, %c0_291] : memref<8x1x640xf32, #tpu.memory_space<vmem>>, vector<1x1x640xf32>
      %694 = vector.shape_cast %693 : vector<1x1x640xf32> to vector<1x640xf32>
      %695 = vector.shape_cast %691 : vector<1x640xf32> to vector<1x1x640xf32>
      tpu.vector_store %arg16[%692, %c0_290, %c0_291], %695 {strides = array<i32>} : memref<8x1x640xf32, #tpu.memory_space<vmem>>, vector<1x1x640xf32>,
    }
    %c8_i32_3 = arith.constant 8 : i32
    %c0_4 = arith.constant 0 : index
    %c0_5 = arith.constant 0 : index
    %c0_6 = arith.constant 0 : index
    %25 = vector.load %arg16[%c0_4, %c0_5, %c0_6] : memref<8x1x640xf32, #tpu.memory_space<vmem>>, vector<8x1x640xf32>
    %26 = vector.shape_cast %25 : vector<8x1x640xf32> to vector<8x640xf32>
    %27 = arith.truncf %26 : vector<8x640xf32> to vector<8x640xbf16>
    %c0_7 = arith.constant 0 : index
    %c0_8 = arith.constant 0 : index
    %28 = vector.load %arg6[%c0_7, %c0_8] : memref<640x128xbf16, #tpu.memory_space<vmem>>, vector<640x128xbf16>
    %cst_9 = arith.constant dense<0.000000e+00> : vector<8x128xf32>
    %29 = tpu.matmul %27, %28, %cst_9 {dimension_numbers = #tpu.dot_dimension_numbers<[1], [0], [0], [1], [0, 0, 1, 1], [], []>} : vector<8x640xbf16>, vector<640x128xbf16>, vector<8x128xf32> -> vector<8x128xf32>
    %c0_10 = arith.constant 0 : index
    %c0_11 = arith.constant 0 : index
    %30 = vector.load %arg7[%c0_10, %c0_11] : memref<1x128xf32, #tpu.memory_space<vmem>>, vector<1x128xf32>
    %31 = vector.broadcast %30 : vector<1x128xf32> to vector<8x128xf32>
    %32 = arith.addf %29, %31 : vector<8x128xf32>
    %cst_12 = arith.constant 0.000000e+00 : f32
    %33 = vector.broadcast %cst_12 : f32 to vector<8x128xf32>
    %34 = arith.maximumf %32, %33 : vector<8x128xf32>
    %35 = arith.truncf %34 : vector<8x128xf32> to vector<8x128xbf16>
    %c0_13 = arith.constant 0 : index
    %c0_14 = arith.constant 0 : index
    %36 = vector.load %arg8[%c0_13, %c0_14] : memref<128x128xbf16, #tpu.memory_space<vmem>>, vector<128x128xbf16>
    %cst_15 = arith.constant dense<0.000000e+00> : vector<8x128xf32>
    %37 = tpu.matmul %35, %36, %cst_15 {dimension_numbers = #tpu.dot_dimension_numbers<[1], [0], [0], [1], [0, 0, 1, 1], [], []>} : vector<8x128xbf16>, vector<128x128xbf16>, vector<8x128xf32> -> vector<8x128xf32>
    %c0_16 = arith.constant 0 : index
    %c0_17 = arith.constant 0 : index
    %38 = vector.load %arg9[%c0_16, %c0_17] : memref<1x128xf32, #tpu.memory_space<vmem>>, vector<1x128xf32>
    %39 = vector.broadcast %38 : vector<1x128xf32> to vector<8x128xf32>
    %40 = arith.addf %37, %39 : vector<8x128xf32>
    %cst_18 = arith.constant 0.000000e+00 : f32
    %41 = vector.broadcast %cst_18 : f32 to vector<8x128xf32>
    %42 = arith.maximumf %40, %41 : vector<8x128xf32>
    %43 = arith.truncf %42 : vector<8x128xf32> to vector<8x128xbf16>
    %c0_19 = arith.constant 0 : index
    %c0_20 = arith.constant 0 : index
    %44 = vector.load %arg10[%c0_19, %c0_20] : memref<128x128xbf16, #tpu.memory_space<vmem>>, vector<128x128xbf16>
    %cst_21 = arith.constant dense<0.000000e+00> : vector<8x128xf32>
    %45 = tpu.matmul %43, %44, %cst_21 {dimension_numbers = #tpu.dot_dimension_numbers<[1], [0], [0], [1], [0, 0, 1, 1], [], []>} : vector<8x128xbf16>, vector<128x128xbf16>, vector<8x128xf32> -> vector<8x128xf32>
    %c0_22 = arith.constant 0 : index
    %c0_23 = arith.constant 0 : index
    %46 = vector.load %arg11[%c0_22, %c0_23] : memref<1x128xf32, #tpu.memory_space<vmem>>, vector<1x128xf32>
    %47 = vector.broadcast %46 : vector<1x128xf32> to vector<8x128xf32>
    %48 = arith.addf %45, %47 : vector<8x128xf32>
    %c0_24 = arith.constant 0 : index
    %c0_25 = arith.constant 0 : index
    %49 = vector.load %arg12[%c0_24, %c0_25] : memref<8x128xf32, #tpu.memory_space<vmem>>, vector<8x128xf32>
    tpu.vector_store %arg12[%c0_24, %c0_25], %48 {strides = array<i32>} : memref<8x128xf32, #tpu.memory_space<vmem>>, vector<8x128xf32>,
    return
  }
  func.func @transform_0(%arg0: i32) -> (i32, i32, i32) {
    %c0_i32 = arith.constant 0 : i32
    %c0_i32_0 = arith.constant 0 : i32
    %c0_i32_1 = arith.constant 0 : i32
    return %arg0, %c0_i32, %c0_i32_0 : i32, i32, i32
  }
  func.func @transform_1(%arg0: i32) -> (i32, i32) {
    %c0_i32 = arith.constant 0 : i32
    %c0_i32_0 = arith.constant 0 : i32
    %c0_i32_1 = arith.constant 0 : i32
    return %c0_i32, %c0_i32_0 : i32, i32
  }
  func.func @transform_2(%arg0: i32) -> (i32, i32) {
    %c0_i32 = arith.constant 0 : i32
    %c0_i32_0 = arith.constant 0 : i32
    %c0_i32_1 = arith.constant 0 : i32
    return %c0_i32, %c0_i32_0 : i32, i32
  }
  func.func @transform_3(%arg0: i32) -> (i32, i32, i32) {
    %c0_i32 = arith.constant 0 : i32
    %c0_i32_0 = arith.constant 0 : i32
    %c0_i32_1 = arith.constant 0 : i32
    %c0_i32_2 = arith.constant 0 : i32
    return %c0_i32, %c0_i32_0, %c0_i32_1 : i32, i32, i32
  }
  func.func @transform_4(%arg0: i32) -> (i32, i32) {
    %c0_i32 = arith.constant 0 : i32
    %c0_i32_0 = arith.constant 0 : i32
    %c0_i32_1 = arith.constant 0 : i32
    return %c0_i32, %c0_i32_0 : i32, i32
  }
  func.func @transform_5(%arg0: i32) -> (i32, i32) {
    %c0_i32 = arith.constant 0 : i32
    %c0_i32_0 = arith.constant 0 : i32
    %c0_i32_1 = arith.constant 0 : i32
    return %c0_i32, %c0_i32_0 : i32, i32
  }
  func.func @transform_6(%arg0: i32) -> (i32, i32) {
    %c0_i32 = arith.constant 0 : i32
    %c0_i32_0 = arith.constant 0 : i32
    %c0_i32_1 = arith.constant 0 : i32
    return %c0_i32, %c0_i32_0 : i32, i32
  }
  func.func @transform_7(%arg0: i32) -> (i32, i32) {
    %c0_i32 = arith.constant 0 : i32
    %c0_i32_0 = arith.constant 0 : i32
    %c0_i32_1 = arith.constant 0 : i32
    return %c0_i32, %c0_i32_0 : i32, i32
  }
  func.func @transform_8(%arg0: i32) -> (i32, i32) {
    %c0_i32 = arith.constant 0 : i32
    %c0_i32_0 = arith.constant 0 : i32
    %c0_i32_1 = arith.constant 0 : i32
    return %c0_i32, %c0_i32_0 : i32, i32
  }
  func.func @transform_9(%arg0: i32) -> (i32, i32) {
    %c0_i32 = arith.constant 0 : i32
    %c0_i32_0 = arith.constant 0 : i32
    %c0_i32_1 = arith.constant 0 : i32
    return %c0_i32, %c0_i32_0 : i32, i32
  }
  func.func @transform_10(%arg0: i32) -> (i32, i32) {
    %c0_i32 = arith.constant 0 : i32
    %c0_i32_0 = arith.constant 0 : i32
    %c0_i32_1 = arith.constant 0 : i32
    return %c0_i32, %c0_i32_0 : i32, i32
  }
  func.func @transform_11(%arg0: i32) -> (i32, i32) {
    %c0_i32 = arith.constant 0 : i32
    %c0_i32_0 = arith.constant 0 : i32
    return %arg0, %c0_i32 : i32, i32
  }
}

</mosaic_0001>

<bundles_post_ra>
// kernel: net_forward_pallas.1
= control target key start
LH: loop header
LB: loop body
LE: loop exit
PB: predicated region body
PF: predicated region fallthrough
CT: control target
= control target key end

     0   :  { %s9913_s0 = inlined_call_operand.vmem [shape: bf16[16,896,80], index: 0, kind: input, shape index: {}]   ;;  %s9914_s1 = inlined_call_operand.vmem [shape: bf16[80,128], index: 1, kind: input, shape index: {}]   ;;  %s9915_s2 = inlined_call_operand.vmem [shape: f32[1,128], index: 2, kind: input, shape index: {}]   ;;  %s9916_s3 = inlined_call_operand.vmem [shape: bf16[5,32,128], index: 3, kind: input, shape index: {}]   ;;  %s9917_s4 = inlined_call_operand.vmem [shape: f32[1,128], index: 4, kind: input, shape index: {}]   ;;  %s9918_s5 = inlined_call_operand.vmem [shape: bf16[640,128], index: 5, kind: input, shape index: {}]   ;;  %s9919_s6 = inlined_call_operand.vmem [shape: f32[1,128], index: 6, kind: input, shape index: {}]   ;;  %s9920_s7 = inlined_call_operand.vmem [shape: bf16[128,128], index: 7, kind: input, shape index: {}]   ;;  %s9921_s8 = inlined_call_operand.vmem [shape: f32[1,128], index: 8, kind: input, shape index: {}]   ;;  %s9922_s9 = inlined_call_operand.vmem [shape: bf16[128,128], index: 9, kind: input, shape index: {}]   ;;  %s9923_s10 = inlined_call_operand.vmem [shape: f32[1,128], index: 10, kind: input, shape index: {}]   ;;  %s9924_s11 = inlined_call_operand.hbm [shape: f32[16,128], index: 11, kind: output, shape index: {}]  }
   0x1   :  { %9985 = sst [smem:[#allocation29_spill]] %s9913_s0 }
   0x2   :  { %16 = vsyncpa [#allocation7], 0 }
   0x3   :  { %18 = vsyncpa [#allocation7 + $0x1], 0  ;;  %s7275_s17 = smov 0   ;;  %s7277_s18 = smov 0  }
   0x4   :  { %s7279_s19 = smov 0   ;;  %s7281_s20 = smov 0  }
   0x5 LB: > { %s7296_s21 = sadd.s32 4294967295, %s7195_s20   ;;  %s6011_s22 = sadd.s32 4294967294, %s7195_s20   ;;  %s7195_s20 = sphi %s7281_s20, %s10153_s20   ;;  %s7191_s19 = sphi %s7279_s19, %s10152_s19   ;;  %s7187_s18 = sphi %s7277_s18, %s10151_s18   ;;  %s7183_s17 = sphi %s7275_s17, %s10150_s17  }
   0x6   : > { %s7300_s23 = sadd.s32 1, %s7195_s20   ;;  %s267_s24 = sadd.s32 1, %s7191_s19 }
   0x7   : > { %s264_s25 = ssub.s32 %s7195_s20, %s7300_s23  ;;  %p277_p0 = scmp.ne.s32.totalorder %s7191_s19, %s7187_s18 }
   0x8   : > { %p265_p1 = scmp.eq.s32.totalorder %s264_s25, 0  ;;  %p278_p2 = scmp.eq.s32.totalorder %s7296_s21, 1 }
   0x9   : > { %p283_p3 = scmp.ne.s32.totalorder %s7187_s18, %s7183_s17  ;;  %p284_p4 = scmp.eq.s32.totalorder %s6011_s22, 1 }
   0xa   : > { %s7311_s26 = scalar_select %p265_p1, %s7191_s19, %s267_s24  }
   0xb   : > { %p7313_p5 = por %p278_p2, %p277_p0  ;;  %p7317_p6 = por %p284_p4, %p283_p3 }
   0xc   : > { %9986 = sst [smem:[#allocation9_spill]] %s7311_s26  ;;  %p6014_p7 = scmp.ge.s32.totalorder %s7195_s20, 1 }
   0xd   : > { %p342_p8 = scmp.lt.s32.totalorder %s7195_s20, 3 }
   0xf   : > { %p343_p9 = pnand %p6014_p7, %p342_p8 }
  0x11   : > { %346 = sbr.rel (%p343_p9) target bundleno = 1894 (0x766), region = 64 }
  0x16   : > { %s9925_s29 = sand.u32 1, %s7187_s18   ;;  %s6016_s30 = sshll.u32 %s7296_s21, 3  ;;  %v9928_v0 = vlaneseq  ;;  %v9926_v1 = vmov 0.0  }
  0x17   : > { %s7327_s12 = sshll.u32 %s9925_s29, 3  ;;  %p384_p10 = scmp.lt.s32.totalorder %s6016_s30, 15  ;;  %408 = vst [vmem:[#allocation2 + $0x2a8] sm:$0xff] %v9926_v1 }
  0x18   : > { %v7331_v2 = vshrl.u32 %v9928_v0, 7  ;;  %v394_v3 = vand.u32 127, %v9928_v0  ;;  %s9990_s0 = sld [smem:[#allocation29_spill]]  ;;  %s7348_s24 = smov 0  }
  0x19   : > { %s10155_s30 = smov (!%p384_p10, %s6016_s30), 15 }
  0x1a   : > { %9989 = vst [vmem:[#allocation10_spill] sm:$0xff] %v7331_v2  ;;  %v395_v4 = vmul.u32 2, %v7331_v2  ;;  %vm397_vm0 = vcmp.lt.s32.totalorder %v7331_v2, 5  ;;  %s6927_s13 = smul.u32 448, %s10155_s30 }
  0x1c   : > { %vm396_vm1 = vcmp.eq.s32.totalorder %v394_v3, %v395_v4  ;;  %v402_v5 = vadd.s32 1, %v395_v4 }
  0x1d   : > { %vm398_vm2 = vmand %vm396_vm1, %vm397_vm0 }
  0x1e   : > { %s7339_s16 = scalar_lea.vmem %s9990_s0, %s6927_s13  ;;  %v6018_v6 = vsel %vm398_vm2, 1.0, %v9926_v1  ;;  %vm403_vm3 = vcmp.eq.s32.totalorder %v394_v3, %v402_v5 }
  0x1f   : > { %v7342_v7 = vpack.c.bf16 %v6018_v6, %v6018_v6  ;;  %vm404_vm4 = vmand %vm403_vm3, %vm397_vm0 }
  0x20   : > { %v6019_v8 = vsel %vm404_vm4, 1.0, %v9926_v1 }
  0x21   : > { %9991 = vst [vmem:[#allocation11_spill] sm:$0xff] %v7342_v7  ;;  %v7345_v9 = vpack.c.bf16 %v6019_v8, %v6019_v8 }
  0x23   : > { %9992 = vst [vmem:[#allocation12_spill] sm:$0xff] %v7345_v9 }
  0x24 LB: >> { %v6988_v10 = vld [vmem:[%s9914_s1 + $0x20] sm:$0xff]   ;;  %v6990_v12 = vld [vmem:[%s9914_s1 + $0x18] sm:$0xff]   ;;  %s6307_s26 = smul.u32 448, %s7199_s24  ;;  %v6992_v14 = vld [vmem:[%s9914_s1 + $0x10] sm:$0xff]   ;;  %vm563_vm5 = vcmask 654336   ;;  %vm1995_vm6 = vcmask 1046528   ;;  %s7199_s24 = sphi %s7348_s24, %s414_s24  }
  0x25   : >> { %v6989_v11 = vld [vmem:[%s9914_s1 + $0x20] sm:$0xff]   ;;  %6535 = vmatprep.subr.bf16.mxu0 %v6988_v10  ;;  %v6991_v13 = vld [vmem:[%s9914_s1 + $0x18] sm:$0xff]   ;;  %v6993_v15 = vld [vmem:[%s9914_s1 + $0x10] sm:$0xff]   ;;  %vm2012_vm7 = vcmask 1045504   ;;  %s7203_s13 = smov 12   ;;  %vm2029_vm8 = vcmask 1044480  }
  0x26   : >> { %6573 = vmatprep.subr.bf16.mxu1 %v6989_v11  ;;  %6536 = vmatpush3.bf16.msra.mxu0 %v6988_v10  ;;  %s7373_s29 = scalar_lea.vmem %s7339_s16, %s6307_s26  ;;  %v6994_v16 = vld [vmem:[%s9914_s1 + $0x8] sm:$0xff]   ;;  %v6996_v20 = vld [vmem:[%s9914_s1] sm:$0xff]   ;;  %v7023_v34 = vld [vmem:[%s9914_s1 + $0x18] sm:$0xff]   ;;  %s7204_s14 = smov 18   ;;  %vm2046_vm9 = vcmask 1043456   ;;  %vm2007_vm10 = vcmask 48128  }
  0x27   : >> { %6574 = vmatpush3.bf16.msra.mxu1 %v6989_v11  ;;  %6537 = vmatprep.subr.bf16.mxu0 %v6990_v12  ;;  %v6995_v17 = vld [vmem:[%s9914_s1 + $0x8] sm:$0xff]   ;;  %v6998_v18 = vld [vmem:[%s7373_s29] sm:$0xff]   ;;  %v6999_v19 = vld [vmem:[%s7373_s29 + $0x70] sm:$0xff]   ;;  %s7205_s0 = smov 24   ;;  %vm2024_vm11 = vcmask 97280   ;;  %vm2041_vm12 = vcmask 146432  }
  0x28   : >> { %6575 = vmatprep.subr.bf16.mxu1 %v6991_v13  ;;  %v6997_v21 = vld [vmem:[%s9914_s1] sm:$0xff]   ;;  %6545 = vmatprep.mubr.msk.bf16.mxu0 %vm563_vm5, %v6998_v18  ;;  %v7000_v22 = vld [vmem:[%s7373_s29 + $0x8] sm:$0xff]   ;;  %v7001_v23 = vld [vmem:[%s7373_s29 + $0x78] sm:$0xff]   ;;  %vm2058_vm13 = vcmask 195584   ;;  %vm2063_vm14 = vcmask 261120   ;;  %vm7207_vm15 = vmmov 0  }
  0x29   : >> { %6583 = vmatprep.mubr.msk.bf16.mxu1 %vm563_vm5, %v6999_v19  ;;  %v7002_v24 = vld [vmem:[%s7373_s29 + $0x10] sm:$0xff]   ;;  %v7003_v25 = vld [vmem:[%s7373_s29 + $0x80] sm:$0xff]   ;;  %v7004_v26 = vld [vmem:[%s7373_s29 + $0x18] sm:$0xff]   ;;  %vm4213_vm0 = vcmask 130048   ;;  %s7208_s25 = smov 16   ;;  %s7209_s26 = smov 64  }
  0x2a   : >> { %6538 = vmatpush3.bf16.msra.mxu0 %v6990_v12  ;;  %v7005_v27 = vld [vmem:[%s7373_s29 + $0x88] sm:$0xff]   ;;  %v7006_v28 = vld [vmem:[%s7373_s29 + $0x20] sm:$0xff]   ;;  %v7007_v29 = vld [vmem:[%s7373_s29 + $0x90] sm:$0xff]   ;;  %s7210_s30 = smov 32   ;;  %vm4318_vm1 = vcmask 392192   ;;  %vm4325_vm2 = vcmask 523264  }
  0x2b   : >> { %6576 = vmatpush3.bf16.msra.mxu1 %v6991_v13  ;;  %6539 = vmatprep.subr.bf16.mxu0 %v6992_v14  ;;  %v7018_v30 = vld [vmem:[%s9914_s1 + $0x20] sm:$0xff]   ;;  %v7008_v31 = vld [vmem:[%s7373_s29 + $0x28] sm:$0xff]   ;;  %v7009_v32 = vld [vmem:[%s7373_s29 + $0x98] sm:$0xff]  }
  0x2c   : >> { %6577 = vmatprep.subr.bf16.mxu1 %v6993_v15  ;;  %v7010_v33 = vld [vmem:[%s7373_s29 + $0x30] sm:$0xff]   ;;  %v7011_v35 = vld [vmem:[%s7373_s29 + $0xa0] sm:$0xff]   ;;  %v7012_v37 = vld [vmem:[%s7373_s29 + $0x38] sm:$0xff]  }
  0x2d   : >> { %v7024_v36 = vld [vmem:[%s9914_s1 + $0x10] sm:$0xff]   ;;  %v7029_v38 = vld [vmem:[%s9914_s1 + $0x8] sm:$0xff]   ;;  %v7014_v40 = vld [vmem:[%s7373_s29 + $0x40] sm:$0xff]  }
  0x2e   : >> { %6540 = vmatpush3.bf16.msra.mxu0 %v6992_v14  ;;  %v7013_v39 = vld [vmem:[%s7373_s29 + $0xa8] sm:$0xff]   ;;  %v7015_v41 = vld [vmem:[%s7373_s29 + $0xb0] sm:$0xff]   ;;  %v7030_v42 = vld [vmem:[%s9914_s1] sm:$0xff]  }
  0x2f   : >> { %6578 = vmatpush3.bf16.msra.mxu1 %v6993_v15  ;;  %6541 = vmatprep.subr.bf16.mxu0 %v6994_v16  ;;  %v7016_v43 = vld [vmem:[%s7373_s29 + $0x48] sm:$0xff]   ;;  %v7017_v44 = vld [vmem:[%s7373_s29 + $0xb8] sm:$0xff]   ;;  %v7019_v45 = vld [vmem:[%s7373_s29 + $0x50] sm:$0xff]  }
  0x30   : >> { %6579 = vmatprep.subr.bf16.mxu1 %v6995_v17  ;;  %v7020_v46 = vld [vmem:[%s7373_s29 + $0xc0] sm:$0xff]   ;;  %v7021_v48 = vld [vmem:[%s7373_s29 + $0x58] sm:$0xff]   ;;  %v7022_v50 = vld [vmem:[%s7373_s29 + $0xc8] sm:$0xff]  }
  0x31   : >> { %v7041_v47 = vld [vmem:[%s9914_s1 + $0x20] sm:$0xff]   ;;  %v7044_v49 = vld [vmem:[%s9914_s1 + $0x18] sm:$0xff]   ;;  %v7045_v51 = vld [vmem:[%s9914_s1 + $0x10] sm:$0xff]  }
  0x32   : >> { %6542 = vmatpush3.bf16.msra.mxu0 %v6994_v16  ;;  %v7025_v52 = vld [vmem:[%s7373_s29 + $0x60] sm:$0xff]   ;;  %v7026_v53 = vld [vmem:[%s7373_s29 + $0xd0] sm:$0xff]   ;;  %v7048_v54 = vld [vmem:[%s9914_s1 + $0x8] sm:$0xff]  }
  0x33   : >> { %6580 = vmatpush3.bf16.msra.mxu1 %v6995_v17  ;;  %6543 = vmatprep.subr.bf16.mxu0 %v6996_v20  ;;  %v7027_v55 = vld [vmem:[%s7373_s29 + $0x68] sm:$0xff]   ;;  %v7028_v56 = vld [vmem:[%s7373_s29 + $0xd8] sm:$0xff]   ;;  %v7049_v57 = vld [vmem:[%s9914_s1] sm:$0xff]  }
  0x34   : >> { %6581 = vmatprep.subr.bf16.mxu1 %v6997_v21  ;;  %v7031_v58 = vld [vmem:[%s7373_s29 + $0xe0] sm:$0xff]   ;;  %v7050_v59 = vld [vmem:[%s7373_s29 + $0x150] sm:$0xff]   ;;  %v7032_v60 = vld [vmem:[%s7373_s29 + $0xe8] sm:$0xff]  }
  0x35   : >> { %v7033_v61 = vld [vmem:[%s7373_s29 + $0xf0] sm:$0xff]   ;;  %v7051_v62 = vld [vmem:[%s7373_s29 + $0x158] sm:$0xff]   ;;  %v7052_v63 = vld [vmem:[%s7373_s29 + $0x160] sm:$0xff]  }
  0x36   : >> { %6544 = vmatpush3.bf16.msra.mxu0 %v6996_v20  ;;  %v7034_v3 = vld [vmem:[%s7373_s29 + $0xf8] sm:$0xff]   ;;  %v7035_v4 = vld [vmem:[%s7373_s29 + $0x100] sm:$0xff]   ;;  %v7053_v5 = vld [vmem:[%s7373_s29 + $0x168] sm:$0xff]  }
  0x37   : >> { %6582 = vmatpush3.bf16.msra.mxu1 %v6997_v21  ;;  %6611 = vmatprep.subr.bf16.mxu0 %v7018_v30  ;;  %v7054_v6 = vld [vmem:[%s7373_s29 + $0x170] sm:$0xff]   ;;  %v7036_v8 = vld [vmem:[%s7373_s29 + $0x108] sm:$0xff]   ;;  %v7055_v11 = vld [vmem:[%s7373_s29 + $0x178] sm:$0xff]  }
  0x38   : >> { %6649 = vmatprep.subr.bf16.mxu1 %v7041_v47  ;;  %v7037_v10 = vld [vmem:[%s7373_s29 + $0x110] sm:$0xff]   ;;  %v7056_v12 = vld [vmem:[%s7373_s29 + $0x180] sm:$0xff]   ;;  %v7038_v13 = vld [vmem:[%s7373_s29 + $0x118] sm:$0xff]  }
  0x39   : >> { %6546 = vmatmul.mubr.msk.bf16.vlgmr.msra.gmra.mxu0 %vm563_vm5, %v7000_v22  ;;  %v7039_v14 = vld [vmem:[%s7373_s29 + $0x120] sm:$0xff]   ;;  %v7057_v15 = vld [vmem:[%s7373_s29 + $0x188] sm:$0xff]   ;;  %v7058_v16 = vld [vmem:[%s7373_s29 + $0x190] sm:$0xff]  }
  0x3a   : >> { %6584 = vmatmul.mubr.msk.bf16.vlgmr.msra.gmra.mxu1 %vm563_vm5, %v7001_v23  ;;  %6549 = vmatprep.mubr.msk.bf16.mxu0 %vm563_vm5, %v7002_v24  ;;  %v7040_v17 = vld [vmem:[%s7373_s29 + $0x128] sm:$0xff]   ;;  %v7042_v18 = vld [vmem:[%s7373_s29 + $0x130] sm:$0xff]   ;;  %v7059_v19 = vld [vmem:[%s7373_s29 + $0x198] sm:$0xff]  }
  0x3b   : >> { %6587 = vmatprep.mubr.msk.bf16.mxu1 %vm563_vm5, %v7003_v25  ;;  %6612 = vmatpush3.bf16.msra.mxu0 %v7018_v30  ;;  %v7060_v20 = vld [vmem:[%s7373_s29 + $0x1a0] sm:$0xff]   ;;  %v7043_v21 = vld [vmem:[%s7373_s29 + $0x138] sm:$0xff]   ;;  %v7061_v23 = vld [vmem:[%s7373_s29 + $0x1a8] sm:$0xff]  }
  0x3c   : >> { %6613 = vmatprep.subr.bf16.mxu0 %v7023_v34  ;;  %6650 = vmatpush3.bf16.msra.mxu1 %v7041_v47  ;;  %v7046_v22 = vld [vmem:[%s7373_s29 + $0x140] sm:$0xff]   ;;  %v7062_v24 = vld [vmem:[%s7373_s29 + $0x1b0] sm:$0xff]   ;;  %v7047_v25 = vld [vmem:[%s7373_s29 + $0x148] sm:$0xff]  }
  0x3d   : >> { %6651 = vmatprep.subr.bf16.mxu1 %v7044_v49 }
  0x3f   : >> { %6614 = vmatpush3.bf16.msra.mxu0 %v7023_v34 }
  0x40   : >> { %6615 = vmatprep.subr.bf16.mxu0 %v7024_v36  ;;  %6652 = vmatpush3.bf16.msra.mxu1 %v7044_v49 }
  0x41   : >> { %6550 = vmatmul.mubr.msk.bf16.gmra.mxu0 %vm563_vm5, %v7004_v26  ;;  %6653 = vmatprep.subr.bf16.mxu1 %v7045_v51  ;;  %v7063_v26 = vld [vmem:[%s7373_s29 + $0x1b8] sm:$0xff]   ;;  %s7202_s29 = smov 6  }
  0x42   : >> { %6588 = vmatmul.mubr.msk.bf16.gmra.mxu1 %vm563_vm5, %v7005_v27  ;;  %6553 = vmatprep.mubr.msk.bf16.mxu0 %vm563_vm5, %v7006_v28  ;;  %v7532_v27 = vld [vmem:[%s9915_s2] ss:$0 sm:$0xff] }
  0x43   : >> { %6591 = vmatprep.mubr.msk.bf16.mxu1 %vm563_vm5, %v7007_v29  ;;  %6616 = vmatpush3.bf16.msra.mxu0 %v7024_v36 }
  0x44   : >> { %6617 = vmatprep.subr.bf16.mxu0 %v7029_v38  ;;  %6654 = vmatpush3.bf16.msra.mxu1 %v7045_v51 }
  0x45   : >> { %6655 = vmatprep.subr.bf16.mxu1 %v7048_v54 }
  0x47   : >> { %6618 = vmatpush3.bf16.msra.mxu0 %v7029_v38 }
  0x48   : >> { %6619 = vmatprep.subr.bf16.mxu0 %v7030_v42  ;;  %6656 = vmatpush3.bf16.msra.mxu1 %v7048_v54 }
  0x49   : >> { %6554 = vmatmul.mubr.msk.bf16.gmra.mxu0 %vm563_vm5, %v7008_v31  ;;  %6657 = vmatprep.subr.bf16.mxu1 %v7049_v57 }
  0x4a   : >> { %6592 = vmatmul.mubr.msk.bf16.gmra.mxu1 %vm563_vm5, %v7009_v32  ;;  %6557 = vmatprep.mubr.msk.bf16.mxu0 %vm563_vm5, %v7010_v33 }
  0x4b   : >> { %6595 = vmatprep.mubr.msk.bf16.mxu1 %vm563_vm5, %v7011_v35  ;;  %6620 = vmatpush3.bf16.msra.mxu0 %v7030_v42 }
  0x4c   : >> { %6658 = vmatpush3.bf16.msra.mxu1 %v7049_v57 }
  0x51   : >> { %6558 = vmatmul.mubr.msk.bf16.gmra.mxu0 %vm563_vm5, %v7012_v37 }
  0x52   : >> { %6596 = vmatmul.mubr.msk.bf16.gmra.mxu1 %vm563_vm5, %v7013_v39  ;;  %6561 = vmatprep.mubr.msk.bf16.mxu0 %vm563_vm5, %v7014_v40 }
  0x53   : >> { %6599 = vmatprep.mubr.msk.bf16.mxu1 %vm563_vm5, %v7015_v41 }
  0x59   : >> { %6562 = vmatmul.mubr.msk.bf16.gmra.mxu0 %vm563_vm5, %v7016_v43 }
  0x5a   : >> { %6600 = vmatmul.mubr.msk.bf16.gmra.mxu1 %vm563_vm5, %v7017_v44  ;;  %6565 = vmatprep.mubr.msk.bf16.mxu0 %vm563_vm5, %v7019_v45 }
  0x5b   : >> { %6603 = vmatprep.mubr.msk.bf16.mxu1 %vm563_vm5, %v7020_v46 }
  0x61   : >> { %6566 = vmatmul.mubr.msk.bf16.gmra.mxu0 %vm563_vm5, %v7021_v48 }
  0x62   : >> { %6604 = vmatmul.mubr.msk.bf16.gmra.mxu1 %vm563_vm5, %v7022_v50  ;;  %6569 = vmatprep.mubr.msk.bf16.mxu0 %vm563_vm5, %v7025_v52 }
  0x63   : >> { %6607 = vmatprep.mubr.msk.bf16.mxu1 %vm563_vm5, %v7026_v53 }
  0x69   : >> { %6570 = vmatmul.mubr.msk.bf16.gmra.mxu0 %vm563_vm5, %v7027_v55 }
  0x6a   : >> { %6608 = vmatmul.mubr.msk.bf16.gmra.mxu1 %vm563_vm5, %v7028_v56  ;;  %6621 = vmatprep.mubr.msk.bf16.mxu0 %vm563_vm5, %v7031_v58 }
  0x6b   : >> { %6659 = vmatprep.mubr.msk.bf16.mxu1 %vm563_vm5, %v7050_v59 }
  0x71   : >> { %6622 = vmatmul.mubr.msk.bf16.vlgmr.msra.gmra.mxu0 %vm563_vm5, %v7032_v60 }
  0x72   : >> { %6625 = vmatprep.mubr.msk.bf16.mxu0 %vm563_vm5, %v7033_v61  ;;  %6660 = vmatmul.mubr.msk.bf16.vlgmr.msra.gmra.mxu1 %vm563_vm5, %v7051_v62 }
  0x73   : >> { %6663 = vmatprep.mubr.msk.bf16.mxu1 %vm563_vm5, %v7052_v63 }
  0x79   : >> { %6626 = vmatmul.mubr.msk.bf16.gmra.mxu0 %vm563_vm5, %v7034_v3 }
  0x7a   : >> { %6629 = vmatprep.mubr.msk.bf16.mxu0 %vm563_vm5, %v7035_v4  ;;  %6664 = vmatmul.mubr.msk.bf16.gmra.mxu1 %vm563_vm5, %v7053_v5 }
  0x7b   : >> { %6667 = vmatprep.mubr.msk.bf16.mxu1 %vm563_vm5, %v7054_v6 }
  0x81   : >> { %6630 = vmatmul.mubr.msk.bf16.gmra.mxu0 %vm563_vm5, %v7036_v8 }
  0x82   : >> { %6633 = vmatprep.mubr.msk.bf16.mxu0 %vm563_vm5, %v7037_v10  ;;  %6668 = vmatmul.mubr.msk.bf16.gmra.mxu1 %vm563_vm5, %v7055_v11 }
  0x83   : >> { %6671 = vmatprep.mubr.msk.bf16.mxu1 %vm563_vm5, %v7056_v12 }
  0x89   : >> { %6634 = vmatmul.mubr.msk.bf16.gmra.mxu0 %vm563_vm5, %v7038_v13 }
  0x8a   : >> { %6637 = vmatprep.mubr.msk.bf16.mxu0 %vm563_vm5, %v7039_v14  ;;  %6672 = vmatmul.mubr.msk.bf16.gmra.mxu1 %vm563_vm5, %v7057_v15 }
  0x8b   : >> { %6675 = vmatprep.mubr.msk.bf16.mxu1 %vm563_vm5, %v7058_v16 }
  0x91   : >> { %6638 = vmatmul.mubr.msk.bf16.gmra.mxu0 %vm563_vm5, %v7040_v17 }
  0x92   : >> { %6641 = vmatprep.mubr.msk.bf16.mxu0 %vm563_vm5, %v7042_v18  ;;  %6676 = vmatmul.mubr.msk.bf16.gmra.mxu1 %vm563_vm5, %v7059_v19 }
  0x93   : >> { %6679 = vmatprep.mubr.msk.bf16.mxu1 %vm563_vm5, %v7060_v20 }
  0x99   : >> { %6642 = vmatmul.mubr.msk.bf16.gmra.mxu0 %vm563_vm5, %v7043_v21 }
  0x9a   : >> { %6645 = vmatprep.mubr.msk.bf16.mxu0 %vm563_vm5, %v7046_v22  ;;  %6680 = vmatmul.mubr.msk.bf16.gmra.mxu1 %vm563_vm5, %v7061_v23 }
  0x9b   : >> { %6683 = vmatprep.mubr.msk.bf16.mxu1 %vm563_vm5, %v7062_v24 }
  0xa1   : >> { %6646 = vmatmul.mubr.msk.bf16.gmra.mxu0 %vm563_vm5, %v7047_v25 }
  0xa2   : >> { %6684 = vmatmul.mubr.msk.bf16.gmra.mxu1 %vm563_vm5, %v7063_v26 }
  0xf9   : >> { %v6547_v28 = vpop.f32.mrf.mxu0 }
  0xfa   : >> { %v649_v29 = vadd.f32 %v6547_v28, %v7532_v27  ;;  %v6585_v30 = vpop.f32.mrf.mxu1 }
  0xfb   : >> { %v1037_v31 = vadd.f32 %v6585_v30, %v7532_v27  ;;  %v640_v32 = vpop.f32.mrf.mxu0 }
  0xfc   : >> { %v753_v33 = vmax.f32 %v649_v29, 0.0  ;;  %v641_v34 = vadd.f32 %v7532_v27, %v640_v32  ;;  %v1028_v35 = vpop.f32.mrf.mxu1 }
  0xfd   : >> { %v1141_v36 = vmax.f32 %v1037_v31, 0.0  ;;  %v1029_v37 = vadd.f32 %v7532_v27, %v1028_v35  ;;  %v6548_v38 = vpop.f32.mrf.mxu0 }
  0xfe   : >> { %781 = vst [vmem:[#allocation2 + $0x40] sm:$0xff] %v753_v33  ;;  %v751_v39 = vmax.f32 %v641_v34, 0.0  ;;  %v652_v40 = vadd.f32 %v6548_v38, %v7532_v27  ;;  %v6586_v41 = vpop.f32.mrf.mxu1 }
  0xff   : >> { %1169 = vst [vmem:[#allocation2 + $0x1e8] sm:$0xff] %v1141_v36  ;;  %v1139_v42 = vmax.f32 %v1029_v37, 0.0  ;;  %v1040_v43 = vadd.f32 %v6586_v41, %v7532_v27  ;;  %v643_v44 = vpop.f32.mrf.mxu0 }
 0x100   : >> { %v754_v45 = vmax.f32 %v652_v40, 0.0  ;;  %v644_v46 = vadd.f32 %v7532_v27, %v643_v44  ;;  %v1031_v47 = vpop.f32.mrf.mxu1  ;;  %v1977_v20 = vmax.f32 %v751_v39, %v753_v33 }
 0x101   : >> { %1167 = vst [vmem:[#allocation2 + $0xe0] sm:$0xff] %v1139_v42  ;;  %v1142_v48 = vmax.f32 %v1040_v43, 0.0  ;;  %v7542_v49 = vadd.f32 %v7532_v27, %v1031_v47  ;;  %v6551_v50 = vpop.f32.mrf.mxu0 }
 0x102   : >> { %v752_v51 = vmax.f32 %v644_v46, 0.0  ;;  %v665_v52 = vadd.f32 %v6551_v50, %v7532_v27  ;;  %v6589_v53 = vpop.f32.mrf.mxu1 }
 0x103   : >> { %1170 = vst [vmem:[#allocation2 + $0x78] sm:$0xff] %v1142_v48  ;;  %v7547_v55 = vadd.f32 %v6589_v53, %v7532_v27  ;;  %v656_v56 = vpop.f32.mrf.mxu0 }
 0x104   : >> { %v757_v57 = vmax.f32 %v665_v52, 0.0  ;;  %v657_v58 = vadd.f32 %v7532_v27, %v656_v56  ;;  %v1044_v59 = vpop.f32.mrf.mxu1  ;;  %v1978_v24 = vmax.f32 %v752_v51, %v754_v45 }
 0x105   : >> { %v1145_v60 = vmax.f32 %v7547_v55, 0.0  ;;  %v7552_v61 = vadd.f32 %v7532_v27, %v1044_v59  ;;  %v6552_v62 = vpop.f32.mrf.mxu0 }
 0x106   : >> { %785 = vst [vmem:[#allocation2 + $0x370] sm:$0xff] %v757_v57  ;;  %v755_v63 = vmax.f32 %v657_v58, 0.0  ;;  %v668_v3 = vadd.f32 %v6552_v62, %v7532_v27  ;;  %v6590_v4 = vpop.f32.mrf.mxu1 }
 0x107   : >> { %1173 = vst [vmem:[#allocation2 + $0xb8] sm:$0xff] %v1145_v60  ;;  %v1143_v5 = vmax.f32 %v7552_v61, 0.0  ;;  %v7559_v6 = vadd.f32 %v6590_v4, %v7532_v27  ;;  %v659_v8 = vpop.f32.mrf.mxu0 }
 0x108   : >> { %783 = vst [vmem:[#allocation2 + $0x320] sm:$0xff] %v755_v63  ;;  %v758_v10 = vmax.f32 %v668_v3, 0.0  ;;  %v660_v11 = vadd.f32 %v7532_v27, %v659_v8  ;;  %v1047_v12 = vpop.f32.mrf.mxu1  ;;  %v1986_v13 = vmax.f32 %v755_v63, %v757_v57 }
 0x109   : >> { %1171 = vst [vmem:[#allocation2 + $0xd8] sm:$0xff] %v1143_v5  ;;  %v1146_v14 = vmax.f32 %v7559_v6, 0.0  ;;  %v1048_v15 = vadd.f32 %v7532_v27, %v1047_v12  ;;  %v6555_v16 = vpop.f32.mrf.mxu0  ;;  %v2330_v62 = vmax.f32 %v1143_v5, %v1145_v60 }
 0x10a   : >> { %v756_v17 = vmax.f32 %v660_v11, 0.0  ;;  %v7565_v18 = vadd.f32 %v6555_v16, %v7532_v27  ;;  %v6593_v19 = vpop.f32.mrf.mxu1  ;;  %v7572_v30 = vmax.f32 %v1977_v20, %v1986_v13 }
 0x10b   : >> { %v1144_v21 = vmax.f32 %v1048_v15, 0.0  ;;  %v1069_v22 = vadd.f32 %v6593_v19, %v7532_v27  ;;  %v672_v23 = vpop.f32.mrf.mxu0 }
 0x10c   : >> { %v761_v25 = vmax.f32 %v7565_v18, 0.0  ;;  %v7570_v26 = vadd.f32 %v7532_v27, %v672_v23  ;;  %v1060_v28 = vpop.f32.mrf.mxu1  ;;  %v1987_v29 = vmax.f32 %v756_v17, %v758_v10  ;;  %9993 = vst [vmem:[#allocation13_spill] sm:$0xff] %v7572_v30  ;;  %v1996_v44 = vrot.slane %v7572_v30, 1  ;;  %v1973_v17 = vld [vmem:[#allocation2 + $0x40] sm:$0xf] }
 0x10d   : >> { %v1149_v31 = vmax.f32 %v1069_v22, 0.0  ;;  %v1061_v32 = vadd.f32 %v7532_v27, %v1060_v28  ;;  %v6556_v34 = vpop.f32.mrf.mxu0  ;;  %v2013_v8 = vrot.slane %v7572_v30, 2  ;;  %v2331_v10 = vmax.f32 %v1144_v21, %v1146_v14  ;;  %v1982_v23 = vld [vmem:[#allocation2 + $0x370] sm:$0xf] }
 0x10e   : >> { %789 = vst [vmem:[#allocation2 + $0x310] sm:$0xff] %v761_v25  ;;  %v759_v33 = vmax.f32 %v7570_v26, 0.0  ;;  %v7579_v35 = vadd.f32 %v6556_v34, %v7532_v27  ;;  %v6594_v36 = vpop.f32.mrf.mxu1  ;;  %v7581_v37 = vmax.f32 %v1978_v24, %v1987_v29 }
 0x10f   : >> { %1177 = vst [vmem:[#allocation2 + $0x20] sm:$0xff] %v1149_v31  ;;  %v1147_v38 = vmax.f32 %v1061_v32, 0.0  ;;  %v1072_v39 = vadd.f32 %v6594_v36, %v7532_v27  ;;  %v675_v40 = vpop.f32.mrf.mxu0  ;;  %v1976_v6 = vld [vmem:[#allocation2 + $0x320] sm:$0xf] }
 0x110   : >> { %9994 = vst [vmem:[#allocation14_spill] sm:$0xff] %v7581_v37  ;;  %787 = vst [vmem:[#allocation2 + $0x108] sm:$0xff] %v759_v33  ;;  %v762_v41 = vmax.f32 %v7579_v35, 0.0  ;;  %v7588_v42 = vadd.f32 %v7532_v27, %v675_v40  ;;  %v1063_v43 = vpop.f32.mrf.mxu1  ;;  %v1997_v45 = vrot.slane %v7581_v37, 1  ;;  %v2014_v57 = vrot.slane %v7581_v37, 2 }
 0x111   : >> { %1175 = vst [vmem:[#allocation2 + $0x98] sm:$0xff] %v1147_v38  ;;  %v1150_v46 = vmax.f32 %v1072_v39, 0.0  ;;  %v1064_v47 = vadd.f32 %v7532_v27, %v1063_v43  ;;  %v6559_v48 = vpop.f32.mrf.mxu0  ;;  %v2339_v50 = vmax.f32 %v1147_v38, %v1149_v31  ;;  %v1979_v22 = vmax.f32 %v1973_v17, %v1976_v6 }
 0x112   : >> { %v760_v51 = vmax.f32 %v7588_v42, 0.0  ;;  %v7595_v52 = vadd.f32 %v6559_v48, %v7532_v27  ;;  %v6597_v53 = vpop.f32.mrf.mxu1  ;;  %v1998_v56 = vsel %vm1995_vm6, %v1996_v44, %v1997_v45  ;;  %v2015_v14 = vsel %vm2012_vm7, %v2013_v8, %v2014_v57 }
 0x113   : >> { %v1148_v58 = vmax.f32 %v1064_v47, 0.0  ;;  %v7602_v59 = vadd.f32 %v6597_v53, %v7532_v27  ;;  %v688_v61 = vpop.f32.mrf.mxu0  ;;  %2001 = vrot.lane.b32.xlu0 %v1998_v56, %s7202_s29  ;;  %v7616_v16 = vmax.f32 %v2330_v62, %v2339_v50  ;;  %v7644_v36 = vmax.f32 %v759_v33, %v761_v25 }
 0x114   : >> { %v765_v63 = vmax.f32 %v7595_v52, 0.0  ;;  %v7609_v3 = vadd.f32 %v7532_v27, %v688_v61  ;;  %v1076_v4 = vpop.f32.mrf.mxu1  ;;  %v2073_v33 = vmax.f32 %v760_v51, %v762_v41 }
 0x115   : >> { %v9941_v11 = vmax.f32 %v7602_v59, 0.0  ;;  %v7614_v12 = vadd.f32 %v7532_v27, %v1076_v4  ;;  %v6560_v13 = vpop.f32.mrf.mxu0  ;;  %v2340_v15 = vmax.f32 %v1148_v58, %v1150_v46  ;;  %9995 = vst [vmem:[#allocation15_spill] sm:$0xff] %v7616_v16  ;;  %v2348_v42 = vrot.slane %v7616_v16, 1 }
 0x116   : >> { %793 = vst [vmem:[#allocation2 + $0x2d0] sm:$0xff] %v765_v63  ;;  %v763_v55 = vmax.f32 %v7609_v3, 0.0  ;;  %v7622_v60 = vadd.f32 %v6560_v13, %v7532_v27  ;;  %v6598_v5 = vpop.f32.mrf.mxu1  ;;  %v2363_v41 = vrot.slane %v7616_v16, 2 }
 0x117   : >> { %1181 = vst [vmem:[#allocation2 + $0x18] sm:$0xff] %v9941_v11  ;;  %v9940_v19 = vmax.f32 %v7614_v12, 0.0  ;;  %v7631_v20 = vadd.f32 %v6598_v5, %v7532_v27  ;;  %v691_v21 = vpop.f32.mrf.mxu0  ;;  %v1985_v24 = vld [vmem:[#allocation2 + $0x108] sm:$0xf]  ;;  %2018 = vrot.lane.b32.xlu0 %v2015_v14, %s7203_s13  ;;  %v7634_v28 = vmax.f32 %v2331_v10, %v2340_v15  ;;  %v2378_v10 = vrot.slane %v7616_v16, 3 }
 0x118   : >> { %791 = vst [vmem:[#allocation2 + $0xf8] sm:$0xff] %v763_v55  ;;  %v766_v29 = vmax.f32 %v7622_v60, 0.0  ;;  %v692_v31 = vadd.f32 %v7532_v27, %v691_v21  ;;  %v1079_v32 = vpop.f32.mrf.mxu1  ;;  %v1988_v34 = vmax.f32 %v1982_v23, %v1985_v24  ;;  %v2329_v8 = vld [vmem:[#allocation2 + $0x98] sm:$0xf] }
 0x119   : >> { %9996 = vst [vmem:[#allocation16_spill] sm:$0xff] %v7634_v28  ;;  %1179 = vst [vmem:[#allocation2 + $0x1f8] sm:$0xff] %v9940_v19  ;;  %v1154_v38 = vmax.f32 %v7631_v20, 0.0  ;;  %v7650_v39 = vadd.f32 %v7532_v27, %v1079_v32  ;;  %v6563_v40 = vpop.f32.mrf.mxu0  ;;  %v2349_v43 = vrot.slane %v7634_v28, 1  ;;  %v2364_v53 = vrot.slane %v7634_v28, 2 }
 0x11a   : >> { %v764_v44 = vmax.f32 %v692_v31, 0.0  ;;  %v7655_v18 = vadd.f32 %v6563_v40, %v7532_v27  ;;  %v6601_v26 = vpop.f32.mrf.mxu1  ;;  %v7657_v25 = vmax.f32 %v1979_v22, %v1988_v34  ;;  %v2379_v17 = vrot.slane %v7634_v28, 3  ;;  %v2326_v23 = vld [vmem:[#allocation2 + $0xb8] sm:$0xf] }
 0x11b   : >> { %v1152_v46 = vmax.f32 %v7650_v39, 0.0  ;;  %v7663_v47 = vadd.f32 %v6601_v26, %v7532_v27  ;;  %v704_v48 = vpop.f32.mrf.mxu0  ;;  %v2350_v50 = vsel %vm1995_vm6, %v2348_v42, %v2349_v43  ;;  %v2365_v24 = vsel %vm2012_vm7, %v2363_v41, %v2364_v53  ;;  %v2335_v42 = vld [vmem:[#allocation2 + $0x20] sm:$0xf] }
 0x11c   : >> { %9997 = vst [vmem:[#allocation17_spill] sm:$0xff] %v7657_v25  ;;  %v9931_v56 = vmax.f32 %v7655_v18, 0.0  ;;  %v7671_v58 = vadd.f32 %v7532_v27, %v704_v48  ;;  %v1092_v61 = vpop.f32.mrf.mxu1  ;;  %v1999_v35 = vrot.slane %v7657_v25, 1  ;;  %2353 = vrot.lane.b32.xlu0 %v2350_v50, %s7202_s29  ;;  %v2016_v6 = vrot.slane %v7657_v25, 2 }
 0x11d   : >> { %v1157_v51 = vmax.f32 %v7663_v47, 0.0  ;;  %v7678_v62 = vadd.f32 %v7532_v27, %v1092_v61  ;;  %v6564_v4 = vpop.f32.mrf.mxu0  ;;  %v2082_v31 = vmax.f32 %v764_v44, %v766_v29  ;;  %v2332_v40 = vmax.f32 %v2326_v23, %v2329_v8 }
 0x11e   : >> { %797 = vst [vmem:[#allocation2 + $0x70] sm:$0xff] %v9931_v56  ;;  %v9930_v13 = vmax.f32 %v7671_v58, 0.0  ;;  %v7686_v15 = vadd.f32 %v6564_v4, %v7532_v27  ;;  %v6602_v60 = vpop.f32.mrf.mxu1  ;;  %v2000_v5 = vsel %vm1995_vm6, %v1997_v45, %v1999_v35  ;;  %v2081_v48 = vmax.f32 %v763_v55, %v765_v63 }
 0x11f   : >> { %1185 = vst [vmem:[#allocation2 + $0x380] sm:$0xff] %v1157_v51  ;;  %v1155_v14 = vmax.f32 %v7678_v62, 0.0  ;;  %v7696_v21 = vadd.f32 %v6602_v60, %v7532_v27  ;;  %v707_v22 = vpop.f32.mrf.mxu0  ;;  %2003 = vrot.lane.b32.xlu1 %v2000_v5, %s7202_s29  ;;  %v2017_v61 = vsel %vm2012_vm7, %v2014_v57, %v2016_v6  ;;  %v2394_v3 = vrot.slane %v7634_v28, 4 }
 0x120   : >> { %795 = vst [vmem:[#allocation2 + $0x328] sm:$0xff] %v9930_v13  ;;  %v7706_v32 = vadd.f32 %v7532_v27, %v707_v22  ;;  %v1095_v34 = vpop.f32.mrf.mxu1  ;;  %v2338_v26 = vld [vmem:[#allocation2 + $0x1f8] sm:$0xf]  ;;  %2368 = vrot.lane.b32.xlu0 %v2365_v24, %s7203_s13  ;;  %v7727_v55 = vmax.f32 %v2073_v33, %v2082_v31  ;;  %v2380_v6 = vsel %vm2029_vm8, %v2378_v10, %v2379_v17  ;;  %v2393_v23 = vrot.slane %v7616_v16, 4 }
 0x121   : >> { %1183 = vst [vmem:[#allocation2 + $0x248] sm:$0xff] %v1155_v14  ;;  %v1158_v29 = vmax.f32 %v7696_v21, 0.0  ;;  %v7717_v44 = vadd.f32 %v7532_v27, %v1095_v34  ;;  %v6567_v50 = vpop.f32.mrf.mxu0  ;;  %v2341_v35 = vmax.f32 %v2335_v42, %v2338_v26  ;;  %v2417_v21 = vmax.f32 %v1152_v46, %v1154_v38 }
 0x122   : >> { %v7724_v52 = vadd.f32 %v6567_v50, %v7532_v27  ;;  %v6605_v63 = vpop.f32.mrf.mxu1  ;;  %9998 = vst [vmem:[#allocation18_spill] sm:$0xff] %v7727_v55  ;;  %v2106_v54 = vrot.slane %v7727_v55, 2 }
 0x123   : >> { %v1156_v4 = vmax.f32 %v7717_v44, 0.0  ;;  %v7731_v8 = vadd.f32 %v6605_v63, %v7532_v27  ;;  %v720_v60 = vpop.f32.mrf.mxu0  ;;  %2020 = vrot.lane.b32.xlu1 %v2017_v61, %s7203_s13  ;;  %v7734_v57 = vmax.f32 %v2332_v40, %v2341_v35  ;;  %v7751_v40 = vmax.f32 %v7644_v36, %v2081_v48 }
 0x124   : >> { %v9934_v5 = vmax.f32 %v7724_v52, 0.0  ;;  %v7741_v22 = vadd.f32 %v7532_v27, %v720_v60  ;;  %v1108_v33 = vpop.f32.mrf.mxu1  ;;  %2383 = vrot.lane.b32.xlu0 %v2380_v6, %s7204_s14  ;;  %v2395_v61 = vsel %vm2046_vm9, %v2393_v23, %v2394_v3  ;;  %v9939_v35 = vrot.slane %v7727_v55, 1 }
 0x125   : >> { %v9929_v24 = vmax.f32 %v7731_v8, 0.0  ;;  %v7747_v31 = vadd.f32 %v7532_v27, %v1108_v33  ;;  %v6568_v34 = vpop.f32.mrf.mxu0  ;;  %v2351_v10 = vrot.slane %v7734_v57, 1  ;;  %9999 = vst [vmem:[#allocation19_spill] sm:$0xff] %v7751_v40  ;;  %v2366_v6 = vrot.slane %v7734_v57, 2 }
 0x126   : >> { %801 = vst [vmem:[#allocation2 + $0x2e0] sm:$0xff] %v9934_v5  ;;  %v9933_v42 = vmax.f32 %v7741_v22, 0.0  ;;  %v7757_v26 = vadd.f32 %v6568_v34, %v7532_v27  ;;  %v6606_v50 = vpop.f32.mrf.mxu1  ;;  %v2381_v56 = vrot.slane %v7734_v57, 3  ;;  %v2121_v23 = vrot.slane %v7727_v55, 3  ;;  %v2421_v11 = vld [vmem:[#allocation2 + $0x380] sm:$0xf] }
 0x127   : >> { %1189 = vst [vmem:[#allocation2 + $0x178] sm:$0xff] %v9929_v24  ;;  %v9932_v36 = vmax.f32 %v7747_v31, 0.0  ;;  %v7767_v48 = vadd.f32 %v6606_v50, %v7532_v27  ;;  %v723_v63 = vpop.f32.mrf.mxu0  ;;  %v2352_v60 = vsel %vm1995_vm6, %v2349_v43, %v2351_v10  ;;  %v2080_v33 = vld [vmem:[#allocation2 + $0x328] sm:$0xf]  ;;  %v2077_v50 = vld [vmem:[#allocation2 + $0x2d0] sm:$0xf]  ;;  %v2367_v5 = vsel %vm2012_vm7, %v2364_v53, %v2366_v6 }
 0x128   : >> { %799 = vst [vmem:[#allocation2 + $0x1a8] sm:$0xff] %v9933_v42  ;;  %v7777_v34 = vadd.f32 %v7532_v27, %v723_v63  ;;  %v1111_v1 = vpop.f32.mrf.mxu1  ;;  %2355 = vrot.lane.b32.xlu1 %v2352_v60, %s7202_s29  ;;  %2398 = vrot.lane.b32.xlu0 %v2395_v61, %s7205_s0  ;;  %v2090_v24 = vrot.slane %v7751_v40, 1  ;;  %v2071_v63 = vld [vmem:[#allocation2 + $0xf8] sm:$0xf]  ;;  %v2105_v43 = vrot.slane %v7751_v40, 2 }
 0x129   : >> { %1187 = vst [vmem:[#allocation2 + $0x2b8] sm:$0xff] %v9932_v36  ;;  %v7785_v10 = vadd.f32 %v7532_v27, %v1111_v1  ;;  %v6571_v0 = vpop.f32.mrf.mxu0  ;;  %v2083_v36 = vmax.f32 %v2077_v50, %v2080_v33  ;;  %v2415_v38 = vld [vmem:[#allocation2 + $0x248] sm:$0xf] }
 0x12a   : >> { %v7791_v13 = vadd.f32 %v6571_v0, %v7532_v27  ;;  %v6609_v61 = vpop.f32.mrf.mxu1  ;;  %v2092_v41 = vsel %vm1995_vm6, %v2090_v24, %v9939_v35  ;;  %v2068_v0 = vld [vmem:[#allocation2 + $0x310] sm:$0xf]  ;;  %v2396_v24 = vrot.slane %v7734_v57, 4  ;;  %v10006_v2 = vmax.f32 %v7777_v34, 0.0 }
 0x12b   : >> { %v7796_v1 = vadd.f32 %v6609_v61, %v7532_v27  ;;  %v736_v42 = vpop.f32.mrf.mxu0  ;;  %v2074_v50 = vmax.f32 %v2068_v0, %v2071_v63  ;;  %v2382_v63 = vsel %vm2029_vm8, %v2379_v17, %v2381_v56  ;;  %v10009_v34 = vmax.f32 %v7724_v52, 0.0 }
 0x12c   : >> { %v9935_v45 = vmax.f32 %v7791_v13, 0.0  ;;  %v7806_v60 = vadd.f32 %v7532_v27, %v736_v42  ;;  %v1124_v33 = vpop.f32.mrf.mxu1  ;;  %2370 = vrot.lane.b32.xlu1 %v2367_v5, %s7203_s13  ;;  %2095 = vrot.lane.b32.xlu0 %v2092_v41, %s7202_s29 }
 0x12d   : >> { %v9936_v61 = vmax.f32 %v7796_v1, 0.0  ;;  %v7812_v53 = vadd.f32 %v7532_v27, %v1124_v33  ;;  %v6572_v6 = vpop.f32.mrf.mxu0  ;;  %v7825_v0 = vmax.f32 %v2074_v50, %v2083_v36 }
 0x12e   : >> { %805 = vst [vmem:[#allocation2 + $0x1a0] sm:$0xff] %v9935_v45  ;;  %v9937_v42 = vmax.f32 %v7806_v60, 0.0  ;;  %v7820_v5 = vadd.f32 %v6572_v6, %v7532_v27  ;;  %v6610_v41 = vpop.f32.mrf.mxu1  ;;  %v2107_v6 = vsel %vm2012_vm7, %v2105_v43, %v2106_v54 }
 0x12f   : >> { %1193 = vst [vmem:[#allocation2 + $0x2f8] sm:$0xff] %v9936_v61  ;;  %v9938_v57 = vmax.f32 %v7812_v53, 0.0  ;;  %v7831_v33 = vadd.f32 %v6610_v41, %v7532_v27  ;;  %v739_v45 = vpop.f32.mrf.mxu0  ;;  %v2120_v61 = vrot.slane %v7751_v40, 3  ;;  %v2123_v20 = vrot.slane %v7825_v0, 3 }
 0x130   : >> { %803 = vst [vmem:[#allocation2 + $0x350] sm:$0xff] %v9937_v42  ;;  %v7841_v17 = vadd.f32 %v7532_v27, %v739_v45  ;;  %v1127_v36 = vpop.f32.mrf.mxu1  ;;  %2385 = vrot.lane.b32.xlu1 %v2382_v63, %s7204_s14  ;;  %2110 = vrot.lane.b32.xlu0 %v2107_v6, %s7203_s13  ;;  %v2108_v63 = vrot.slane %v7825_v0, 2  ;;  %v2136_v6 = vrot.slane %v7727_v55, 4 }
 0x131   : >> { %1191 = vst [vmem:[#allocation2 + $0x2e8] sm:$0xff] %v9938_v57  ;;  %v7849_v50 = vadd.f32 %v7532_v27, %v1127_v36  ;;  %v6623_v41 = vpop.f32.mrf.mxu0  ;;  %v2397_v36 = vsel %vm2046_vm9, %v2394_v3, %v2396_v24  ;;  %v2122_v35 = vsel %vm2029_vm8, %v2120_v61, %v2121_v23  ;;  %v2135_v57 = vrot.slane %v7751_v40, 4  ;;  %v2424_v3 = vld [vmem:[#allocation2 + $0x2b8] sm:$0xf] }
 0x132   : >> { %v7854_v45 = vadd.f32 %v6623_v41, %v7532_v27  ;;  %v7858_v56 = vpop.f32.mrf.mxu1  ;;  %v2426_v41 = vmax.f32 %v1156_v4, %v1158_v29  ;;  %v2425_v29 = vmax.f32 %v1155_v14, %v1157_v51  ;;  %v2427_v47 = vmax.f32 %v2421_v11, %v2424_v3 }
 0x133   : >> { %v1416_v43 = vpop.f32.mrf.mxu0  ;;  %v2137_v39 = vsel %vm2046_vm9, %v2135_v57, %v2136_v6  ;;  %v2093_v51 = vrot.slane %v7825_v0, 1  ;;  %v10001_v14 = vmax.f32 %v7602_v59, 0.0  ;;  %v10002_v61 = vmax.f32 %v7614_v12, 0.0 }
 0x134   : >> { %v9944_v42 = vmax.f32 %v7854_v45, 0.0  ;;  %v7871_v19 = vadd.f32 %v7532_v27, %v1416_v43  ;;  %2400 = vrot.lane.b32.xlu1 %v2397_v36, %s7205_s0  ;;  %2125 = vrot.lane.b32.xlu0 %v2122_v35, %s7204_s14  ;;  %v7876_v24 = vpop.f32.mrf.mxu1  ;;  %v2109_v35 = vsel %vm2012_vm7, %v2106_v54, %v2108_v63  ;;  %v7896_v62 = vmax.f32 %v2417_v21, %v2426_v41  ;;  %v2412_v54 = vld [vmem:[#allocation2 + $0x18] sm:$0xf] }
 0x135   : >> { %v6624_v44 = vpop.f32.mrf.mxu0  ;;  %v2416_v43 = vmax.f32 %v10002_v61, %v10001_v14  ;;  %v2418_v11 = vmax.f32 %v2412_v54, %v2415_v38  ;;  %v2124_v59 = vsel %vm2029_vm8, %v2121_v23, %v2123_v20  ;;  %v2138_v12 = vrot.slane %v7825_v0, 4 }
 0x136   : >> { %1557 = vst [vmem:[#allocation2 + $0x1c8] sm:$0xff] %v9944_v42  ;;  %v9943_v4 = vmax.f32 %v7871_v19, 0.0  ;;  %v7894_v46 = vpop.f32.mrf.mxu1  ;;  %10000 = vst [vmem:[#allocation20_spill] sm:$0xff] %v7896_v62  ;;  %v7914_v3 = vadd.f32 %v6624_v44, %v7532_v27 }
 0x137   : >> { %v1419_v36 = vpop.f32.mrf.mxu0  ;;  %v7909_v63 = vmax.f32 %v2416_v43, %v2425_v29  ;;  %v7918_v14 = vmax.f32 %v2418_v11, %v2427_v47  ;;  %v2139_v43 = vsel %vm2046_vm9, %v2136_v6, %v2138_v12 }
 0x138   : >> { %1555 = vst [vmem:[#allocation2 + $0x270] sm:$0xff] %v9943_v4  ;;  %2112 = vrot.lane.b32.xlu1 %v2109_v35, %s7203_s13  ;;  %2140 = vrot.lane.b32.xlu0 %v2137_v39, %s7205_s0  ;;  %v7907_v57 = vpop.f32.mrf.mxu1  ;;  %v2435_v35 = vrot.slane %v7896_v62, 1  ;;  %v10004_v39 = vrot.slane %v7727_v55, 1  ;;  %v7925_v29 = vadd.f32 %v7532_v27, %v1419_v36  ;;  %v2465_v4 = vrot.slane %v7896_v62, 3 }
 0x139   : >> { %10003 = vst [vmem:[#allocation21_spill] sm:$0xff] %v7909_v63  ;;  %v6627_v41 = vpop.f32.mrf.mxu0  ;;  %v2434_v20 = vrot.slane %v7909_v63, 1 }
 0x13a   : >> { %v7916_v21 = vpop.f32.mrf.mxu1  ;;  %v2094_v38 = vsel %vm1995_vm6, %v10004_v39, %v2093_v51  ;;  %v7931_v0 = vadd.f32 %v6627_v41, %v7532_v27  ;;  %v2450_v41 = vrot.slane %v7896_v62, 2 }
 0x13b   : >> { %v1432_v61 = vpop.f32.mrf.mxu0  ;;  %v2436_v39 = vsel %vm1995_vm6, %v2434_v20, %v2435_v35  ;;  %v10005_v20 = vmax.f32 %v7757_v26, 0.0 }
 0x13c   : >> { %2127 = vrot.lane.b32.xlu1 %v2124_v59, %s7204_s14  ;;  %2097 = vrot.lane.b32.xlu0 %v2094_v38, %s7202_s29  ;;  %v7933_v44 = vpop.f32.mrf.mxu1  ;;  %v9942_v36 = vmax.f32 %v7931_v0, 0.0  ;;  %v7940_v54 = vadd.f32 %v7532_v27, %v1432_v61  ;;  %v2437_v59 = vrot.slane %v7918_v14, 1  ;;  %v2449_v61 = vrot.slane %v7909_v63, 2 }
 0x13d   : >> { %v6628_v51 = vpop.f32.mrf.mxu0  ;;  %v2168_v9 = vmax.f32 %v10006_v2, %v10005_v20  ;;  %v10010_v2 = vmax.f32 %v7741_v22, 0.0 }
 0x13e   : >> { %v7942_v11 = vpop.f32.mrf.mxu1  ;;  %v7948_v38 = vadd.f32 %v6628_v51, %v7532_v27  ;;  %1561 = vst [vmem:[#allocation2 + $0xe8] sm:$0xff] %v9942_v36  ;;  %v9949_v6 = vmax.f32 %v7940_v54, 0.0  ;;  %v2452_v51 = vrot.slane %v7918_v14, 2  ;;  %v2451_v42 = vsel %vm2012_vm7, %v2449_v61, %v2450_v41 }
 0x13f   : >> { %v1435_v47 = vpop.f32.mrf.mxu0  ;;  %v10008_v61 = vmax.f32 %v7706_v32, 0.0  ;;  %v2167_v20 = vmax.f32 %v10010_v2, %v10009_v34  ;;  %v2157_v2 = vld [vmem:[#allocation2 + $0x1a8] sm:$0xf] }
 0x140   : >> { %2142 = vrot.lane.b32.xlu1 %v2139_v43, %s7205_s0  ;;  %2439 = vrot.lane.b32.xlu0 %v2436_v39, %s7202_s29  ;;  %v7956_v12 = vadd.f32 %v7532_v27, %v1435_v47  ;;  %1559 = vst [vmem:[#allocation2 + $0x138] sm:$0xff] %v9949_v6  ;;  %v7967_v36 = vpop.f32.mrf.mxu1  ;;  %v2438_v47 = vsel %vm1995_vm6, %v2435_v35, %v2437_v59  ;;  %v2464_v35 = vrot.slane %v7909_v63, 3  ;;  %v10007_v59 = vmax.f32 %v7686_v15, 0.0 }
 0x141   : >> { %v6631_v23 = vpop.f32.mrf.mxu0  ;;  %v10011_v6 = vmax.f32 %v7655_v18, 0.0  ;;  %v2453_v22 = vsel %vm2012_vm7, %v2450_v41, %v2452_v51 }
 0x142   : >> { %v7965_v39 = vadd.f32 %v6631_v23, %v7532_v27  ;;  %v2159_v26 = vmax.f32 %v10008_v61, %v10007_v59  ;;  %v8002_v52 = vpop.f32.mrf.mxu1  ;;  %v2480_v59 = vrot.slane %v7896_v62, 4  ;;  %v2466_v61 = vsel %vm2029_vm8, %v2464_v35, %v2465_v4 }
 0x143   : >> { %v1448_v7 = vpop.f32.mrf.mxu0 }
 0x144   : >> { %2441 = vrot.lane.b32.xlu1 %v2438_v47, %s7202_s29  ;;  %2454 = vrot.lane.b32.xlu0 %v2451_v42, %s7203_s13  ;;  %v7980_v43 = vadd.f32 %v7532_v27, %v1448_v7  ;;  %v2467_v42 = vrot.slane %v7918_v14, 3  ;;  %v10012_v7 = vmax.f32 %v7671_v58, 0.0  ;;  %v10013_v25 = vmax.f32 %v7965_v39, 0.0 }
 0x145   : >> { %v6632_v47 = vpop.f32.mrf.mxu0  ;;  %v8007_v18 = vmax.f32 %v2159_v26, %v2168_v9  ;;  %v2479_v9 = vrot.slane %v7909_v63, 4  ;;  %v2482_v26 = vrot.slane %v7918_v14, 4  ;;  %v2154_v14 = vld [vmem:[#allocation2 + $0x70] sm:$0xf]  ;;  %v2247_v63 = vld [vmem:[#allocation2 + $0xe0] sm:$0xff] }
 0x146   : >> { %v2158_v23 = vmax.f32 %v10012_v7, %v10011_v6  ;;  %1565 = vst [vmem:[#allocation2 + $0xa8] sm:$0xff] %v10013_v25  ;;  %v9952_v15 = vmax.f32 %v7980_v43, 0.0  ;;  %v8000_v32 = vadd.f32 %v6632_v47, %v7532_v27  ;;  %v2163_v25 = vld [vmem:[#allocation2 + $0x2e0] sm:$0xf]  ;;  %v2166_v6 = vld [vmem:[#allocation2 + $0x350] sm:$0xf] }
 0x147   : >> { %10014 = vst [vmem:[#allocation22_spill] sm:$0xff] %v8007_v18  ;;  %v1451_v58 = vpop.f32.mrf.mxu0  ;;  %v2169_v34 = vmax.f32 %v2163_v25, %v2166_v6  ;;  %v2177_v25 = vrot.slane %v8007_v18, 1  ;;  %v2251_v6 = vld [vmem:[#allocation2 + $0x78] sm:$0xff] }
 0x148   : >> { %2456 = vrot.lane.b32.xlu1 %v2453_v22, %s7203_s13  ;;  %2469 = vrot.lane.b32.xlu0 %v2466_v61, %s7204_s14  ;;  %1563 = vst [vmem:[#allocation2 + $0x218] sm:$0xff] %v9952_v15  ;;  %v8015_v41 = vadd.f32 %v7532_v27, %v1451_v58  ;;  %v8017_v51 = vmax.f32 %v2158_v23, %v2167_v20  ;;  %v8025_v22 = vpop.f32.mrf.mxu1  ;;  %v9956_v23 = vrot.slane %v8007_v18, 2 }
 0x149   : >> { %v6635_v35 = vpop.f32.mrf.mxu0  ;;  %v2468_v61 = vsel %vm2029_vm8, %v2465_v4, %v2467_v42  ;;  %v2481_v58 = vsel %vm2046_vm9, %v2479_v9, %v2480_v59  ;;  %v2160_v15 = vmax.f32 %v2154_v14, %v2157_v2  ;;  %v2483_v42 = vsel %vm2046_vm9, %v2480_v59, %v2482_v26 }
 0x14a   : >> { %10015 = vst [vmem:[#allocation23_spill] sm:$0xff] %v8017_v51  ;;  %v8023_v7 = vadd.f32 %v6635_v35, %v7532_v27  ;;  %v2191_v62 = vrot.slane %v8017_v51, 2  ;;  %v10016_v26 = vmax.f32 %v7820_v5, 0.0  ;;  %v10017_v14 = vmax.f32 %v7841_v17, 0.0 }
 0x14b   : >> { %v1464_v20 = vpop.f32.mrf.mxu0  ;;  %v2206_v5 = vrot.slane %v8017_v51, 3  ;;  %v10019_v17 = vmax.f32 %v7791_v13, 0.0 }
 0x14c   : >> { %2471 = vrot.lane.b32.xlu1 %v2468_v61, %s7204_s14  ;;  %2484 = vrot.lane.b32.xlu0 %v2481_v58, %s7205_s0  ;;  %v9954_v47 = vmax.f32 %v8023_v7, 0.0  ;;  %v8034_v35 = vadd.f32 %v7532_v27, %v1464_v20  ;;  %v8045_v58 = vpop.f32.mrf.mxu1  ;;  %v8047_v20 = vmax.f32 %v2160_v15, %v2169_v34  ;;  %v2193_v2 = vsel %vm2012_vm7, %v2191_v62, %v9956_v23  ;;  %v2249_v62 = vld [vmem:[#allocation2 + $0x1e8] sm:$0xf] }
 0x14d   : >> { %v6636_v4 = vpop.f32.mrf.mxu0  ;;  %v10021_v23 = vmax.f32 %v7542_v49, 0.0  ;;  %v9964_v49 = vrot.slane %v8007_v18, 4 }
 0x14e   : >> { %1569 = vst [vmem:[#allocation2 + $0xc0] sm:$0xff] %v9954_v47  ;;  %v8043_v61 = vadd.f32 %v6636_v4, %v7532_v27  ;;  %v2245_v47 = vmax.f32 %v10017_v14, %v10016_v26  ;;  %v2176_v4 = vrot.slane %v8017_v51, 1  ;;  %v10018_v15 = vmax.f32 %v8034_v35, 0.0  ;;  %v8078_v37 = vpop.f32.mrf.mxu1 }
 0x14f   : >> { %v1467_v9 = vpop.f32.mrf.mxu0  ;;  %v10020_v26 = vmax.f32 %v7806_v60, 0.0  ;;  %v2254_v59 = vmax.f32 %v10021_v23, %v2251_v6  ;;  %v2179_v13 = vrot.slane %v8047_v20, 1  ;;  %v10022_v60 = vrot.slane %v8007_v18, 3 }
 0x150   : >> { %2486 = vrot.lane.b32.xlu1 %v2483_v42, %s7205_s0  ;;  %2196 = vrot.lane.b32.xlu0 %v2193_v2, %s7203_s13  ;;  %1567 = vst [vmem:[#allocation2 + $0x338] sm:$0xff] %v10018_v15  ;;  %v8064_v34 = vadd.f32 %v7532_v27, %v1467_v9  ;;  %v2250_v42 = vld [vmem:[#allocation2 + $0x1e8] sm:$0xff]  ;;  %v2178_v30 = vsel %vm1995_vm6, %v2176_v4, %v2177_v25 }
 0x151   : >> { %v2244_v14 = vmax.f32 %v10020_v26, %v10019_v17  ;;  %v6639_v2 = vpop.f32.mrf.mxu0  ;;  %v2253_v15 = vmax.f32 %v2247_v63, %v2250_v42  ;;  %v2208_v17 = vsel %vm2029_vm8, %v2206_v5, %v10022_v60  ;;  %v8085_v23 = vmax.f32 %v2245_v47, %v2254_v59  ;;  %v2252_v5 = vld [vmem:[#allocation2 + $0xd8] sm:$0xf]  ;;  %v2240_v47 = vld [vmem:[#allocation2 + $0x1a0] sm:$0xf] }
 0x152   : >> { %v8076_v9 = vadd.f32 %v6639_v2, %v7532_v27  ;;  %v2194_v26 = vrot.slane %v8047_v20, 2  ;;  %v2221_v42 = vrot.slane %v8017_v51, 4  ;;  %v2255_v51 = vmax.f32 %v2249_v62, %v2252_v5 }
 0x153   : >> { %v1480_v6 = vpop.f32.mrf.mxu0  ;;  %v8095_v2 = vmax.f32 %v2244_v14, %v2253_v15  ;;  %v2180_v14 = vsel %vm1995_vm6, %v2177_v25, %v2179_v13  ;;  %v8124_v13 = vld [vmem:[%s9915_s2] ss:$0 sm:$0xff]  ;;  %v2224_v25 = vrot.slane %v8047_v20, 4 }
 0x154   : >> { %2181 = vrot.lane.b32.xlu1 %v2178_v30, %s7202_s29  ;;  %2211 = vrot.lane.b32.xlu0 %v2208_v17, %s7204_s14  ;;  %v9961_v63 = vmax.f32 %v8076_v9, 0.0  ;;  %v8091_v4 = vadd.f32 %v7532_v27, %v1480_v6  ;;  %v8106_v17 = vld [vmem:[%s9915_s2] ss:$0 sm:$0xff]  ;;  %v8108_v6 = vpop.f32.mrf.mxu1  ;;  %v2223_v15 = vsel %vm2046_vm9, %v2221_v42, %v9964_v49 }
 0x155   : >> { %10023 = vst [vmem:[#allocation24_spill] sm:$0xff] %v8095_v2  ;;  %v6640_v60 = vpop.f32.mrf.mxu0 }
 0x156   : >> { %1573 = vst [vmem:[#allocation2 + $0x1e0] sm:$0xff] %v9961_v63  ;;  %v8101_v59 = vadd.f32 %v6640_v60, %v7532_v27  ;;  %v2209_v27 = vrot.slane %v8047_v20, 3  ;;  %v2243_v60 = vld [vmem:[#allocation2 + $0xe0] sm:$0xf]  ;;  %v10025_v55 = vmax.f32 %v8091_v4, 0.0  ;;  %v8155_v63 = vadd.f32 %v7894_v46, %v8106_v17 }
 0x157   : >> { %v1483_v30 = vpop.f32.mrf.mxu0  ;;  %v2246_v62 = vmax.f32 %v2240_v47, %v2243_v60  ;;  %v10029_v47 = vrot.slane %v8085_v23, 1  ;;  %v2277_v46 = vrot.slane %v8095_v2, 2 }
 0x158   : >> { %10024 = vst [vmem:[#allocation25_spill] sm:$0xff] %v8101_v59  ;;  %2183 = vrot.lane.b32.xlu1 %v2180_v14, %s7202_s29  ;;  %2226 = vrot.lane.b32.xlu0 %v2223_v15, %s7205_s0  ;;  %1571 = vst [vmem:[#allocation2 + $0x10] sm:$0xff] %v10025_v55  ;;  %v8127_v42 = vadd.f32 %v8124_v13, %v1483_v30  ;;  %v10027_v14 = vrot.slane %v8007_v18, 2  ;;  %v2262_v15 = vrot.slane %v8095_v2, 1  ;;  %v10037_v59 = vmax.f32 %v7849_v50, 0.0 }
 0x159   : >> { %v6643_v5 = vpop.f32.mrf.mxu0  ;;  %v8135_v55 = vadd.f32 %v7858_v56, %v8106_v17  ;;  %v8144_v30 = vadd.f32 %v8106_v17, %v7876_v24  ;;  %v7064_v56 = vld [vmem:[%s9916_s3 + $0x18] sm:$0xff]   ;;  %v8169_v20 = vmax.f32 %v2246_v62, %v2255_v51  ;;  %v10033_v62 = vrot.slane %v8007_v18, 3 }
 0x15a   : >> { %10026 = vst [vmem:[#allocation26_spill] sm:$0xff] %v8127_v42  ;;  %v2195_v49 = vsel %vm2012_vm7, %v10027_v14, %v2194_v26  ;;  %v8140_v40 = vadd.f32 %v8124_v13, %v6643_v5  ;;  %v8146_v26 = vpop.f32.mrf.mxu1  ;;  %v2264_v60 = vsel %vm1995_vm6, %v2262_v15, %v10029_v47  ;;  %6687 = vmatprep.subr.bf16.mxu0 %v7064_v56  ;;  %v10034_v24 = vrot.slane %v8007_v18, 4 }
 0x15b   : >> { %v1496_v14 = vpop.f32.mrf.mxu0  ;;  %v10032_v16 = vmax.f32 %v8144_v30, 0.0  ;;  %6688 = vmatpush3.bf16.msra.mxu0 %v7064_v56  ;;  %v7065_v56 = vld [vmem:[%s9916_s3 + $0x10] sm:$0xff]  }
 0x15c   : >> { %10028 = vst [vmem:[#allocation27_spill] sm:$0xff] %v8140_v40  ;;  %2198 = vrot.lane.b32.xlu1 %v2195_v49, %s7203_s13  ;;  %2267 = vrot.lane.b32.xlu0 %v2264_v60, %s7202_s29  ;;  %v8161_v5 = vadd.f32 %v8124_v13, %v1496_v14  ;;  %v8164_v47 = vpop.f32.mrf.mxu1  ;;  %v10030_v60 = vmax.f32 %v8135_v55, 0.0  ;;  %v10031_v14 = vmax.f32 %v8140_v40, 0.0  ;;  %v2225_v42 = vsel %vm2046_vm9, %v10034_v24, %v2224_v25 }
 0x15d   : >> { %v6644_v49 = vpop.f32.mrf.mxu0  ;;  %1943 = vst [vmem:[#allocation2 + $0x188] sm:$0xff] %v10032_v16  ;;  %v10039_v25 = vmax.f32 %v7747_v31, 0.0  ;;  %6689 = vmatprep.subr.bf16.mxu0 %v7065_v56 }
 0x15e   : >> { %1945 = vst [vmem:[#allocation2 + $0x2c8] sm:$0xff] %v10030_v60  ;;  %1577 = vst [vmem:[#allocation2 + $0x160] sm:$0xff] %v10031_v14  ;;  %v8179_v28 = vadd.f32 %v8124_v13, %v6644_v49  ;;  %v2210_v60 = vsel %vm2029_vm8, %v10033_v62, %v2209_v27  ;;  %v10035_v14 = vrot.slane %v8085_v23, 2  ;;  %v10036_v49 = vmax.f32 %v7831_v33, 0.0 }
 0x15f   : >> { %v1499_v40 = vpop.f32.mrf.mxu0  ;;  %v2292_v27 = vrot.slane %v8095_v2, 3  ;;  %v10038_v62 = vmax.f32 %v7731_v8, 0.0  ;;  %v10042_v8 = vmax.f32 %v7785_v10, 0.0  ;;  %6690 = vmatpush3.bf16.msra.mxu0 %v7065_v56  ;;  %v2507_v56 = vld [vmem:[#allocation2 + $0x2f8] sm:$0xf]  ;;  %v10047_v33 = vrot.slane %v8085_v23, 1 }
 0x160   : >> { %v2279_v15 = vsel %vm2012_vm7, %v2277_v46, %v10035_v14  ;;  %v2512_v16 = vmax.f32 %v10037_v59, %v10036_v49  ;;  %2213 = vrot.lane.b32.xlu1 %v2210_v60, %s7204_s14  ;;  %v10040_v46 = vmax.f32 %v8161_v5, 0.0  ;;  %v8208_v50 = vadd.f32 %v8124_v13, %v1499_v40  ;;  %v8210_v59 = vpop.f32.mrf.mxu1 }
 0x161   : >> { %2282 = vrot.lane.b32.xlu0 %v2279_v15, %s7203_s13  ;;  %v2502_v24 = vmax.f32 %v10039_v25, %v10038_v62  ;;  %v10041_v15 = vmax.f32 %v7767_v48, 0.0  ;;  %v10043_v60 = vmax.f32 %v7796_v1, 0.0  ;;  %v10044_v14 = vmax.f32 %v7812_v53, 0.0  ;;  %v6647_v62 = vpop.f32.mrf.mxu0 }
 0x162   : >> { %1575 = vst [vmem:[#allocation2 + $0x80] sm:$0xff] %v10040_v46  ;;  %v8225_v40 = vadd.f32 %v8106_v17, %v7907_v57  ;;  %v8229_v25 = vadd.f32 %v7916_v21, %v8106_v17  ;;  %v2265_v46 = vrot.slane %v8169_v20, 1  ;;  %v10045_v48 = vrot.slane %v8085_v23, 3 }
 0x163   : >> { %v2503_v31 = vmax.f32 %v10042_v8, %v10041_v15  ;;  %v2511_v49 = vmax.f32 %v10044_v14, %v10043_v60  ;;  %v8237_v53 = vadd.f32 %v8124_v13, %v6647_v62  ;;  %v9973_v15 = vrot.slane %v8085_v23, 4  ;;  %v1512_v8 = vpop.f32.mrf.mxu0 }
 0x164   : >> { %v2294_v10 = vsel %vm2029_vm8, %v2292_v27, %v10045_v48  ;;  %v9971_v60 = vmax.f32 %v8229_v25, 0.0  ;;  %2228 = vrot.lane.b32.xlu1 %v2225_v42, %s7205_s0  ;;  %v8248_v14 = vadd.f32 %v8124_v13, %v1512_v8  ;;  %v8252_v62 = vadd.f32 %v8106_v17, %v7933_v44  ;;  %v2510_v8 = vld [vmem:[#allocation2 + $0x270] sm:$0xf]  ;;  %v2501_v44 = vld [vmem:[#allocation2 + $0x2e8] sm:$0xf] }
 0x165   : >> { %v8240_v57 = vmax.f32 %v2503_v31, %v2512_v16  ;;  %2297 = vrot.lane.b32.xlu0 %v2294_v10, %s7204_s14  ;;  %v9972_v27 = vmax.f32 %v8237_v53, 0.0  ;;  %v8254_v16 = vpop.f32.mrf.mxu1  ;;  %v2307_v31 = vrot.slane %v8095_v2, 4  ;;  %v8257_v48 = vmax.f32 %v2502_v24, %v2511_v49  ;;  %v6648_v1 = vpop.f32.mrf.mxu0 }
 0x166   : >> { %1949 = vst [vmem:[#allocation2 + $0x288] sm:$0xff] %v9971_v60  ;;  %v8263_v42 = vadd.f32 %v7942_v11, %v8106_v17  ;;  %v2280_v10 = vrot.slane %v8169_v20, 2  ;;  %v8270_v24 = vadd.f32 %v8124_v13, %v6648_v1  ;;  %v2266_v60 = vsel %vm1995_vm6, %v10047_v33, %v2265_v46  ;;  %v2498_v1 = vld [vmem:[#allocation2 + $0x178] sm:$0xf] }
 0x167   : >> { %10046 = vst [vmem:[#allocation28_spill] sm:$0xff] %v8257_v48  ;;  %1581 = vst [vmem:[#allocation2 + $0x28] sm:$0xff] %v9972_v27  ;;  %v2309_v11 = vsel %vm2046_vm9, %v2307_v31, %v9973_v15  ;;  %v1515_v51 = vpop.f32.mrf.mxu0  ;;  %v10048_v49 = vmax.f32 %v8248_v14, 0.0  ;;  %v10049_v31 = vmax.f32 %v8252_v62, 0.0  ;;  %v8293_v27 = vadd.f32 %v8106_v17, %v7967_v36 }
 0x168   : >> { %2269 = vrot.lane.b32.xlu1 %v2266_v60, %s7202_s29  ;;  %v8287_v46 = vadd.f32 %v8124_v13, %v1515_v51  ;;  %v8297_v60 = vadd.f32 %v8002_v52, %v8106_v17  ;;  %v2520_v33 = vrot.slane %v8257_v48, 1  ;;  %v2513_v15 = vmax.f32 %v2507_v56, %v2510_v8 }
 0x169   : >> { %2312 = vrot.lane.b32.xlu0 %v2309_v11, %s7205_s0  ;;  %1579 = vst [vmem:[#allocation2 + $0x58] sm:$0xff] %v10048_v49  ;;  %1947 = vst [vmem:[#allocation2 + $0x348] sm:$0xff] %v10049_v31  ;;  %v8299_v11 = vpop.f32.mrf.mxu1  ;;  %v2295_v49 = vrot.slane %v8169_v20, 3  ;;  %v9980_v13 = vrot.slane %v8240_v57, 2  ;;  %v8309_v21 = vadd.f32 %v8106_v17, %v8025_v22  ;;  %v10050_v52 = vrot.slane %v8085_v23, 2 }
 0x16a   : >> { %v9976_v36 = vmax.f32 %v8297_v60, 0.0  ;;  %v10051_v18 = vrot.slane %v8240_v57, 1  ;;  %v2504_v8 = vmax.f32 %v2498_v1, %v2501_v44  ;;  %v2535_v51 = vrot.slane %v8257_v48, 2 }
 0x16b   : >> { %v2281_v2 = vsel %vm2012_vm7, %v10050_v52, %v2280_v10  ;;  %v9977_v22 = vmax.f32 %v8309_v21, 0.0  ;;  %v8325_v31 = vadd.f32 %v8045_v58, %v8106_v17  ;;  %v8327_v10 = vpop.f32.mrf.mxu1  ;;  %v10054_v58 = vmax.f32 %v7871_v19, 0.0 }
 0x16c   : >> { %v2522_v56 = vsel %vm1995_vm6, %v2520_v33, %v10051_v18  ;;  %2284 = vrot.lane.b32.xlu1 %v2281_v2, %s7203_s13  ;;  %1953 = vst [vmem:[#allocation2 + $0x308] sm:$0xff] %v9976_v36  ;;  %v10052_v18 = vrot.slane %v8085_v23, 3  ;;  %v2310_v2 = vrot.slane %v8169_v20, 4  ;;  %v8333_v1 = vmax.f32 %v2504_v8, %v2513_v15 }
 0x16d   : >> { %2525 = vrot.lane.b32.xlu0 %v2522_v56, %s7202_s29  ;;  %v2551_v33 = vrot.slane %v8240_v57, 3  ;;  %v2537_v52 = vsel %vm2012_vm7, %v2535_v51, %v9980_v13  ;;  %v10053_v56 = vmax.f32 %v7854_v45, 0.0  ;;  %1951 = vst [vmem:[#allocation2 + $0x280] sm:$0xff] %v9977_v22  ;;  %v8348_v20 = vadd.f32 %v8106_v17, %v8078_v37 }
 0x16e   : >> { %v2296_v44 = vsel %vm2029_vm8, %v10052_v18, %v2295_v49  ;;  %v10055_v15 = vmax.f32 %v7914_v3, 0.0  ;;  %v10056_v8 = vmax.f32 %v7925_v29, 0.0  ;;  %v10057_v51 = vmax.f32 %v7931_v0, 0.0  ;;  %v8369_v3 = vpop.f32.mrf.mxu1 }
 0x16f   : >> { %v2588_v36 = vmax.f32 %v10054_v58, %v10053_v56  ;;  %v10058_v45 = vmax.f32 %v7940_v54, 0.0  ;;  %v10059_v56 = vmax.f32 %v7948_v38, 0.0  ;;  %v10060_v58 = vmax.f32 %v7956_v12, 0.0 }
 0x170   : >> { %v2589_v18 = vmax.f32 %v10056_v8, %v10055_v15  ;;  %v8364_v49 = vadd.f32 %v8108_v6, %v8106_v17  ;;  %2299 = vrot.lane.b32.xlu1 %v2296_v44, %s7204_s14  ;;  %v2550_v29 = vrot.slane %v8257_v48, 3  ;;  %v8375_v54 = vadd.f32 %v8106_v17, %v8146_v26 }
 0x171   : >> { %v2597_v19 = vmax.f32 %v10058_v45, %v10057_v51  ;;  %v2598_v22 = vmax.f32 %v10060_v58, %v10059_v56  ;;  %2540 = vrot.lane.b32.xlu0 %v2537_v52, %s7203_s13  ;;  %v10061_v38 = vrot.slane %v8085_v23, 4  ;;  %v2523_v6 = vrot.slane %v8333_v1, 1  ;;  %v8393_v51 = vpop.f32.mrf.mxu1  ;;  %v2584_v45 = vld [vmem:[#allocation2 + $0x1c8] sm:$0xf] }
 0x172   : >> { %v9978_v0 = vmax.f32 %v8364_v49, 0.0  ;;  %v2566_v44 = vrot.slane %v8240_v57, 4  ;;  %v2552_v52 = vsel %vm2029_vm8, %v2550_v29, %v2551_v33  ;;  %v9979_v26 = vmax.f32 %v8375_v54, 0.0  ;;  %v2593_v56 = vld [vmem:[#allocation2 + $0xe8] sm:$0xf] }
 0x173   : >> { %v2311_v12 = vsel %vm2046_vm9, %v10061_v38, %v2310_v2  ;;  %v8383_v15 = vmax.f32 %v2588_v36, %v2597_v19  ;;  %v8385_v8 = vmax.f32 %v2589_v18, %v2598_v22  ;;  %v2565_v2 = vrot.slane %v8257_v48, 4  ;;  %v2587_v18 = vld [vmem:[#allocation2 + $0x138] sm:$0xf] }
 0x174   : >> { %1957 = vst [vmem:[#allocation2 + $0x1b8] sm:$0xff] %v9978_v0  ;;  %2314 = vrot.lane.b32.xlu1 %v2311_v12, %s7205_s0  ;;  %1955 = vst [vmem:[#allocation2 + $0x240] sm:$0xff] %v9979_v26  ;;  %v2538_v36 = vrot.slane %v8333_v1, 2  ;;  %v2596_v19 = vld [vmem:[#allocation2 + $0x218] sm:$0xf]  ;;  %v10062_v58 = vmax.f32 %v8135_v55, 0.0 }
 0x175   : >> { %2555 = vrot.lane.b32.xlu0 %v2552_v52, %s7204_s14  ;;  %v2567_v22 = vsel %vm2046_vm9, %v2565_v2, %v2566_v44  ;;  %v10063_v29 = vmax.f32 %v8144_v30, 0.0  ;;  %v10064_v12 = vmax.f32 %v8155_v63, 0.0  ;;  %v10065_v52 = vmax.f32 %v8225_v40, 0.0  ;;  %v1884_v40 = vpop.f32.mrf.mxu1 }
 0x176   : >> { %v10066_v37 = vrot.slane %v8240_v57, 1  ;;  %v2606_v13 = vrot.slane %v8383_v15, 1  ;;  %v2607_v2 = vrot.slane %v8385_v8, 1  ;;  %v10067_v48 = vmax.f32 %v8237_v53, 0.0 }
 0x177   : >> { %v2855_v38 = vmax.f32 %v10063_v29, %v10062_v58  ;;  %v8407_v0 = vmax.f32 %v10065_v52, %v10064_v12  ;;  %v10068_v55 = vmax.f32 %v8248_v14, 0.0  ;;  %v2553_v63 = vrot.slane %v8333_v1, 3  ;;  %v8423_v12 = vpop.f32.mrf.mxu1 }
 0x178   : >> { %v2524_v26 = vsel %vm1995_vm6, %v10066_v37, %v2523_v6  ;;  %v2590_v58 = vmax.f32 %v2584_v45, %v2587_v18  ;;  %v2599_v29 = vmax.f32 %v2593_v56, %v2596_v19  ;;  %v2621_v37 = vrot.slane %v8383_v15, 2 }
 0x179   : >> { %v2846_v30 = vmax.f32 %v10068_v55, %v10067_v48  ;;  %2527 = vrot.lane.b32.xlu1 %v2524_v26, %s7202_s29  ;;  %2570 = vrot.lane.b32.xlu0 %v2567_v22, %s7205_s0  ;;  %v2622_v6 = vrot.slane %v8385_v8, 2  ;;  %v10069_v53 = vrot.slane %v8240_v57, 2  ;;  %v2608_v48 = vsel %vm1995_vm6, %v2606_v13, %v2607_v2 }
 0x17a   : >> { %v8435_v45 = vadd.f32 %v8164_v47, %v8106_v17  ;;  %v2554_v56 = vsel %vm2029_vm8, %v2551_v33, %v2553_v63  ;;  %v2568_v22 = vrot.slane %v8333_v1, 4  ;;  %v8439_v18 = vmax.f32 %v2590_v58, %v2599_v29  ;;  %v1887_v63 = vpop.f32.mrf.mxu1 }
 0x17b   : >> { %v2539_v14 = vsel %vm2012_vm7, %v10069_v53, %v2538_v36  ;;  %v8429_v26 = vmax.f32 %v2846_v30, %v2855_v38  ;;  %v2623_v36 = vsel %vm2012_vm7, %v2621_v37, %v2622_v6  ;;  %v2636_v13 = vrot.slane %v8383_v15, 3 }
 0x17c   : >> { %v2637_v19 = vrot.slane %v8385_v8, 3  ;;  %v10070_v38 = vmax.f32 %v7965_v39, 0.0  ;;  %v10071_v52 = vmax.f32 %v7980_v43, 0.0  ;;  %v10072_v47 = vmax.f32 %v8000_v32, 0.0 }
 0x17d   : >> { %2542 = vrot.lane.b32.xlu1 %v2539_v14, %s7203_s13  ;;  %2611 = vrot.lane.b32.xlu0 %v2608_v48, %s7202_s29  ;;  %v10073_v30 = vmax.f32 %v8015_v41, 0.0  ;;  %v10074_v1 = vmax.f32 %v8023_v7, 0.0  ;;  %v10075_v58 = vmax.f32 %v8034_v35, 0.0  ;;  %v10076_v37 = vmax.f32 %v8043_v61, 0.0 }
 0x17e   : >> { %v2674_v55 = vmax.f32 %v10071_v52, %v10070_v38  ;;  %v10077_v53 = vmax.f32 %v8064_v34, 0.0  ;;  %v1930_v39 = vmax.f32 %v8435_v45, 0.0  ;;  %v8463_v43 = vadd.f32 %v8106_v17, %v8210_v59 }
 0x17f   : >> { %v2675_v33 = vmax.f32 %v10073_v30, %v10072_v47  ;;  %v2683_v29 = vmax.f32 %v10075_v58, %v10074_v1  ;;  %v2609_v32 = vrot.slane %v8439_v18, 1  ;;  %v2624_v41 = vrot.slane %v8439_v18, 2  ;;  %v2673_v47 = vld [vmem:[#allocation2 + $0x338] sm:$0xf]  ;;  %v2679_v1 = vld [vmem:[#allocation2 + $0xc0] sm:$0xf] }
 0x180   : >> { %v2684_v14 = vmax.f32 %v10077_v53, %v10076_v37  ;;  %v1928_v7 = vmax.f32 %v8463_v43, 0.0  ;;  %v8472_v35 = vadd.f32 %v8254_v16, %v8106_v17  ;;  %v2569_v61 = vsel %vm2046_vm9, %v2566_v44, %v2568_v22  ;;  %v2670_v16 = vld [vmem:[#allocation2 + $0xa8] sm:$0xf]  ;;  %v2682_v58 = vld [vmem:[#allocation2 + $0x10] sm:$0xf] }
 0x181   : >> { %2557 = vrot.lane.b32.xlu1 %v2554_v56, %s7204_s14  ;;  %2626 = vrot.lane.b32.xlu0 %v2623_v36, %s7203_s13  ;;  %v2651_v34 = vrot.slane %v8383_v15, 4  ;;  %v2652_v59 = vrot.slane %v8385_v8, 4  ;;  %v8479_v48 = vadd.f32 %v8106_v17, %v8299_v11  ;;  %v6685_v56 = vpop.f32.mrf.mxu1  ;;  %v2638_v36 = vsel %vm2029_vm8, %v2636_v13, %v2637_v19  ;;  %v2765_v43 = vld [vmem:[#allocation2 + $0x160] sm:$0xf] }
 0x182   : >> { %v8484_v38 = vmax.f32 %v2674_v55, %v2683_v29  ;;  %v8486_v52 = vmax.f32 %v2675_v33, %v2684_v14  ;;  %v1933_v44 = vmax.f32 %v8472_v35, 0.0  ;;  %v8494_v22 = vadd.f32 %v8327_v10, %v8106_v17 }
 0x183   : >> { %v1931_v11 = vmax.f32 %v8479_v48, 0.0  ;;  %v8498_v13 = vadd.f32 %v8106_v17, %v8369_v3  ;;  %v2610_v55 = vsel %vm1995_vm6, %v2607_v2, %v2609_v32  ;;  %v2625_v30 = vsel %vm2012_vm7, %v2622_v6, %v2624_v41  ;;  %v1900_v53 = vpop.f32.mrf.mxu1 }
 0x184   : >> { %1961 = vst [vmem:[#allocation2 + $0x180] sm:$0xff] %v1933_v44  ;;  %v8508_v29 = vadd.f32 %v8393_v51, %v8106_v17  ;;  %v8511_v10 = vadd.f32 %v8106_v17, %v1884_v40  ;;  %v2653_v3 = vsel %vm2046_vm9, %v2651_v34, %v2652_v59  ;;  %v2676_v2 = vmax.f32 %v2670_v16, %v2673_v47 }
 0x185   : >> { %2572 = vrot.lane.b32.xlu1 %v2569_v61, %s7205_s0  ;;  %2641 = vrot.lane.b32.xlu0 %v2638_v36, %s7204_s14  ;;  %v8502_v33 = vpop.permute.xlu0 %2001  ;;  %1959 = vst [vmem:[#allocation2 + $0x48] sm:$0xff] %v1931_v11  ;;  %v2692_v14 = vrot.slane %v8484_v38, 1  ;;  %v2693_v51 = vrot.slane %v8486_v52, 1  ;;  %v2685_v41 = vmax.f32 %v2679_v1, %v2682_v58  ;;  %v10078_v61 = vmax.f32 %v8229_v25, 0.0 }
 0x186   : >> { %v1937_v40 = vmax.f32 %v8508_v29, 0.0  ;;  %v1935_v32 = vmax.f32 %v8511_v10, 0.0  ;;  %v10079_v34 = vmax.f32 %v8252_v62, 0.0  ;;  %v10080_v16 = vmax.f32 %v8263_v42, 0.0 }
 0x187   : >> { %v10081_v47 = vmax.f32 %v8293_v27, 0.0  ;;  %v10083_v25 = vmax.f32 %v8309_v21, 0.0  ;;  %v10084_v62 = vmax.f32 %v8325_v31, 0.0  ;;  %v10085_v42 = vmax.f32 %v8348_v20, 0.0  ;;  %v6686_v31 = vpop.f32.mrf.mxu1 }
 0x188   : >> { %v2932_v36 = vmax.f32 %v10079_v34, %v10078_v61  ;;  %1965 = vst [vmem:[#allocation2 + $0xd0] sm:$0xff] %v1937_v40  ;;  %1963 = vst [vmem:[#allocation2 + $0x190] sm:$0xff] %v1935_v32  ;;  %v8550_v27 = vadd.f32 %v8423_v12, %v8106_v17  ;;  %v2639_v61 = vrot.slane %v8439_v18, 3  ;;  %v2707_v34 = vrot.slane %v8484_v38, 2 }
 0x189   : >> { %2613 = vrot.lane.b32.xlu1 %v2610_v55, %s7202_s29  ;;  %2656 = vrot.lane.b32.xlu0 %v2653_v3, %s7205_s0  ;;  %v2933_v37 = vmax.f32 %v10081_v47, %v10080_v16  ;;  %v8534_v6 = vpop.permute.xlu0 %2018  ;;  %v10082_v55 = vmax.f32 %v8297_v60, 0.0  ;;  %v2942_v58 = vmax.f32 %v10085_v42, %v10084_v62  ;;  %v8553_v3 = vadd.f32 %v8106_v17, %v1887_v63 }
 0x18a   : >> { %v2708_v60 = vrot.slane %v8486_v52, 2  ;;  %v8559_v21 = vadd.f32 %v6685_v56, %v8106_v17  ;;  %v2694_v20 = vsel %vm1995_vm6, %v2692_v14, %v2693_v51  ;;  %v8571_v47 = vmax.f32 %v2676_v2, %v2685_v41  ;;  %v10088_v41 = vld [vmem:[#allocation27_spill] sm:$0xff] }
 0x18b   : >> { %v2941_v1 = vmax.f32 %v10083_v25, %v10082_v55  ;;  %v8566_v12 = vmax.f32 %v2933_v37, %v2942_v58  ;;  %v8576_v25 = vadd.f32 %v8106_v17, %v1900_v53  ;;  %v2654_v14 = vrot.slane %v8439_v18, 4  ;;  %v1903_v53 = vpop.f32.mrf.mxu1 }
 0x18c   : >> { %v9982_v55 = vmax.f32 %v8559_v21, 0.0  ;;  %v2722_v37 = vrot.slane %v8484_v38, 3  ;;  %v10087_v62 = vmax.f32 %v8091_v4, 0.0  ;;  %v10089_v42 = vmax.f32 %v10088_v41, 0.0  ;;  %v10091_v4 = vld [vmem:[#allocation25_spill] sm:$0xff] }
 0x18d   : >> { %v8564_v16 = vmax.f32 %v2932_v36, %v2941_v1  ;;  %2628 = vrot.lane.b32.xlu1 %v2625_v30, %s7203_s13  ;;  %2697 = vrot.lane.b32.xlu0 %v2694_v20, %s7202_s29  ;;  %v2723_v1 = vrot.slane %v8486_v52, 3  ;;  %v10086_v30 = vmax.f32 %v8076_v9, 0.0  ;;  %v10090_v58 = vmax.f32 %v8161_v5, 0.0 }
 0x18e   : >> { %v2354_v36 = vpop.permute.xlu0 %2353  ;;  %1969 = vst [vmem:[#allocation2 + $0x1b0] sm:$0xff] %v9982_v55  ;;  %v1939_v18 = vmax.f32 %v8576_v25, 0.0  ;;  %v2640_v56 = vsel %vm2029_vm8, %v2637_v19, %v2639_v61  ;;  %v2709_v9 = vsel %vm2012_vm7, %v2707_v34, %v2708_v60  ;;  %v2695_v63 = vrot.slane %v8571_v47, 1 }
 0x18f   : >> { %v2760_v2 = vmax.f32 %v10087_v62, %v10086_v30  ;;  %v2769_v20 = vmax.f32 %v10090_v58, %v10089_v42  ;;  %v10092_v30 = vmax.f32 %v10091_v4, 0.0  ;;  %v10093_v62 = vld [vmem:[#allocation26_spill] sm:$0xff]  ;;  %v10095_v42 = vmax.f32 %v8179_v28, 0.0 }
 0x190   : >> { %v10094_v41 = vmax.f32 %v10093_v62, 0.0  ;;  %v10096_v58 = vmax.f32 %v8208_v50, 0.0  ;;  %1967 = vst [vmem:[#allocation2 + $0x2b0] sm:$0xff] %v1939_v18  ;;  %v2655_v28 = vsel %vm2046_vm9, %v2652_v59, %v2654_v14  ;;  %v8617_v50 = vadd.f32 %v6686_v31, %v8106_v17 }
 0x191   : >> { %2643 = vrot.lane.b32.xlu1 %v2640_v56, %s7204_s14  ;;  %2712 = vrot.lane.b32.xlu0 %v2709_v9, %s7203_s13  ;;  %v8611_v19 = vpop.permute.xlu1 %2003  ;;  %v8620_v61 = vadd.f32 %v8106_v17, %v1903_v53  ;;  %v2724_v56 = vsel %vm2029_vm8, %v2722_v37, %v2723_v1  ;;  %v2737_v9 = vrot.slane %v8484_v38, 4  ;;  %v2738_v4 = vrot.slane %v8486_v52, 4 }
 0x192   : >> { %v2761_v5 = vmax.f32 %v10094_v41, %v10092_v30  ;;  %v2770_v55 = vmax.f32 %v10096_v58, %v10095_v42  ;;  %v2369_v34 = vpop.permute.xlu0 %2368  ;;  %v8627_v30 = vmax.f32 %v2760_v2, %v2769_v20  ;;  %v2359_v62 = vsel %vm2007_vm10, 0.0, %v2354_v36  ;;  %v10101_v58 = vld [vmem:[#allocation15_spill] sm:$0xff] }
 0x193   : >> { %v1942_v31 = vmax.f32 %v8617_v50, 0.0  ;;  %v1940_v17 = vmax.f32 %v8620_v61, 0.0  ;;  %v2696_v14 = vsel %vm1995_vm6, %v2693_v51, %v2695_v63  ;;  %v2374_v37 = vsel %vm2024_vm11, 0.0, %v2369_v34 }
 0x194   : >> { %v8630_v59 = vmax.f32 %v2761_v5, %v2770_v55  ;;  %v2710_v53 = vrot.slane %v8571_v47, 2  ;;  %v10097_v55 = vmax.f32 %v8364_v49, 0.0  ;;  %v10098_v2 = vmax.f32 %v8375_v54, 0.0 }
 0x195   : >> { %2658 = vrot.lane.b32.xlu1 %v2655_v28, %s7205_s0  ;;  %2727 = vrot.lane.b32.xlu0 %v2724_v56, %s7204_s14  ;;  %v8641_v36 = vpop.permute.xlu1 %2020  ;;  %v3019_v41 = vmax.f32 %v1928_v7, %v1930_v39  ;;  %v3027_v51 = vmax.f32 %v1931_v11, %v1933_v44  ;;  %v10099_v63 = vmax.f32 %v8494_v22, 0.0  ;;  %v10100_v5 = vmax.f32 %v8498_v13, 0.0  ;;  %v2756_v39 = vld [vmem:[#allocation2 + $0x1e0] sm:$0xf]  ;;  %v2768_v11 = vld [vmem:[#allocation2 + $0x58] sm:$0xf] }
 0x196   : >> { %v3018_v20 = vmax.f32 %v10098_v2, %v10097_v55  ;;  %v2361_v49 = vadd.f32 %v2359_v62, %v10101_v58  ;;  %v2384_v28 = vpop.permute.xlu0 %2383  ;;  %v2739_v54 = vsel %vm2046_vm9, %v2737_v9, %v2738_v4  ;;  %v2778_v45 = vrot.slane %v8627_v30, 1  ;;  %v2759_v44 = vld [vmem:[#allocation2 + $0x80] sm:$0xf] }
 0x197   : >> { %v3028_v42 = vmax.f32 %v10100_v5, %v10099_v63  ;;  %v3104_v7 = vmax.f32 %v1935_v32, %v1937_v40  ;;  %v2389_v35 = vsel %vm2041_vm12, 0.0, %v2384_v28  ;;  %v2779_v48 = vrot.slane %v8630_v59, 1 }
 0x198   : >> { %v8670_v22 = vmax.f32 %v3018_v20, %v3027_v51  ;;  %v2376_v50 = vadd.f32 %v2374_v37, %v2361_v49  ;;  %v10102_v29 = vmax.f32 %v8550_v27, 0.0  ;;  %v10103_v10 = vmax.f32 %v8553_v3, 0.0 }
 0x199   : >> { %v8672_v13 = vmax.f32 %v3019_v41, %v3028_v42  ;;  %2699 = vrot.lane.b32.xlu1 %v2696_v14, %s7202_s29  ;;  %2742 = vrot.lane.b32.xlu0 %v2739_v54, %s7205_s0  ;;  %v2711_v32 = vsel %vm2012_vm7, %v2708_v60, %v2710_v53  ;;  %v2725_v61 = vrot.slane %v8571_v47, 3  ;;  %v2762_v62 = vmax.f32 %v2756_v39, %v2759_v44 }
 0x19a   : >> { %v3105_v40 = vmax.f32 %v10103_v10, %v10102_v29  ;;  %v2356_v34 = vpop.permute.xlu1 %2355  ;;  %v2391_v56 = vadd.f32 %v2389_v35, %v2376_v50  ;;  %v2399_v9 = vpop.permute.xlu0 %2398  ;;  %v2771_v14 = vmax.f32 %v2765_v43, %v2768_v11  ;;  %v2780_v27 = vsel %vm1995_vm6, %v2778_v45, %v2779_v48 }
 0x19b   : >> { %v2404_v37 = vsel %vm2058_vm13, 0.0, %v2399_v9  ;;  %v2793_v3 = vrot.slane %v8627_v30, 2  ;;  %v2794_v55 = vrot.slane %v8630_v59, 2  ;;  %v2726_v53 = vsel %vm2029_vm8, %v2723_v1, %v2725_v61 }
 0x19c   : >> { %v2406_v60 = vadd.f32 %v2404_v37, %v2391_v56  ;;  %v2740_v2 = vrot.slane %v8571_v47, 4  ;;  %v8697_v51 = vmax.f32 %v2762_v62, %v2771_v14  ;;  %v10104_v63 = vmax.f32 %v8270_v24, 0.0  ;;  %v2842_v14 = vld [vmem:[#allocation2 + $0x28] sm:$0xf] }
 0x19d   : >> { %2714 = vrot.lane.b32.xlu1 %v2711_v32, %s7203_s13  ;;  %2783 = vrot.lane.b32.xlu0 %v2780_v27, %s7202_s29  ;;  %v10105_v5 = vmax.f32 %v8287_v46, 0.0  ;;  %v10106_v58 = vmax.f32 %v8559_v21, 0.0  ;;  %v3114_v28 = vmax.f32 %v1940_v17, %v1942_v31  ;;  %v2360_v1 = vsel %vm2007_vm10, 0.0, %v2356_v34  ;;  %v10108_v34 = vld [vmem:[#allocation19_spill] sm:$0xff] }
 0x19e   : >> { %v2371_v20 = vpop.permute.xlu1 %2370  ;;  %2408 = vst.msk [vmem:[#allocation3 + $0x40] sm:$0xff] %vm2063_vm14, %v2406_v60  ;;  %v2096_v41 = vpop.permute.xlu0 %2095  ;;  %v2795_v47 = vsel %vm2012_vm7, %v2793_v3, %v2794_v55  ;;  %v2808_v54 = vrot.slane %v8627_v30, 3  ;;  %v2809_v45 = vrot.slane %v8630_v59, 3  ;;  %v2741_v46 = vsel %vm2046_vm9, %v2738_v4, %v2740_v2  ;;  %v2845_v37 = vld [vmem:[#allocation2 + $0x188] sm:$0xf] }
 0x19f   : >> { %v2847_v42 = vmax.f32 %v10105_v5, %v10104_v63  ;;  %v3113_v49 = vmax.f32 %v1939_v18, %v10106_v58  ;;  %v2375_v24 = vsel %vm2024_vm11, 0.0, %v2371_v20  ;;  %v8719_v25 = vmax.f32 %v3105_v40, %v3114_v28  ;;  %v10107_v18 = vld [vmem:[#allocation16_spill] sm:$0xff]  ;;  %v2851_v27 = vld [vmem:[#allocation2 + $0x2c8] sm:$0xf] }
 0x1a0   : >> { %v2362_v31 = vadd.f32 %v2360_v1, %v10107_v18  ;;  %v2781_v39 = vrot.slane %v8697_v51, 1  ;;  %v2823_v35 = vrot.slane %v8627_v30, 4  ;;  %v2824_v44 = vrot.slane %v8630_v59, 4  ;;  %v2854_v20 = vld [vmem:[#allocation2 + $0x348] sm:$0xf] }
 0x1a1   : >> { %2729 = vrot.lane.b32.xlu1 %v2726_v53, %s7204_s14  ;;  %2798 = vrot.lane.b32.xlu0 %v2795_v47, %s7203_s13  ;;  %v8717_v21 = vmax.f32 %v3104_v7, %v3113_v49  ;;  %v2101_v50 = vsel %vm2007_vm10, 0.0, %v2096_v41  ;;  %v2810_v4 = vsel %vm2029_vm8, %v2808_v54, %v2809_v45  ;;  %v8729_v7 = vmax.f32 %v2847_v42, %v8407_v0 }
 0x1a2   : >> { %v2386_v17 = vpop.permute.xlu1 %2385  ;;  %v2111_v43 = vpop.permute.xlu0 %2110  ;;  %v2377_v29 = vadd.f32 %v2375_v24, %v2362_v31  ;;  %v2796_v40 = vrot.slane %v8697_v51, 2  ;;  %v2103_v56 = vadd.f32 %v2101_v50, %v10108_v34  ;;  %v2782_v9 = vsel %vm1995_vm6, %v2779_v48, %v2781_v39 }
 0x1a3   : >> { %v2390_v11 = vsel %vm2041_vm12, 0.0, %v2386_v17  ;;  %v2116_v10 = vsel %vm2024_vm11, 0.0, %v2111_v43  ;;  %v2825_v0 = vsel %vm2046_vm9, %v2823_v35, %v2824_v44  ;;  %v2864_v53 = vrot.slane %v8429_v26, 1 }
 0x1a4   : >> { %v2392_v32 = vadd.f32 %v2390_v11, %v2377_v29  ;;  %v2865_v2 = vrot.slane %v8729_v7, 1  ;;  %v2118_v63 = vadd.f32 %v2116_v10, %v2103_v56  ;;  %v2848_v48 = vmax.f32 %v2842_v14, %v2845_v37  ;;  %v10109_v29 = vld [vmem:[#allocation18_spill] sm:$0xff] }
 0x1a5   : >> { %2744 = vrot.lane.b32.xlu1 %v2741_v46, %s7205_s0  ;;  %2813 = vrot.lane.b32.xlu0 %v2810_v4, %s7204_s14  ;;  %v2797_v42 = vsel %vm2012_vm7, %v2794_v55, %v2796_v40  ;;  %v2811_v49 = vrot.slane %v8697_v51, 3  ;;  %v2857_v1 = vmax.f32 %v2851_v27, %v2854_v20  ;;  %v2879_v24 = vrot.slane %v8429_v26, 2 }
 0x1a6   : >> { %v2401_v61 = vpop.permute.xlu1 %2400  ;;  %v2126_v62 = vpop.permute.xlu0 %2125  ;;  %v2866_v54 = vsel %vm1995_vm6, %v2864_v53, %v2865_v2  ;;  %v2880_v46 = vrot.slane %v8729_v7, 2  ;;  %v2826_v17 = vrot.slane %v8697_v51, 4  ;;  %v2894_v50 = vrot.slane %v8429_v26, 3 }
 0x1a7   : >> { %v2405_v3 = vsel %vm2058_vm13, 0.0, %v2401_v61  ;;  %v2131_v60 = vsel %vm2041_vm12, 0.0, %v2126_v62  ;;  %v2812_v55 = vsel %vm2029_vm8, %v2809_v45, %v2811_v49  ;;  %v8758_v43 = vmax.f32 %v2848_v48, %v2857_v1 }
 0x1a8   : >> { %v2407_v41 = vadd.f32 %v2405_v3, %v2392_v32  ;;  %v2133_v58 = vadd.f32 %v2131_v60, %v2118_v63  ;;  %v2881_v11 = vsel %vm2012_vm7, %v2879_v24, %v2880_v46  ;;  %v2895_v4 = vrot.slane %v8729_v7, 3  ;;  %v10110_v60 = vld [vmem:[#allocation14_spill] sm:$0xff]  ;;  %v7066_v24 = vld [vmem:[%s9916_s3 + $0x8] sm:$0xff]  }
 0x1a9   : >> { %2785 = vrot.lane.b32.xlu1 %v2782_v9, %s7202_s29  ;;  %2828 = vrot.lane.b32.xlu0 %v2825_v0, %s7205_s0  ;;  %v2827_v40 = vsel %vm2046_vm9, %v2824_v44, %v2826_v17  ;;  %v2909_v34 = vrot.slane %v8429_v26, 4  ;;  %v2867_v9 = vrot.slane %v8758_v43, 1  ;;  %v2910_v0 = vrot.slane %v8729_v7, 4 }
 0x1aa   : >> { %2409 = vst.msk [vmem:[#allocation3 + $0x48] sm:$0xff] %vm2063_vm14, %v2407_v41  ;;  %v2113_v5 = vpop.permute.xlu1 %2112  ;;  %v2141_v28 = vpop.permute.xlu0 %2140  ;;  %v2896_v62 = vsel %vm2029_vm8, %v2894_v50, %v2895_v4  ;;  %v2031_v53 = vrot.slane %v10110_v60, 3  ;;  %v2882_v63 = vrot.slane %v8758_v43, 2  ;;  %v2912_v50 = vrot.slane %v8758_v43, 4  ;;  %6711 = vmatprep.subr.bf16.mxu1 %v7066_v24 }
 0x1ab   : >> { %v2146_v47 = vsel %vm2058_vm13, 0.0, %v2141_v28  ;;  %v2117_v45 = vsel %vm2024_vm11, 0.0, %v2113_v5  ;;  %v2868_v20 = vsel %vm1995_vm6, %v2865_v2, %v2867_v9  ;;  %v2911_v48 = vsel %vm2046_vm9, %v2909_v34, %v2910_v0  ;;  %v10112_v28 = vld [vmem:[#allocation21_spill] sm:$0xff]  ;;  %v2931_v34 = vld [vmem:[#allocation2 + $0x280] sm:$0xf]  ;;  %6712 = vmatpush3.bf16.msra.mxu1 %v7066_v24 }
 0x1ac   : >> { %v2148_v18 = vadd.f32 %v2146_v47, %v2133_v58  ;;  %v2897_v2 = vrot.slane %v8758_v43, 3  ;;  %v2940_v9 = vld [vmem:[#allocation2 + $0x240] sm:$0xf]  ;;  %v2965_v24 = vrot.slane %v8564_v16, 2 }
 0x1ad   : >> { %2800 = vrot.lane.b32.xlu1 %v2797_v42, %s7203_s13  ;;  %2869 = vrot.lane.b32.xlu0 %v2866_v54, %s7202_s29  ;;  %v10111_v42 = vld [vmem:[#allocation13_spill] sm:$0xff]  ;;  %v2048_v54 = vrot.slane %v10110_v60, 4 }
 0x1ae   : >> { %v2128_v31 = vpop.permute.xlu1 %2127  ;;  %2150 = vst.msk [vmem:[#allocation3 + $0x10] sm:$0xff] %vm2063_vm14, %v2148_v18  ;;  %v2098_v39 = vpop.permute.xlu0 %2097  ;;  %v2030_v58 = vrot.slane %v10111_v42, 3 }
 0x1af   : >> { %v2102_v35 = vsel %vm2007_vm10, 0.0, %v2098_v39  ;;  %v2132_v56 = vsel %vm2041_vm12, 0.0, %v2128_v31  ;;  %v2883_v31 = vsel %vm2012_vm7, %v2880_v46, %v2882_v63  ;;  %v10113_v46 = vld [vmem:[#allocation20_spill] sm:$0xff] }
 0x1b0   : >> { %v2104_v10 = vadd.f32 %v2102_v35, %v10109_v29  ;;  %v2032_v17 = vsel %vm2029_vm8, %v2030_v58, %v2031_v53  ;;  %v2047_v35 = vrot.slane %v10111_v42, 4  ;;  %v2928_v29 = vld [vmem:[#allocation2 + $0x288] sm:$0xf]  ;;  %v2913_v58 = vsel %vm2046_vm9, %v2910_v0, %v2912_v50 }
 0x1b1   : >> { %2815 = vrot.lane.b32.xlu1 %v2812_v55, %s7204_s14  ;;  %2884 = vrot.lane.b32.xlu0 %v2881_v11, %s7203_s13  ;;  %v8833_v0 = vld [vmem:[%s9916_s3 + $0x28] sm:$0xff]  }
 0x1b2   : >> { %v2143_v51 = vpop.permute.xlu1 %2142  ;;  %v2119_v32 = vadd.f32 %v2117_v45, %v2104_v10  ;;  %v2440_v61 = vpop.permute.xlu0 %2439  ;;  %6735 = vmatprep.subr.bf16.mxu0 %v8833_v0 }
 0x1b3   : >> { %v2147_v37 = vsel %vm2058_vm13, 0.0, %v2143_v51  ;;  %v2445_v41 = vsel %vm2007_vm10, 0.0, %v2440_v61  ;;  %v2898_v51 = vsel %vm2029_vm8, %v2895_v4, %v2897_v2  ;;  %v2049_v61 = vsel %vm2046_vm9, %v2047_v35, %v2048_v54 }
 0x1b4   : >> { %v2134_v14 = vadd.f32 %v2132_v56, %v2119_v32  ;;  %v2447_v1 = vadd.f32 %v2445_v41, %v10112_v28  ;;  %v2937_v56 = vld [vmem:[#allocation2 + $0x308] sm:$0xf]  ;;  %v2951_v4 = vrot.slane %v8566_v12, 1  ;;  %v10114_v41 = vld [vmem:[#allocation17_spill] sm:$0xff]  ;;  %v2934_v28 = vmax.f32 %v2928_v29, %v2931_v34 }
 0x1b5   : >> { %2830 = vrot.lane.b32.xlu1 %v2827_v40, %s7205_s0  ;;  %2899 = vrot.lane.b32.xlu0 %v2896_v62, %s7204_s14  ;;  %v2033_v63 = vrot.slane %v10114_v41, 3 }
 0x1b6   : >> { %v2442_v44 = vpop.permute.xlu1 %2441  ;;  %v2149_v27 = vadd.f32 %v2147_v37, %v2134_v14  ;;  %v2455_v3 = vpop.permute.xlu0 %2454  ;;  %v3186_v14 = vld [vmem:[#allocation3 + $0x10] sm:$0xff] }
 0x1b7   : >> { %v2460_v5 = vsel %vm2024_vm11, 0.0, %v2455_v3  ;;  %v2446_v18 = vsel %vm2007_vm10, 0.0, %v2442_v44  ;;  %v2950_v44 = vrot.slane %v8564_v16, 1 }
 0x1b8   : >> { %2151 = vst.msk [vmem:[#allocation3 + $0x18] sm:$0xff] %vm2063_vm14, %v2149_v27  ;;  %v2462_v39 = vadd.f32 %v2460_v5, %v2447_v1  ;;  %v2448_v10 = vadd.f32 %v2446_v18, %v10113_v46  ;;  %v2943_v1 = vmax.f32 %v2937_v56, %v2940_v9  ;;  %v2966_v18 = vrot.slane %v8566_v12, 2 }
 0x1b9   : >> { %2871 = vrot.lane.b32.xlu1 %v2868_v20, %s7202_s29  ;;  %2914 = vrot.lane.b32.xlu0 %v2911_v48, %s7205_s0  ;;  %v2980_v46 = vrot.slane %v8564_v16, 3 }
 0x1ba   : >> { %v2457_v49 = vpop.permute.xlu1 %2456  ;;  %v2470_v47 = vpop.permute.xlu0 %2469  ;;  %v2967_v29 = vsel %vm2012_vm7, %v2965_v24, %v2966_v18  ;;  %v3026_v24 = vld [vmem:[#allocation2 + $0x190] sm:$0xf] }
 0x1bb   : >> { %v2475_v55 = vsel %vm2041_vm12, 0.0, %v2470_v47  ;;  %v2461_v11 = vsel %vm2024_vm11, 0.0, %v2457_v49  ;;  %v2952_v47 = vsel %vm1995_vm6, %v2950_v44, %v2951_v4 }
 0x1bc   : >> { %v2477_v40 = vadd.f32 %v2475_v55, %v2462_v39  ;;  %v2463_v27 = vadd.f32 %v2461_v11, %v2448_v10  ;;  %v2050_v39 = vrot.slane %v10114_v41, 4  ;;  %v8840_v11 = vmax.f32 %v2934_v28, %v2943_v1 }
 0x1bd   : >> { %2886 = vrot.lane.b32.xlu1 %v2883_v31, %s7203_s13  ;;  %2035 = vrot.lane.b32.xlu0 %v2032_v17, %s7204_s14  ;;  %v2034_v17 = vsel %vm2029_vm8, %v2031_v53, %v2033_v63  ;;  %v2981_v10 = vrot.slane %v8566_v12, 3  ;;  %v7069_v53 = vld [vmem:[%s9916_s3] sm:$0xff]  }
 0x1be   : >> { %v2472_v45 = vpop.permute.xlu1 %2471  ;;  %v2485_v32 = vpop.permute.xlu0 %2484  ;;  %v2051_v34 = vsel %vm2046_vm9, %v2048_v54, %v2050_v39  ;;  %v2953_v56 = vrot.slane %v8840_v11, 1  ;;  %6713 = vmatprep.subr.bf16.mxu1 %v7069_v53  ;;  %v2968_v1 = vrot.slane %v8840_v11, 2  ;;  %v3052_v39 = vrot.slane %v8672_v13, 2 }
 0x1bf   : >> { %v2476_v62 = vsel %vm2041_vm12, 0.0, %v2472_v45  ;;  %v2490_v43 = vsel %vm2058_vm13, 0.0, %v2485_v32  ;;  %v3187_v37 = vld [vmem:[#allocation3 + $0x18] sm:$0xff]  ;;  %v10115_v45 = vld [vmem:[#allocation23_spill] sm:$0xff]  ;;  %6714 = vmatpush3.bf16.msra.mxu1 %v7069_v53 }
 0x1c0   : >> { %v2492_v3 = vadd.f32 %v2490_v43, %v2477_v40  ;;  %v8815_v20 = vpack.c.bf16 %v3187_v37, %v3186_v14  ;;  %v2478_v48 = vadd.f32 %v2476_v62, %v2463_v27  ;;  %v2982_v43 = vsel %vm2029_vm8, %v2980_v46, %v2981_v10 }
 0x1c1   : >> { %2901 = vrot.lane.b32.xlu1 %v2898_v51, %s7204_s14  ;;  %2052 = vrot.lane.b32.xlu0 %v2049_v61, %s7205_s0  ;;  %v2995_v14 = vrot.slane %v8564_v16, 4  ;;  %v2996_v37 = vrot.slane %v8566_v12, 4  ;;  %v3036_v27 = vrot.slane %v8670_v22, 1  ;;  %v2954_v28 = vsel %vm1995_vm6, %v2951_v4, %v2953_v56 }
 0x1c2   : >> { %v2487_v5 = vpop.permute.xlu1 %2486  ;;  %2494 = vst.msk [vmem:[#allocation3 + $0x50] sm:$0xff] %vm2063_vm14, %v2492_v3  ;;  %6691 = vmatprep.mubr.msk.bf16.mxu0 %vm2063_vm14, %v8815_v20  ;;  %v2197_v49 = vpop.permute.xlu0 %2196  ;;  %v3037_v3 = vrot.slane %v8672_v13, 1 }
 0x1c3   : >> { %v2491_v2 = vsel %vm2058_vm13, 0.0, %v2487_v5  ;;  %v2202_v40 = vsel %vm2024_vm11, 0.0, %v2197_v49  ;;  %v3014_v5 = vld [vmem:[#allocation2 + $0x1b8] sm:$0xf] }
 0x1c4   : >> { %v2493_v31 = vadd.f32 %v2491_v2, %v2478_v48  ;;  %v2997_v2 = vsel %vm2046_vm9, %v2995_v14, %v2996_v37  ;;  %v3038_v4 = vsel %vm1995_vm6, %v3036_v27, %v3037_v3  ;;  %v10117_v14 = vld [vmem:[#allocation24_spill] sm:$0xff] }
 0x1c5   : >> { %2916 = vrot.lane.b32.xlu1 %v2913_v58, %s7205_s0  ;;  %2955 = vrot.lane.b32.xlu0 %v2952_v47, %s7202_s29  ;;  %v3023_v58 = vld [vmem:[#allocation2 + $0x180] sm:$0xf]  ;;  %v3017_v47 = vld [vmem:[#allocation2 + $0x48] sm:$0xf] }
 0x1c6   : >> { %2495 = vst.msk [vmem:[#allocation3 + $0x58] sm:$0xff] %vm2063_vm14, %v2493_v31  ;;  %v2182_v55 = vpop.permute.xlu1 %2181  ;;  %v2212_v35 = vpop.permute.xlu0 %2211  ;;  %v2983_v31 = vrot.slane %v8840_v11, 3 }
 0x1c7   : >> { %v2187_v50 = vsel %vm2007_vm10, 0.0, %v2182_v55  ;;  %v2217_v62 = vsel %vm2041_vm12, 0.0, %v2212_v35  ;;  %v10116_v35 = vld [vmem:[#allocation22_spill] sm:$0xff] }
 0x1c8   : >> { %v2189_v51 = vadd.f32 %v2187_v50, %v10115_v45  ;;  %v3020_v45 = vmax.f32 %v3014_v5, %v3017_v47 }
 0x1c9   : >> { %2037 = vrot.lane.b32.xlu1 %v2034_v17, %s7204_s14  ;;  %2970 = vrot.lane.b32.xlu0 %v2967_v29, %s7203_s13  ;;  %v3051_v17 = vrot.slane %v8670_v22, 2 }
 0x1ca   : >> { %v2184_v32 = vpop.permute.xlu1 %2183  ;;  %v2204_v61 = vadd.f32 %v2202_v40, %v2189_v51  ;;  %v2227_v9 = vpop.permute.xlu0 %2226  ;;  %v3029_v51 = vmax.f32 %v3023_v58, %v3026_v24  ;;  %v2969_v40 = vsel %vm2012_vm7, %v2966_v18, %v2968_v1  ;;  %v2998_v18 = vrot.slane %v8840_v11, 4 }
 0x1cb   : >> { %v2232_v54 = vsel %vm2058_vm13, 0.0, %v2227_v9  ;;  %v2188_v49 = vsel %vm2007_vm10, 0.0, %v2184_v32  ;;  %v3053_v9 = vsel %vm2012_vm7, %v3051_v17, %v3052_v39  ;;  %v3112_v17 = vld [vmem:[#allocation2 + $0x2a8] sm:$0xf] }
 0x1cc   : >> { %v2219_v44 = vadd.f32 %v2217_v62, %v2204_v61  ;;  %v2190_v50 = vadd.f32 %v2188_v49, %v10116_v35  ;;  %v8900_v27 = vmax.f32 %v3020_v45, %v3029_v51  ;;  %v2999_v49 = vsel %vm2046_vm9, %v2996_v37, %v2998_v18  ;;  %v3100_v37 = vld [vmem:[#allocation2 + $0xd0] sm:$0xf] }
 0x1cd   : >> { %2054 = vrot.lane.b32.xlu1 %v2051_v34, %s7205_s0  ;;  %2985 = vrot.lane.b32.xlu0 %v2982_v43, %s7204_s14  ;;  %v2984_v34 = vsel %vm2029_vm8, %v2981_v10, %v2983_v31  ;;  %v3066_v10 = vrot.slane %v8670_v22, 3  ;;  %v3081_v31 = vrot.slane %v8670_v22, 4  ;;  %v3103_v45 = vld [vmem:[#allocation2 + $0x2b0] sm:$0xf] }
 0x1ce   : >> { %v2199_v41 = vpop.permute.xlu1 %2198  ;;  %v2234_v63 = vadd.f32 %v2232_v54, %v2219_v44  ;;  %v2268_v48 = vpop.permute.xlu0 %2267  ;;  %v3039_v1 = vrot.slane %v8900_v27, 1  ;;  %v3109_v51 = vld [vmem:[#allocation2 + $0x1b0] sm:$0xf] }
 0x1cf   : >> { %v2203_v55 = vsel %vm2024_vm11, 0.0, %v2199_v41  ;;  %v2273_v32 = vsel %vm2007_vm10, 0.0, %v2268_v48  ;;  %v3067_v48 = vrot.slane %v8672_v13, 3 }
 0x1d0   : >> { %2236 = vst.msk [vmem:[#allocation3 + $0x20] sm:$0xff] %vm2063_vm14, %v2234_v63  ;;  %v2205_v61 = vadd.f32 %v2203_v55, %v2190_v50  ;;  %v2275_v44 = vadd.f32 %v2273_v32, %v10117_v14  ;;  %v3082_v55 = vrot.slane %v8672_v13, 4  ;;  %v3054_v32 = vrot.slane %v8900_v27, 2 }
 0x1d1   : >> { %2957 = vrot.lane.b32.xlu1 %v2954_v28, %s7202_s29  ;;  %3000 = vrot.lane.b32.xlu0 %v2997_v2, %s7205_s0  ;;  %v3068_v24 = vsel %vm2029_vm8, %v3066_v10, %v3067_v48  ;;  %v3137_v14 = vrot.slane %v8717_v21, 2  ;;  %v7068_v10 = vld [vmem:[%s9916_s3 + $0x20] sm:$0xff]  }
 0x1d2   : >> { %v2214_v29 = vpop.permute.xlu1 %2213 }
 0x1d3   : >> { %v2283_v46 = vpop.permute.xlu0 %2282  ;;  %v2218_v53 = vsel %vm2041_vm12, 0.0, %v2214_v29  ;;  %v3122_v29 = vrot.slane %v8717_v21, 1 }
 0x1d4   : >> { %v2288_v56 = vsel %vm2024_vm11, 0.0, %v2283_v46  ;;  %v2220_v62 = vadd.f32 %v2218_v53, %v2205_v61  ;;  %v3123_v46 = vrot.slane %v8719_v25, 1  ;;  %v3083_v61 = vsel %vm2046_vm9, %v3081_v31, %v3082_v55 }
 0x1d5   : >> { %2972 = vrot.lane.b32.xlu1 %v2969_v40, %s7203_s13  ;;  %3041 = vrot.lane.b32.xlu0 %v3038_v4, %s7202_s29  ;;  %v2290_v58 = vadd.f32 %v2288_v56, %v2275_v44  ;;  %v3040_v40 = vsel %vm1995_vm6, %v3037_v3, %v3039_v1 }
 0x1d6   : >> { %v2229_v43 = vpop.permute.xlu1 %2228 }
 0x1d7   : >> { %v2298_v54 = vpop.permute.xlu0 %2297  ;;  %v2233_v41 = vsel %vm2058_vm13, 0.0, %v2229_v43  ;;  %v3188_v56 = vld [vmem:[#allocation3 + $0x20] sm:$0xff]  ;;  %v3115_v43 = vmax.f32 %v3109_v51, %v3112_v17  ;;  %v3153_v17 = vrot.slane %v8719_v25, 3 }
 0x1d8   : >> { %v2303_v63 = vsel %vm2041_vm12, 0.0, %v2298_v54  ;;  %v2235_v5 = vadd.f32 %v2233_v41, %v2220_v62  ;;  %v3106_v62 = vmax.f32 %v3100_v37, %v3103_v45  ;;  %v3124_v41 = vsel %vm1995_vm6, %v3122_v29, %v3123_v46 }
 0x1d9   : >> { %2987 = vrot.lane.b32.xlu1 %v2984_v34, %s7204_s14  ;;  %3056 = vrot.lane.b32.xlu0 %v3053_v9, %s7203_s13  ;;  %v2305_v28 = vadd.f32 %v2303_v63, %v2290_v58  ;;  %v3138_v63 = vrot.slane %v8719_v25, 2  ;;  %v3084_v29 = vrot.slane %v8900_v27, 4 }
 0x1da   : >> { %2237 = vst.msk [vmem:[#allocation3 + $0x28] sm:$0xff] %vm2063_vm14, %v2235_v5  ;;  %v2270_v11 = vpop.permute.xlu1 %2269  ;;  %v8955_v1 = vmax.f32 %v3106_v62, %v3115_v43  ;;  %v8983_v43 = vld [vmem:[%s9916_s3 + $0x48] sm:$0xff]  }
 0x1db   : >> { %v2313_v2 = vpop.permute.xlu0 %2312  ;;  %v2274_v53 = vsel %vm2007_vm10, 0.0, %v2270_v11  ;;  %v3069_v11 = vrot.slane %v8900_v27, 3  ;;  %v3139_v37 = vsel %vm2012_vm7, %v3137_v14, %v3138_v63  ;;  %v3167_v27 = vrot.slane %v8717_v21, 4 }
 0x1dc   : >> { %v2318_v47 = vsel %vm2058_vm13, 0.0, %v2313_v2  ;;  %v2276_v3 = vadd.f32 %v2274_v53, %v8085_v23  ;;  %v3055_v23 = vsel %vm2012_vm7, %v3052_v39, %v3054_v32  ;;  %v3152_v2 = vrot.slane %v8717_v21, 3 }
 0x1dd   : >> { %3002 = vrot.lane.b32.xlu1 %v2999_v49, %s7205_s0  ;;  %v2320_v4 = vadd.f32 %v2318_v47, %v2305_v28  ;;  %3071 = vrot.lane.b32.xlu0 %v3068_v24, %s7204_s14  ;;  %v10118_v24 = vld [vmem:[#allocation28_spill] sm:$0xff]  ;;  %v3125_v53 = vrot.slane %v8955_v1, 1 }
 0x1de   : >> { %v2285_v35 = vpop.permute.xlu1 %2284 }
 0x1df   : >> { %2322 = vst.msk [vmem:[#allocation3 + $0x30] sm:$0xff] %vm2063_vm14, %v2320_v4  ;;  %v2526_v50 = vpop.permute.xlu0 %2525  ;;  %v2289_v34 = vsel %vm2024_vm11, 0.0, %v2285_v35  ;;  %v3126_v14 = vsel %vm1995_vm6, %v3123_v46, %v3125_v53  ;;  %v3193_v46 = vld [vmem:[#allocation3 + $0x48] sm:$0xff] }
 0x1e0   : >> { %v2531_v58 = vsel %vm2007_vm10, 0.0, %v2526_v50  ;;  %v2291_v49 = vadd.f32 %v2289_v34, %v2276_v3  ;;  %v3070_v50 = vsel %vm2029_vm8, %v3067_v48, %v3069_v11  ;;  %v3154_v48 = vsel %vm2029_vm8, %v3152_v2, %v3153_v17 }
 0x1e1   : >> { %3043 = vrot.lane.b32.xlu1 %v3040_v40, %s7202_s29  ;;  %3086 = vrot.lane.b32.xlu0 %v3083_v61, %s7205_s0  ;;  %v3189_v9 = vld [vmem:[#allocation3 + $0x28] sm:$0xff]  ;;  %v2533_v31 = vadd.f32 %v2531_v58, %v10118_v24  ;;  %v3168_v34 = vrot.slane %v8719_v25, 4  ;;  %v3140_v3 = vrot.slane %v8955_v1, 2  ;;  %v3192_v24 = vld [vmem:[#allocation3 + $0x40] sm:$0xff] }
 0x1e2   : >> { %v2300_v44 = vpop.permute.xlu1 %2299  ;;  %v8935_v18 = vpack.c.bf16 %v3189_v9, %v3188_v56  ;;  %v3085_v56 = vsel %vm2046_vm9, %v3082_v55, %v3084_v29  ;;  %v8993_v55 = vld [vmem:[%s9916_s3 + $0x38] sm:$0xff]  }
 0x1e3   : >> { %v2541_v54 = vpop.permute.xlu0 %2540  ;;  %v2304_v5 = vsel %vm2041_vm12, 0.0, %v2300_v44  ;;  %6759 = vmatprep.subr.bf16.mxu1 %v8993_v55 }
 0x1e4   : >> { %6692 = vmatmul.mubr.msk.bf16.vlgmr.msra.gmra.mxu0 %vm2063_vm14, %v8935_v18  ;;  %v2546_v28 = vsel %vm2024_vm11, 0.0, %v2541_v54  ;;  %v2306_v39 = vadd.f32 %v2304_v5, %v2291_v49  ;;  %v3195_v49 = vld [vmem:[#allocation3 + $0x58] sm:$0xff] }
 0x1e5   : >> { %3058 = vrot.lane.b32.xlu1 %v3055_v23, %s7203_s13  ;;  %3127 = vrot.lane.b32.xlu0 %v3124_v41, %s7202_s29  ;;  %v2548_v51 = vadd.f32 %v2546_v28, %v2533_v31  ;;  %v3169_v41 = vsel %vm2046_vm9, %v3167_v27, %v3168_v34  ;;  %v3141_v23 = vsel %vm2012_vm7, %v3138_v63, %v3140_v3  ;;  %v3155_v28 = vrot.slane %v8955_v1, 3 }
 0x1e6   : >> { %6736 = vmatpush3.bf16.msra.mxu0 %v8833_v0  ;;  %v2315_v47 = vpop.permute.xlu1 %2314  ;;  %v3190_v58 = vld [vmem:[#allocation3 + $0x30] sm:$0xff] }
 0x1e7   : >> { %v2556_v4 = vpop.permute.xlu0 %2555  ;;  %6737 = vmatprep.subr.bf16.mxu0 %v7068_v10  ;;  %v2319_v35 = vsel %vm2058_vm13, 0.0, %v2315_v47 }
 0x1e8   : >> { %v2561_v0 = vsel %vm2041_vm12, 0.0, %v2556_v4  ;;  %v2321_v45 = vadd.f32 %v2319_v35, %v2306_v39  ;;  %v3194_v35 = vld [vmem:[#allocation3 + $0x50] sm:$0xff] }
 0x1e9   : >> { %3073 = vrot.lane.b32.xlu1 %v3070_v50, %s7204_s14  ;;  %3142 = vrot.lane.b32.xlu0 %v3139_v37, %s7203_s13  ;;  %v2563_v32 = vadd.f32 %v2561_v0, %v2548_v51  ;;  %v9009_v37 = vpack.c.bf16 %v3193_v46, %v3192_v24  ;;  %v9015_v29 = vpack.c.bf16 %v3195_v49, %v3194_v35 }
 0x1ea   : >> { %6738 = vmatpush3.bf16.msra.mxu0 %v7068_v10  ;;  %2323 = vst.msk [vmem:[#allocation3 + $0x38] sm:$0xff] %vm2063_vm14, %v2321_v45  ;;  %v3170_v45 = vrot.slane %v8955_v1, 4 }
 0x1eb   : >> { %v2528_v40 = vpop.permute.xlu1 %2527  ;;  %v2571_v61 = vpop.permute.xlu0 %2570  ;;  %6783 = vmatprep.subr.bf16.mxu0 %v8983_v43 }
 0x1ec   : >> { %v2576_v9 = vsel %vm2058_vm13, 0.0, %v2571_v61  ;;  %v2532_v10 = vsel %vm2007_vm10, 0.0, %v2528_v40 }
 0x1ed   : >> { %3088 = vrot.lane.b32.xlu1 %v3085_v56, %s7205_s0  ;;  %v2578_v62 = vadd.f32 %v2576_v9, %v2563_v32  ;;  %3157 = vrot.lane.b32.xlu0 %v3154_v48, %s7204_s14  ;;  %v2534_v2 = vadd.f32 %v2532_v10, %v8240_v57  ;;  %v3156_v57 = vsel %vm2029_vm8, %v3153_v17, %v3155_v28 }
 0x1ee   : >> { %v3171_v56 = vsel %vm2046_vm9, %v3168_v34, %v3170_v45 }
 0x1ef   : >> { %v2543_v44 = vpop.permute.xlu1 %2542  ;;  %2580 = vst.msk [vmem:[#allocation3 + $0x60] sm:$0xff] %vm2063_vm14, %v2578_v62  ;;  %v2612_v54 = vpop.permute.xlu0 %2611 }
 0x1f0   : >> { %v2547_v5 = vsel %vm2024_vm11, 0.0, %v2543_v44  ;;  %v2617_v63 = vsel %vm2007_vm10, 0.0, %v2612_v54 }
 0x1f1   : >> { %3129 = vrot.lane.b32.xlu1 %v3126_v14, %s7202_s29  ;;  %v3191_v11 = vld [vmem:[#allocation3 + $0x38] sm:$0xff]  ;;  %3172 = vrot.lane.b32.xlu0 %v3169_v41, %s7205_s0  ;;  %v2549_v50 = vadd.f32 %v2547_v5, %v2534_v2  ;;  %v2619_v40 = vadd.f32 %v2617_v63, %v8383_v15  ;;  %s7211_s29 = smov 48  }
 0x1f2   : >> { %v9006_v47 = vpack.c.bf16 %v3191_v11, %v3190_v58 }
 0x1f3   : >> { %v2558_v39 = vpop.permute.xlu1 %2557  ;;  %v2627_v31 = vpop.permute.xlu0 %2626 }
 0x1f4   : >> { %v2562_v4 = vsel %vm2041_vm12, 0.0, %v2558_v39  ;;  %6695 = vmatprep.mubr.msk.bf16.mxu0 %vm2063_vm14, %v9006_v47  ;;  %v2632_v0 = vsel %vm2024_vm11, 0.0, %v2627_v31 }
 0x1f5   : >> { %3144 = vrot.lane.b32.xlu1 %v3141_v23, %s7203_s13  ;;  %6696 = vmatmul.mubr.msk.bf16.gmra.mxu0 %vm2063_vm14, %v9009_v37  ;;  %v2564_v51 = vadd.f32 %v2562_v4, %v2549_v50  ;;  %v2634_v17 = vadd.f32 %v2632_v0, %v2619_v40  ;;  %s4825_s13 = smul.u32 5, %s7199_s24  ;;  %s414_s24 = sadd.s32 1, %s7199_s24  }
 0x1f6   : >> { %6699 = vmatprep.mubr.msk.bf16.mxu0 %vm2063_vm14, %v9015_v29  ;;  %v3196_v10 = vld [vmem:[#allocation3 + $0x60] sm:$0xff]  ;;  %p411_p11 = scmp.ge.s32.totalorder %s414_s24, 8  }
 0x1f7   : >> { %v2573_v53 = vpop.permute.xlu1 %2572  ;;  %v2642_v32 = vpop.permute.xlu0 %2641  ;;  %vm5256_vm4 = vcmask (%p411_p11), 1041409   ;;  %vm5259_vm5 = vcmask (%p411_p11), 1042434   ;;  %vm5262_vm6 = vcmask (%p411_p11), 1043459   ;;  %vm5265_vm7 = vcmask (%p411_p11), 1044484   ;;  %s6304_s24 = sshll.u32 (%p411_p11), %s7296_s21, 7  ;;  %s10146_s16 = scalar_lea.vmem (%p411_p11), [#allocation6], %s7327_s12 }
 0x1f8   : >> { %v2577_v61 = vsel %vm2058_vm13, 0.0, %v2573_v53  ;;  %v2647_v48 = vsel %vm2041_vm12, 0.0, %v2642_v32  ;;  %vm5268_vm8 = vcmask (%p411_p11), 1045509   ;;  %vm5271_vm9 = vcmask (%p411_p11), 1046534   ;;  %s9868_s15 = scalar_lea.hbm (%p411_p11), %s9924_s11, %s6304_s24 }
 0x1f9   : >> { %v2579_v27 = vadd.f32 %v2577_v61, %v2564_v51  ;;  %3159 = vrot.lane.b32.xlu1 %v3156_v57, %s7204_s14  ;;  %v2649_v9 = vadd.f32 %v2647_v48, %v2634_v17  ;;  %s4826_s14 = scalar_lea.vmem [#allocation5], %s4825_s13 }
 0x1fb   : >> { %2581 = vst.msk [vmem:[#allocation3 + $0x68] sm:$0xff] %vm2063_vm14, %v2579_v27  ;;  %v2614_v1 = vpop.permute.xlu1 %2613  ;;  %v2657_v62 = vpop.permute.xlu0 %2656 }
 0x1fc   : >> { %v2662_v14 = vsel %vm2058_vm13, 0.0, %v2657_v62  ;;  %v2618_v54 = vsel %vm2007_vm10, 0.0, %v2614_v1 }
 0x1fd   : >> { %3174 = vrot.lane.b32.xlu1 %v3171_v56, %s7205_s0  ;;  %v2664_v15 = vadd.f32 %v2662_v14, %v2649_v9  ;;  %v2620_v46 = vadd.f32 %v2618_v54, %v8385_v8 }
 0x1ff   : >> { %v2629_v3 = vpop.permute.xlu1 %2628  ;;  %2666 = vst.msk [vmem:[#allocation3 + $0x70] sm:$0xff] %vm2063_vm14, %v2664_v15  ;;  %v2698_v44 = vpop.permute.xlu0 %2697 }
 0x200   : >> { %v2633_v41 = vsel %vm2024_vm11, 0.0, %v2629_v3  ;;  %v2703_v49 = vsel %vm2007_vm10, 0.0, %v2698_v44 }
 0x201   : >> { %v2635_v28 = vadd.f32 %v2633_v41, %v2620_v46  ;;  %v2705_v31 = vadd.f32 %v2703_v49, %v8484_v38 }
 0x202   : >> { %v3197_v34 = vld [vmem:[#allocation3 + $0x68] sm:$0xff] }
 0x203   : >> { %v2644_v5 = vpop.permute.xlu1 %2643  ;;  %v9036_v23 = vpack.c.bf16 %v3197_v34, %v3196_v10  ;;  %v2713_v58 = vpop.permute.xlu0 %2712 }
 0x204   : >> { %v2648_v11 = vsel %vm2041_vm12, 0.0, %v2644_v5  ;;  %v2718_v2 = vsel %vm2024_vm11, 0.0, %v2713_v58 }
 0x205   : >> { %6700 = vmatmul.mubr.msk.bf16.gmra.mxu0 %vm2063_vm14, %v9036_v23  ;;  %v2650_v39 = vadd.f32 %v2648_v11, %v2635_v28  ;;  %v2720_v50 = vadd.f32 %v2718_v2, %v2705_v31 }
 0x206   : >> { %v3198_v48 = vld [vmem:[#allocation3 + $0x70] sm:$0xff] }
 0x207   : >> { %v2659_v24 = vpop.permute.xlu1 %2658  ;;  %v2728_v4 = vpop.permute.xlu0 %2727 }
 0x208   : >> { %v2663_v8 = vsel %vm2058_vm13, 0.0, %v2659_v24  ;;  %v2733_v35 = vsel %vm2041_vm12, 0.0, %v2728_v4 }
 0x209   : >> { %v2665_v63 = vadd.f32 %v2663_v8, %v2650_v39  ;;  %v2735_v0 = vadd.f32 %v2733_v35, %v2720_v50 }
 0x20b   : >> { %2667 = vst.msk [vmem:[#allocation3 + $0x78] sm:$0xff] %vm2063_vm14, %v2665_v63  ;;  %v2700_v57 = vpop.permute.xlu1 %2699  ;;  %v2743_v45 = vpop.permute.xlu0 %2742 }
 0x20c   : >> { %v2748_v51 = vsel %vm2058_vm13, 0.0, %v2743_v45  ;;  %v2704_v38 = vsel %vm2007_vm10, 0.0, %v2700_v57 }
 0x20d   : >> { %v2750_v53 = vadd.f32 %v2748_v51, %v2735_v0  ;;  %v2706_v17 = vadd.f32 %v2704_v38, %v8486_v52 }
 0x20f   : >> { %v2715_v40 = vpop.permute.xlu1 %2714  ;;  %2752 = vst.msk [vmem:[#allocation3 + $0x80] sm:$0xff] %vm2063_vm14, %v2750_v53  ;;  %v2784_v32 = vpop.permute.xlu0 %2783 }
 0x210   : >> { %v2719_v61 = vsel %vm2024_vm11, 0.0, %v2715_v40  ;;  %v2789_v14 = vsel %vm2007_vm10, 0.0, %v2784_v32 }
 0x211   : >> { %v2721_v15 = vadd.f32 %v2719_v61, %v2706_v17  ;;  %v2791_v41 = vadd.f32 %v2789_v14, %v8627_v30  ;;  %v2008_v14 = vsel %vm2007_vm10, 0.0, %v8502_v33 }
 0x212   : >> { %v3199_v27 = vld [vmem:[#allocation3 + $0x78] sm:$0xff] }
 0x213   : >> { %v2730_v56 = vpop.permute.xlu1 %2729  ;;  %v9052_v1 = vpack.c.bf16 %v3199_v27, %v3198_v48  ;;  %v2799_v9 = vpop.permute.xlu0 %2798 }
 0x214   : >> { %v2734_v62 = vsel %vm2041_vm12, 0.0, %v2730_v56  ;;  %v2804_v3 = vsel %vm2024_vm11, 0.0, %v2799_v9 }
 0x215   : >> { %6703 = vmatprep.mubr.msk.bf16.mxu0 %vm2063_vm14, %v9052_v1  ;;  %v2736_v44 = vadd.f32 %v2734_v62, %v2721_v15  ;;  %v2806_v5 = vadd.f32 %v2804_v3, %v2791_v41 }
 0x216   : >> { %v3200_v4 = vld [vmem:[#allocation3 + $0x80] sm:$0xff] }
 0x217   : >> { %v2745_v54 = vpop.permute.xlu1 %2744  ;;  %v2814_v10 = vpop.permute.xlu0 %2813 }
 0x218   : >> { %v2749_v52 = vsel %vm2058_vm13, 0.0, %v2745_v54  ;;  %v2819_v34 = vsel %vm2041_vm12, 0.0, %v2814_v10 }
 0x219   : >> { %v2751_v46 = vadd.f32 %v2749_v52, %v2736_v44  ;;  %v2821_v11 = vadd.f32 %v2819_v34, %v2806_v5  ;;  %v2010_v44 = vadd.f32 %v2008_v14, %v10111_v42 }
 0x21b   : >> { %2753 = vst.msk [vmem:[#allocation3 + $0x88] sm:$0xff] %vm2063_vm14, %v2751_v46  ;;  %v2786_v58 = vpop.permute.xlu1 %2785  ;;  %v2829_v49 = vpop.permute.xlu0 %2828 }
 0x21c   : >> { %v2834_v28 = vsel %vm2058_vm13, 0.0, %v2829_v49  ;;  %v2790_v30 = vsel %vm2007_vm10, 0.0, %v2786_v58 }
 0x21d   : >> { %v2836_v2 = vadd.f32 %v2834_v28, %v2821_v11  ;;  %v2792_v35 = vadd.f32 %v2790_v30, %v8630_v59 }
 0x21f   : >> { %v2801_v39 = vpop.permute.xlu1 %2800  ;;  %2838 = vst.msk [vmem:[#allocation3 + $0x90] sm:$0xff] %vm2063_vm14, %v2836_v2  ;;  %v2870_v24 = vpop.permute.xlu0 %2869 }
 0x220   : >> { %v2805_v31 = vsel %vm2024_vm11, 0.0, %v2801_v39  ;;  %v2875_v45 = vsel %vm2007_vm10, 0.0, %v2870_v24 }
 0x221   : >> { %v2807_v51 = vadd.f32 %v2805_v31, %v2792_v35  ;;  %v2877_v38 = vadd.f32 %v2875_v45, %v8429_v26  ;;  %v2025_v26 = vsel %vm2024_vm11, 0.0, %v8534_v6 }
 0x222   : >> { %v3201_v8 = vld [vmem:[#allocation3 + $0x88] sm:$0xff]  ;;  %v2027_v34 = vadd.f32 %v2025_v26, %v2010_v44 }
 0x223   : >> { %v2816_v63 = vpop.permute.xlu1 %2815  ;;  %v9068_v50 = vpack.c.bf16 %v3201_v8, %v3200_v4  ;;  %v2885_v57 = vpop.permute.xlu0 %2884 }
 0x224   : >> { %v2820_v0 = vsel %vm2041_vm12, 0.0, %v2816_v63  ;;  %v2890_v53 = vsel %vm2024_vm11, 0.0, %v2885_v57  ;;  %v2026_v63 = vsel %vm2024_vm11, 0.0, %v8641_v36 }
 0x225   : >> { %6704 = vmatmul.mubr.msk.bf16.gmra.mxu0 %vm2063_vm14, %v9068_v50  ;;  %v2822_v40 = vadd.f32 %v2820_v0, %v2807_v51  ;;  %v2892_v17 = vadd.f32 %v2890_v53, %v2877_v38 }
 0x226   : >> { %v3202_v33 = vld [vmem:[#allocation3 + $0x90] sm:$0xff] }
 0x227   : >> { %v2831_v32 = vpop.permute.xlu1 %2830  ;;  %v2900_v61 = vpop.permute.xlu0 %2899 }
 0x228   : >> { %v2835_v59 = vsel %vm2058_vm13, 0.0, %v2831_v32  ;;  %v2905_v48 = vsel %vm2041_vm12, 0.0, %v2900_v61 }
 0x229   : >> { %v2837_v27 = vadd.f32 %v2835_v59, %v2822_v40  ;;  %v2907_v9 = vadd.f32 %v2905_v48, %v2892_v17 }
 0x22b   : >> { %2839 = vst.msk [vmem:[#allocation3 + $0x98] sm:$0xff] %vm2063_vm14, %v2837_v27  ;;  %v2872_v56 = vpop.permute.xlu1 %2871  ;;  %v2915_v62 = vpop.permute.xlu0 %2914 }
 0x22c   : >> { %v2920_v15 = vsel %vm2058_vm13, 0.0, %v2915_v62  ;;  %v2876_v10 = vsel %vm2007_vm10, 0.0, %v2872_v56 }
 0x22d   : >> { %v2922_v3 = vadd.f32 %v2920_v15, %v2907_v9  ;;  %v2878_v58 = vadd.f32 %v2876_v10, %v8729_v7  ;;  %v2009_v7 = vsel %vm2007_vm10, 0.0, %v8611_v19 }
 0x22e   : >> { %v2011_v57 = vadd.f32 %v2009_v7, %v10110_v60 }
 0x22f   : >> { %v2887_v54 = vpop.permute.xlu1 %2886  ;;  %2924 = vst.msk [vmem:[#allocation3 + $0xa0] sm:$0xff] %vm2063_vm14, %v2922_v3  ;;  %v2036_v41 = vpop.permute.xlu0 %2035 }
 0x230   : >> { %v2042_v52 = vsel %vm2041_vm12, 0.0, %v2036_v41  ;;  %v2891_v46 = vsel %vm2024_vm11, 0.0, %v2887_v54  ;;  %v2028_v40 = vadd.f32 %v2026_v63, %v2011_v57 }
 0x231   : >> { %v2044_v6 = vadd.f32 %v2042_v52, %v2027_v34  ;;  %v2893_v39 = vadd.f32 %v2891_v46, %v2878_v58 }
 0x232   : >> { %v3203_v5 = vld [vmem:[#allocation3 + $0x98] sm:$0xff] }
 0x233   : >> { %v2902_v11 = vpop.permute.xlu1 %2901  ;;  %v9090_v49 = vpack.c.bf16 %v3203_v5, %v3202_v33  ;;  %v2053_v42 = vpop.permute.xlu0 %2052 }
 0x234   : >> { %v2906_v28 = vsel %vm2041_vm12, 0.0, %v2902_v11  ;;  %v2059_v2 = vsel %vm2058_vm13, 0.0, %v2053_v42 }
 0x235   : >> { %6707 = vmatprep.mubr.msk.bf16.mxu0 %vm2063_vm14, %v9090_v49  ;;  %v2061_v24 = vadd.f32 %v2059_v2, %v2044_v6  ;;  %v2908_v30 = vadd.f32 %v2906_v28, %v2893_v39  ;;  %v7072_v6 = vld [vmem:[%s9916_s3 + $0x40] sm:$0xff]  }
 0x236   : >> { %v3218_v17 = vld [vmem:[#allocation3 + $0xa0] sm:$0xff] }
 0x237   : >> { %v2917_v31 = vpop.permute.xlu1 %2916  ;;  %2064 = vst.msk [vmem:[#allocation3] sm:$0xff] %vm2063_vm14, %v2061_v24  ;;  %v2956_v4 = vpop.permute.xlu0 %2955 }
 0x238   : >> { %v2921_v8 = vsel %vm2058_vm13, 0.0, %v2917_v31  ;;  %v2961_v53 = vsel %vm2007_vm10, 0.0, %v2956_v4 }
 0x239   : >> { %v2923_v35 = vadd.f32 %v2921_v8, %v2908_v30  ;;  %v2963_v61 = vadd.f32 %v2961_v53, %v8564_v16 }
 0x23b   : >> { %2925 = vst.msk [vmem:[#allocation3 + $0xa8] sm:$0xff] %vm2063_vm14, %v2923_v35  ;;  %v2038_v0 = vpop.permute.xlu1 %2037  ;;  %v2971_v45 = vpop.permute.xlu0 %2970 }
 0x23c   : >> { %v2043_v51 = vsel %vm2041_vm12, 0.0, %v2038_v0  ;;  %v2976_v32 = vsel %vm2024_vm11, 0.0, %v2971_v45 }
 0x23d   : >> { %v2045_v19 = vadd.f32 %v2043_v51, %v2028_v40  ;;  %v2978_v27 = vadd.f32 %v2976_v32, %v2963_v61 }
 0x23e   : >> { %v3184_v10 = vld [vmem:[#allocation3] sm:$0xff] }
 0x23f   : >> { %v2055_v38 = vpop.permute.xlu1 %2054  ;;  %v2986_v59 = vpop.permute.xlu0 %2985 }
 0x240   : >> { %v2060_v36 = vsel %vm2058_vm13, 0.0, %v2055_v38  ;;  %v2991_v60 = vsel %vm2041_vm12, 0.0, %v2986_v59 }
 0x241   : >> { %v2062_v48 = vadd.f32 %v2060_v36, %v2045_v19  ;;  %v2993_v14 = vadd.f32 %v2991_v60, %v2978_v27 }
 0x242   : >> { %v3219_v56 = vld [vmem:[#allocation3 + $0xa8] sm:$0xff] }
 0x243   : >> { %2065 = vst.msk [vmem:[#allocation3 + $0x8] sm:$0xff] %vm2063_vm14, %v2062_v48  ;;  %v2958_v9 = vpop.permute.xlu1 %2957  ;;  %v9111_v62 = vpack.c.bf16 %v3219_v56, %v3218_v17  ;;  %v3001_v15 = vpop.permute.xlu0 %3000 }
 0x244   : >> { %v3006_v3 = vsel %vm2058_vm13, 0.0, %v3001_v15  ;;  %v2962_v54 = vsel %vm2007_vm10, 0.0, %v2958_v9 }
 0x245   : >> { %6708 = vmatmul.mubr.msk.bf16.gmra.mxu0 %vm2063_vm14, %v9111_v62  ;;  %v3008_v16 = vadd.f32 %v3006_v3, %v2993_v14  ;;  %v2964_v34 = vadd.f32 %v2962_v54, %v8566_v12  ;;  %v7073_v12 = vld [vmem:[%s9916_s3 + $0x30] sm:$0xff]  }
 0x246   : >> { %6739 = vmatprep.mubr.msk.bf16.mxu0 %vm2063_vm14, %v8935_v18 }
 0x247   : >> { %v2973_v26 = vpop.permute.xlu1 %2972  ;;  %3010 = vst.msk [vmem:[#allocation3 + $0xb0] sm:$0xff] %vm2063_vm14, %v3008_v16  ;;  %v3042_v44 = vpop.permute.xlu0 %3041 }
 0x248   : >> { %v2977_v41 = vsel %vm2024_vm11, 0.0, %v2973_v26  ;;  %v3047_v11 = vsel %vm2007_vm10, 0.0, %v3042_v44 }
 0x249   : >> { %v2979_v42 = vadd.f32 %v2977_v41, %v2964_v34  ;;  %v3049_v24 = vadd.f32 %v3047_v11, %v8670_v22 }
 0x24a   : >> { %v3185_v52 = vld [vmem:[#allocation3 + $0x8] sm:$0xff] }
 0x24b   : >> { %v2988_v46 = vpop.permute.xlu1 %2987  ;;  %v3204_v33 = vpack.c.bf16 %v3185_v52, %v3184_v10  ;;  %v3057_v5 = vpop.permute.xlu0 %3056 }
 0x24c   : >> { %v2992_v58 = vsel %vm2041_vm12, 0.0, %v2988_v46  ;;  %v3062_v28 = vsel %vm2024_vm11, 0.0, %v3057_v5 }
 0x24d   : >> { %6715 = vmatprep.mubr.msk.bf16.mxu1 %vm2063_vm14, %v3204_v33  ;;  %6740 = vmatmul.mubr.msk.bf16.vlgmr.msra.gmra.mxu0 %vm2063_vm14, %v9006_v47  ;;  %v2994_v2 = vadd.f32 %v2992_v58, %v2979_v42  ;;  %v3064_v7 = vadd.f32 %v3062_v28, %v3049_v24 }
 0x24e   : >> { %6716 = vmatmul.mubr.msk.bf16.vlgmr.msra.gmra.mxu1 %vm2063_vm14, %v8815_v20  ;;  %6743 = vmatprep.mubr.msk.bf16.mxu0 %vm2063_vm14, %v9009_v37  ;;  %v3527_v54 = vld [vmem:[#allocation3 + $0xb0] sm:$0xff] }
 0x24f   : >> { %v3003_v39 = vpop.permute.xlu1 %3002  ;;  %6719 = vmatprep.mubr.msk.bf16.mxu1 %vm2063_vm14, %v8935_v18  ;;  %v3072_v30 = vpop.permute.xlu0 %3071  ;;  %6784 = vmatpush3.bf16.msra.mxu0 %v8983_v43 }
 0x250   : >> { %v3007_v31 = vsel %vm2058_vm13, 0.0, %v3003_v39  ;;  %v3077_v4 = vsel %vm2041_vm12, 0.0, %v3072_v30  ;;  %6760 = vmatpush3.bf16.msra.mxu1 %v8993_v55  ;;  %6785 = vmatprep.subr.bf16.mxu0 %v7072_v6 }
 0x251   : >> { %v3009_v20 = vadd.f32 %v3007_v31, %v2994_v2  ;;  %6761 = vmatprep.subr.bf16.mxu1 %v7073_v12  ;;  %v3079_v35 = vadd.f32 %v3077_v4, %v3064_v7 }
 0x253   : >> { %3011 = vst.msk [vmem:[#allocation3 + $0xb8] sm:$0xff] %vm2063_vm14, %v3009_v20  ;;  %v3044_v8 = vpop.permute.xlu1 %3043  ;;  %v3087_v18 = vpop.permute.xlu0 %3086  ;;  %6786 = vmatpush3.bf16.msra.mxu0 %v7072_v6  ;;  %v9983_v6 = vmov 0.0  }
 0x254   : >> { %v3092_v22 = vsel %vm2058_vm13, 0.0, %v3087_v18  ;;  %6762 = vmatpush3.bf16.msra.mxu1 %v7073_v12  ;;  %v3048_v63 = vsel %vm2007_vm10, 0.0, %v3044_v8  ;;  %6837 = vmatprep.subr.bf16.mxu0 %v9983_v6 }
 0x255   : >> { %6744 = vmatmul.mubr.msk.bf16.gmra.mxu0 %vm2063_vm14, %v9015_v29  ;;  %v3094_v43 = vadd.f32 %v3092_v22, %v3079_v35  ;;  %v3050_v45 = vadd.f32 %v3048_v63, %v8672_v13  ;;  %6807 = vmatprep.subr.bf16.mxu1 %v9983_v6 }
 0x256   : >> { %6720 = vmatmul.mubr.msk.bf16.gmra.mxu1 %vm2063_vm14, %v9006_v47  ;;  %6747 = vmatprep.mubr.msk.bf16.mxu0 %vm2063_vm14, %v9036_v23 }
 0x257   : >> { %v3059_v55 = vpop.permute.xlu1 %3058  ;;  %6723 = vmatprep.mubr.msk.bf16.mxu1 %vm2063_vm14, %v9009_v37  ;;  %3096 = vst.msk [vmem:[#allocation3 + $0xc0] sm:$0xff] %vm2063_vm14, %v3094_v43  ;;  %v3128_v57 = vpop.permute.xlu0 %3127 }
 0x258   : >> { %v3063_v0 = vsel %vm2024_vm11, 0.0, %v3059_v55  ;;  %v3133_v19 = vsel %vm2007_vm10, 0.0, %v3128_v57 }
 0x259   : >> { %v3065_v32 = vadd.f32 %v3063_v0, %v3050_v45  ;;  %v3135_v36 = vadd.f32 %v3133_v19, %v8717_v21 }
 0x25a   : >> { %v3528_v26 = vld [vmem:[#allocation3 + $0xb8] sm:$0xff] }
 0x25b   : >> { %v3074_v51 = vpop.permute.xlu1 %3073  ;;  %v3143_v40 = vpop.permute.xlu0 %3142  ;;  %v3538_v52 = vpack.c.bf16 %v3528_v26, %v3527_v54 }
 0x25c   : >> { %v3078_v53 = vsel %vm2041_vm12, 0.0, %v3074_v51  ;;  %v3148_v13 = vsel %vm2024_vm11, 0.0, %v3143_v40 }
 0x25d   : >> { %6748 = vmatmul.mubr.msk.bf16.gmra.mxu0 %vm2063_vm14, %v9052_v1  ;;  %v3080_v38 = vadd.f32 %v3078_v53, %v3065_v32  ;;  %v3150_v17 = vadd.f32 %v3148_v13, %v3135_v36 }
 0x25e   : >> { %6724 = vmatmul.mubr.msk.bf16.gmra.mxu1 %vm2063_vm14, %v9015_v29  ;;  %6751 = vmatprep.mubr.msk.bf16.mxu0 %vm2063_vm14, %v9068_v50 }
 0x25f   : >> { %v3089_v61 = vpop.permute.xlu1 %3088  ;;  %6727 = vmatprep.mubr.msk.bf16.mxu1 %vm2063_vm14, %v9036_v23  ;;  %v3158_v60 = vpop.permute.xlu0 %3157 }
 0x260   : >> { %v3093_v59 = vsel %vm2058_vm13, 0.0, %v3089_v61  ;;  %v3163_v27 = vsel %vm2041_vm12, 0.0, %v3158_v60 }
 0x261   : >> { %v3095_v48 = vadd.f32 %v3093_v59, %v3080_v38  ;;  %v3165_v9 = vadd.f32 %v3163_v27, %v3150_v17 }
 0x263   : >> { %3097 = vst.msk [vmem:[#allocation3 + $0xc8] sm:$0xff] %vm2063_vm14, %v3095_v48  ;;  %v3130_v56 = vpop.permute.xlu1 %3129  ;;  %v3173_v14 = vpop.permute.xlu0 %3172 }
 0x264   : >> { %v3178_v15 = vsel %vm2058_vm13, 0.0, %v3173_v14  ;;  %v3134_v16 = vsel %vm2007_vm10, 0.0, %v3130_v56  ;;  %vm5274_vm10 = vcmask (%p411_p11), 1047559  }
 0x265   : >> { %6752 = vmatmul.mubr.msk.bf16.gmra.mxu0 %vm2063_vm14, %v9090_v49  ;;  %v3180_v21 = vadd.f32 %v3178_v15, %v3165_v9  ;;  %v3136_v41 = vadd.f32 %v3134_v16, %v8719_v25 }
 0x266   : >> { %6728 = vmatmul.mubr.msk.bf16.gmra.mxu1 %vm2063_vm14, %v9052_v1  ;;  %6755 = vmatprep.mubr.msk.bf16.mxu0 %vm2063_vm14, %v9111_v62 }
 0x267   : >> { %v3145_v3 = vpop.permute.xlu1 %3144  ;;  %6731 = vmatprep.mubr.msk.bf16.mxu1 %vm2063_vm14, %v9068_v50  ;;  %3182 = vst.msk [vmem:[#allocation3 + $0xd0] sm:$0xff] %vm2063_vm14, %v3180_v21 }
 0x268   : >> { %v3149_v44 = vsel %vm2024_vm11, 0.0, %v3145_v3  ;;  %vm7213_vm11 = vmmov (%p411_p11), 0  }
 0x269   : >> { %v3151_v46 = vadd.f32 %v3149_v44, %v3136_v41 }
 0x26b   : >> { %v3160_v10 = vpop.permute.xlu1 %3159 }
 0x26c   : >> { %v3164_v34 = vsel %vm2041_vm12, 0.0, %v3160_v10 }
 0x26d   : >> { %6756 = vmatmul.mubr.msk.bf16.gmra.mxu0 %vm2063_vm14, %v3538_v52  ;;  %v3166_v33 = vadd.f32 %v3164_v34, %v3151_v46 }
 0x26e   : >> { %6732 = vmatmul.mubr.msk.bf16.gmra.mxu1 %vm2063_vm14, %v9090_v49  ;;  %6787 = vmatprep.mubr.msk.bf16.mxu0 %vm2063_vm14, %v9009_v37 }
 0x26f   : >> { %v3175_v5 = vpop.permute.xlu1 %3174  ;;  %6763 = vmatprep.mubr.msk.bf16.mxu1 %vm2063_vm14, %v9006_v47  ;;  %v3946_v47 = vld [vmem:[#allocation3 + $0xc8] sm:$0xff] }
 0x270   : >> { %v3179_v25 = vsel %vm2058_vm13, 0.0, %v3175_v5 }
 0x271   : >> { %v3181_v58 = vadd.f32 %v3179_v25, %v3166_v33 }
 0x273   : >> { %3183 = vst.msk [vmem:[#allocation3 + $0xd8] sm:$0xff] %vm2063_vm14, %v3181_v58 }
 0x275   : >> { %6788 = vmatmul.mubr.msk.bf16.vlgmr.msra.gmra.mxu0 %vm2063_vm14, %v9015_v29 }
 0x276   : >> { %6764 = vmatmul.mubr.msk.bf16.vlgmr.msra.gmra.mxu1 %vm2063_vm14, %v9009_v37  ;;  %6791 = vmatprep.mubr.msk.bf16.mxu0 %vm2063_vm14, %v9036_v23  ;;  %v3945_v37 = vld [vmem:[#allocation3 + $0xc0] sm:$0xff] }
 0x277   : >> { %6767 = vmatprep.mubr.msk.bf16.mxu1 %vm2063_vm14, %v9015_v29  ;;  %v3957_v29 = vpack.c.bf16 %v3946_v47, %v3945_v37 }
 0x27d   : >> { %6792 = vmatmul.mubr.msk.bf16.gmra.mxu0 %vm2063_vm14, %v9052_v1 }
 0x27e   : >> { %6768 = vmatmul.mubr.msk.bf16.gmra.mxu1 %vm2063_vm14, %v9036_v23  ;;  %6795 = vmatprep.mubr.msk.bf16.mxu0 %vm2063_vm14, %v9068_v50  ;;  %v3948_v23 = vld [vmem:[#allocation3 + $0xd8] sm:$0xff] }
 0x27f   : >> { %6771 = vmatprep.mubr.msk.bf16.mxu1 %vm2063_vm14, %v9052_v1  ;;  %v3947_v1 = vld [vmem:[#allocation3 + $0xd0] sm:$0xff] }
 0x285   : >> { %6796 = vmatmul.mubr.msk.bf16.gmra.mxu0 %vm2063_vm14, %v9090_v49 }
 0x286   : >> { %6772 = vmatmul.mubr.msk.bf16.gmra.mxu1 %vm2063_vm14, %v9068_v50  ;;  %6799 = vmatprep.mubr.msk.bf16.mxu0 %vm2063_vm14, %v9111_v62  ;;  %v3958_v50 = vpack.c.bf16 %v3948_v23, %v3947_v1 }
 0x287   : >> { %6775 = vmatprep.mubr.msk.bf16.mxu1 %vm2063_vm14, %v9090_v49 }
 0x28d   : >> { %6800 = vmatmul.mubr.msk.bf16.gmra.mxu0 %vm2063_vm14, %v3538_v52 }
 0x28e   : >> { %6776 = vmatmul.mubr.msk.bf16.gmra.mxu1 %vm2063_vm14, %v9111_v62  ;;  %6803 = vmatprep.mubr.msk.bf16.mxu0 %vm2063_vm14, %v3957_v29 }
 0x28f   : >> { %6779 = vmatprep.mubr.msk.bf16.mxu1 %vm2063_vm14, %v3538_v52 }
 0x295   : >> { %6804 = vmatmul.mubr.msk.bf16.gmra.mxu0 %vm2063_vm14, %v3958_v50 }
 0x296   : >> { %6780 = vmatmul.mubr.msk.bf16.gmra.mxu1 %vm2063_vm14, %v3957_v29  ;;  %6839 = vmatprep.mubr.msk.bf16.mxu0 %vm7207_vm15, %v9983_v6 }
 0x297   : >> { %6809 = vmatprep.mubr.msk.bf16.mxu1 %vm7207_vm15, %v9983_v6 }
 0x2a4   : >> { %v6693_v49 = vpop.f32.mrf.mxu0 }
 0x2a6   : >> { %v9228_v11 = vpop.f32.mrf.mxu0 }
 0x2a8   : >> { %v6694_v62 = vpop.f32.mrf.mxu0 }
 0x2aa   : >> { %v9236_v42 = vpop.f32.mrf.mxu0 }
 0x2b5   : >> { %v9238_v12 = vpop.f32.mrf.mxu0 }
 0x2b7   : >> { %v9240_v28 = vpop.f32.mrf.mxu0 }
 0x2b9   : >> { %v9242_v2 = vpop.f32.mrf.mxu0 }
 0x2bb   : >> { %v9244_v39 = vpop.f32.mrf.mxu0 }
 0x2c5   : >> { %v9246_v24 = vpop.f32.mrf.mxu0 }
 0x2c7   : >> { %v9248_v30 = vpop.f32.mrf.mxu0 }
 0x2c9   : >> { %v9250_v31 = vpop.f32.mrf.mxu0 }
 0x2cb   : >> { %v9252_v4 = vpop.f32.mrf.mxu0 }
 0x2e5   : >> { %v9254_v20 = vpop.f32.mrf.mxu0 }
 0x2e7   : >> { %v9256_v7 = vpop.f32.mrf.mxu0 }
 0x2e9   : >> { %v9258_v8 = vpop.f32.mrf.mxu0 }
 0x2eb   : >> { %v9260_v35 = vpop.f32.mrf.mxu0 }
 0x305   : >> { %v9262_v18 = vpop.f32.mrf.mxu0 }
 0x307   : >> { %v9264_v22 = vpop.f32.mrf.mxu0 }
 0x308   : >> { %10119 = vst [vmem:[#allocation27_spill] sm:$0xff] %v9264_v22 }
 0x309   : >> { %v9266_v43 = vpop.f32.mrf.mxu0 }
 0x30a   : >> { %10120 = vst [vmem:[#allocation25_spill] sm:$0xff] %v9266_v43 }
 0x30b   : >> { %v9268_v55 = vpop.f32.mrf.mxu0 }
 0x30c   : >> { %10121 = vst [vmem:[#allocation26_spill] sm:$0xff] %v9268_v55 }
 0x30d   : >> { %v6741_v63 = vpop.f32.mrf.mxu0 }
 0x30e   : >> { %v6717_v57 = vpop.f32.mrf.mxu1 }
 0x30f   : >> { %v3620_v0 = vpop.f32.mrf.mxu0  ;;  %v3439_v58 = vadd.f32 %v6717_v57, %v6693_v49 }
 0x310   : >> { %v3430_v45 = vpop.f32.mrf.mxu1 }
 0x311   : >> { %v6742_v51 = vpop.f32.mrf.mxu0  ;;  %v3431_v29 = vadd.f32 %v3430_v45, %v9228_v11  ;;  %v3701_v55 = vadd.f32 %v6741_v63, %v3439_v58  ;;  %v9329_v11 = vld [vmem:[%s9917_s4] ss:$0 sm:$0xff] }
 0x312   : >> { %v6718_v53 = vpop.f32.mrf.mxu1 }
 0x313   : >> { %v3623_v40 = vpop.f32.mrf.mxu0  ;;  %v3442_v50 = vadd.f32 %v6718_v53, %v6694_v62 }
 0x314   : >> { %v3433_v32 = vpop.f32.mrf.mxu1 }
 0x315   : >> { %v9270_v19 = vpop.f32.mrf.mxu0 }
 0x316   : >> { %v6721_v38 = vpop.f32.mrf.mxu1 }
 0x317   : >> { %v9272_v61 = vpop.f32.mrf.mxu0 }
 0x318   : >> { %v3446_v13 = vpop.f32.mrf.mxu1 }
 0x319   : >> { %v9274_v59 = vpop.f32.mrf.mxu0 }
 0x31a   : >> { %v6722_v36 = vpop.f32.mrf.mxu1 }
 0x31b   : >> { %v9276_v60 = vpop.f32.mrf.mxu0 }
 0x31c   : >> { %v3449_v48 = vpop.f32.mrf.mxu1 }
 0x31d   : >> { %v9278_v27 = vpop.f32.mrf.mxu0 }
 0x31e   : >> { %v6725_v17 = vpop.f32.mrf.mxu1 }
 0x31f   : >> { %v9280_v56 = vpop.f32.mrf.mxu0 }
 0x320   : >> { %v9282_v9 = vpop.f32.mrf.mxu1 }
 0x321   : >> { %v9284_v14 = vpop.f32.mrf.mxu0 }
 0x322   : >> { %v9286_v15 = vpop.f32.mrf.mxu1 }
 0x323   : >> { %v9288_v21 = vpop.f32.mrf.mxu0 }
 0x324   : >> { %v9290_v3 = vpop.f32.mrf.mxu1 }
 0x325   : >> { %v9292_v16 = vpop.f32.mrf.mxu0 }
 0x326   : >> { %v9294_v26 = vpop.f32.mrf.mxu1 }
 0x327   : >> { %v9296_v44 = vpop.f32.mrf.mxu0 }
 0x328   : >> { %v9298_v54 = vpop.f32.mrf.mxu1 }
 0x329   : >> { %v9300_v41 = vpop.f32.mrf.mxu0 }
 0x32a   : >> { %10122 = vst [vmem:[#allocation15_spill] sm:$0xff] %v9300_v41  ;;  %v9302_v10 = vpop.f32.mrf.mxu1 }
 0x32b   : >> { %v9304_v52 = vpop.f32.mrf.mxu0 }
 0x32c   : >> { %10123 = vst [vmem:[#allocation16_spill] sm:$0xff] %v9304_v52  ;;  %v9306_v34 = vpop.f32.mrf.mxu1  ;;  %v3702_v52 = vadd.f32 %v6742_v51, %v3442_v50 }
 0x32d   : >> { %v9308_v46 = vpop.f32.mrf.mxu0 }
 0x32e   : >> { %10124 = vst [vmem:[#allocation19_spill] sm:$0xff] %v9308_v46  ;;  %v9310_v33 = vpop.f32.mrf.mxu1  ;;  %v3434_v46 = vadd.f32 %v3433_v32, %v9236_v42  ;;  %v3455_v42 = vadd.f32 %v6721_v38, %v9238_v12 }
 0x32f   : >> { %v9312_v5 = vpop.f32.mrf.mxu0 }
 0x330   : >> { %10125 = vst [vmem:[#allocation18_spill] sm:$0xff] %v9312_v5  ;;  %v9314_v25 = vpop.f32.mrf.mxu1  ;;  %v3700_v53 = vadd.f32 %v3623_v40, %v3434_v46 }
 0x331   : >> { %10126 = vst [vmem:[#allocation14_spill] sm:$0xff] %v9314_v25  ;;  %v9316_v47 = vpop.f32.mrf.mxu0  ;;  %v3699_v25 = vadd.f32 %v3620_v0, %v3431_v29  ;;  %v3458_v0 = vadd.f32 %v6722_v36, %v9242_v2  ;;  %v3471_v2 = vadd.f32 %v6725_v17, %v9246_v24  ;;  %v3705_v36 = vadd.f32 %v9270_v19, %v3455_v42 }
 0x332   : >> { %10127 = vst [vmem:[#allocation13_spill] sm:$0xff] %v9316_v47  ;;  %v9318_v37 = vpop.f32.mrf.mxu1  ;;  %v3474_v17 = vadd.f32 %v9286_v15, %v9250_v31  ;;  %v3466_v31 = vadd.f32 %v9290_v3, %v9252_v4  ;;  %v3487_v15 = vadd.f32 %v9294_v26, %v9254_v20  ;;  %v10129_v3 = vmov 0.0  }
 0x333   : >> { %10128 = vst [vmem:[#allocation21_spill] sm:$0xff] %v9318_v37  ;;  %v9321_v23 = vpop.f32.mrf.mxu0 }
 0x334   : >> { %v9323_v1 = vpop.f32.mrf.mxu1 }
 0x335   : >> { %v6789_v6 = vpop.f32.mrf.mxu0 }
 0x336   : >> { %v6765_v43 = vpop.f32.mrf.mxu1 }
 0x337   : >> { %v3911_v5 = vadd.f32 %v6765_v43, %v3701_v55  ;;  %v4040_v22 = vpop.f32.mrf.mxu0  ;;  %v3447_v43 = vadd.f32 %v3446_v13, %v9240_v28 }
 0x338   : >> { %v3830_v49 = vpop.f32.mrf.mxu1 }
 0x339   : >> { %v3909_v57 = vadd.f32 %v3830_v49, %v3699_v25  ;;  %v6790_v47 = vpop.f32.mrf.mxu0  ;;  %v4121_v37 = vadd.f32 %v6789_v6, %v3911_v5  ;;  %v3450_v25 = vadd.f32 %v3449_v48, %v9244_v39  ;;  %v3703_v28 = vadd.f32 %v9272_v61, %v3447_v43 }
 0x33a   : >> { %v6766_v41 = vpop.f32.mrf.mxu1  ;;  %v3706_v39 = vadd.f32 %v9274_v59, %v3458_v0  ;;  %v3463_v48 = vadd.f32 %v9282_v9, %v9248_v30  ;;  %v3709_v9 = vadd.f32 %v9278_v27, %v3471_v2  ;;  %v3708_v2 = vadd.f32 %v9288_v21, %v3466_v31 }
 0x33b   : >> { %v4119_v62 = vadd.f32 %v4040_v22, %v3909_v57  ;;  %v3912_v45 = vadd.f32 %v6766_v41, %v3702_v52  ;;  %v4043_v63 = vpop.f32.mrf.mxu0  ;;  %v4148_v58 = vadd.f32 %v9329_v11, %v4121_v37  ;;  %v3704_v50 = vadd.f32 %v9276_v60, %v3450_v25 }
 0x33c   : >> { %v3833_v55 = vpop.f32.mrf.mxu1 }
 0x33d   : >> { %v4146_v51 = vadd.f32 %v9329_v11, %v4119_v62  ;;  %v4122_v6 = vadd.f32 %v6790_v47, %v3912_v45  ;;  %v3910_v32 = vadd.f32 %v3833_v55, %v3700_v53  ;;  %v6793_v5 = vpop.f32.mrf.mxu0  ;;  %v4168_v47 = vmax.f32 %v4148_v58, 0.0 }
 0x33e   : >> { %v6769_v22 = vpop.f32.mrf.mxu1  ;;  %v3710_v58 = vadd.f32 %v9284_v14, %v3474_v17 }
 0x33f   : >> { %v4149_v41 = vadd.f32 %v9329_v11, %v4122_v6  ;;  %v4120_v40 = vadd.f32 %v4043_v63, %v3910_v32  ;;  %v4056_v52 = vpop.f32.mrf.mxu0  ;;  %v4166_v12 = vmax.f32 %v4146_v51, 0.0  ;;  %v3915_v57 = vadd.f32 %v6769_v22, %v3705_v36  ;;  %v10130_v36 = vld [vmem:[#allocation11_spill] sm:$0xff] }
 0x340   : >> { %v3846_v38 = vpop.f32.mrf.mxu1  ;;  %v3707_v51 = vadd.f32 %v9280_v56, %v3463_v48  ;;  %v3479_v56 = vadd.f32 %v9298_v54, %v9256_v7  ;;  %v3713_v7 = vadd.f32 %v9292_v16, %v3487_v15  ;;  %v3482_v54 = vadd.f32 %v9306_v34, %v9260_v35 }
 0x341   : >> { %v4147_v13 = vadd.f32 %v9329_v11, %v4120_v40  ;;  %v6794_v46 = vpop.f32.mrf.mxu0  ;;  %v3913_v37 = vadd.f32 %v3846_v38, %v3703_v28  ;;  %v4169_v49 = vmax.f32 %v4149_v41, 0.0  ;;  %v4210_v19 = vmax.f32 %v4166_v12, %v4168_v47 }
 0x342   : >> { %v6770_v29 = vpop.f32.mrf.mxu1  ;;  %v4125_v60 = vadd.f32 %v6793_v5, %v3915_v57  ;;  %v3490_v28 = vadd.f32 %v9302_v10, %v9258_v8  ;;  %v3503_v8 = vadd.f32 %v9310_v33, %v9262_v18 }
 0x343   : >> { %v4167_v61 = vmax.f32 %v4147_v13, 0.0  ;;  %v3916_v62 = vadd.f32 %v6770_v29, %v3706_v39  ;;  %v4059_v24 = vpop.f32.mrf.mxu0  ;;  %v4123_v59 = vadd.f32 %v4056_v52, %v3913_v37 }
 0x344   : >> { %v3849_v45 = vpop.f32.mrf.mxu1  ;;  %v4152_v20 = vadd.f32 %v9329_v11, %v4125_v60  ;;  %v10135_v60 = vld [vmem:[#allocation19_spill] sm:$0xff] }
 0x345   : >> { %v4211_v63 = vmax.f32 %v4167_v61, %v4169_v49  ;;  %v4126_v53 = vadd.f32 %v6794_v46, %v3916_v62  ;;  %v3914_v42 = vadd.f32 %v3849_v45, %v3704_v50  ;;  %v6797_v30 = vpop.f32.mrf.mxu0  ;;  %v4150_v27 = vadd.f32 %v9329_v11, %v4123_v59 }
 0x346   : >> { %v6773_v43 = vpop.f32.mrf.mxu1  ;;  %v4172_v16 = vmax.f32 %v4152_v20, 0.0  ;;  %v3711_v50 = vadd.f32 %v9296_v44, %v3479_v56 }
 0x347   : >> { %v4124_v55 = vadd.f32 %v4059_v24, %v3914_v42  ;;  %v4072_v0 = vpop.f32.mrf.mxu0  ;;  %v4212_v6 = vpack.c.bf16 %v4211_v63, %v4210_v19  ;;  %v3919_v32 = vadd.f32 %v6773_v43, %v3709_v9  ;;  %v4153_v22 = vadd.f32 %v9329_v11, %v4126_v53  ;;  %v10131_v24 = vld [vmem:[#allocation15_spill] sm:$0xff]  ;;  %v10132_v63 = vld [vmem:[#allocation16_spill] sm:$0xff]  ;;  %v10134_v42 = vld [vmem:[#allocation14_spill] sm:$0xff] }
 0x348   : >> { %v3862_v25 = vpop.f32.mrf.mxu1  ;;  %v4170_v46 = vmax.f32 %v4150_v27, 0.0  ;;  %v3714_v18 = vadd.f32 %v10131_v24, %v3490_v28  ;;  %v3712_v59 = vadd.f32 %v10132_v63, %v3482_v54  ;;  %v10133_v53 = vld [vmem:[#allocation27_spill] sm:$0xff] }
 0x349   : >> { %v4151_v5 = vadd.f32 %v9329_v11, %v4124_v55  ;;  %v3917_v41 = vadd.f32 %v3862_v25, %v3707_v51  ;;  %v6798_v40 = vpop.f32.mrf.mxu0  ;;  %6808 = vmatpush3.bf16.msra.mxu1 %v4212_v6  ;;  %v4129_v38 = vadd.f32 %v6797_v30, %v3919_v32  ;;  %v4173_v39 = vmax.f32 %v4153_v22, 0.0  ;;  %v10136_v32 = vld [vmem:[#allocation25_spill] sm:$0xff] }
 0x34a   : >> { %v6774_v4 = vpop.f32.mrf.mxu1  ;;  %6813 = vmatprep.subr.bf16.mxu1 %v10129_v3  ;;  %v4332_v33 = vmax.f32 %v4170_v46, %v4172_v16  ;;  %v3495_v30 = vadd.f32 %v10134_v42, %v10133_v53  ;;  %v3717_v55 = vadd.f32 %v10135_v60, %v3503_v8  ;;  %v10137_v25 = vld [vmem:[#allocation21_spill] sm:$0xff] }
 0x34b   : >> { %v4171_v26 = vmax.f32 %v4151_v5, 0.0  ;;  %v4127_v52 = vadd.f32 %v4072_v0, %v3917_v41  ;;  %v3920_v14 = vadd.f32 %v6774_v4, %v3710_v58  ;;  %v4075_v12 = vpop.f32.mrf.mxu0  ;;  %v4156_v49 = vadd.f32 %v9329_v11, %v4129_v38  ;;  %v10141_v16 = vld [vmem:[#allocation13_spill] sm:$0xff] }
 0x34c   : >> { %v3865_v13 = vpop.f32.mrf.mxu1  ;;  %6810 = vmatmul.mubr.msk.bf16.vlgmr.msra.gmra.mxu1 %vm4213_vm0, %v10130_v36  ;;  %v3506_v58 = vadd.f32 %v10137_v25, %v10136_v32 }
 0x34d   : >> { %v4130_v48 = vadd.f32 %v6798_v40, %v3920_v14  ;;  %v6801_v47 = vpop.f32.mrf.mxu0  ;;  %6814 = vmatpush3.bf16.msra.mxu1 %v4212_v6  ;;  %6815 = vmatprep.mubr.msk.bf16.mxu1 %vm7207_vm15, %v10129_v3  ;;  %v4154_v21 = vadd.f32 %v9329_v11, %v4127_v52  ;;  %v3918_v10 = vadd.f32 %v3865_v13, %v3708_v2  ;;  %v4176_v27 = vmax.f32 %v4156_v49, 0.0  ;;  %v10138_v40 = vld [vmem:[#allocation12_spill] sm:$0xff]  ;;  %v10139_v52 = vld [vmem:[#allocation26_spill] sm:$0xff] }
 0x34e   : >> { %v6777_v37 = vpop.f32.mrf.mxu1  ;;  %6819 = vmatprep.subr.bf16.mxu1 %v10129_v3  ;;  %v4333_v29 = vmax.f32 %v4171_v26, %v4173_v39  ;;  %v3498_v14 = vadd.f32 %v9323_v1, %v10139_v52 }
 0x34f   : >> { %v3923_v35 = vadd.f32 %v6777_v37, %v3713_v7  ;;  %v4088_v34 = vpop.f32.mrf.mxu0  ;;  %v4157_v61 = vadd.f32 %v9329_v11, %v4130_v48  ;;  %v4128_v57 = vadd.f32 %v4075_v12, %v3918_v10  ;;  %v4174_v9 = vmax.f32 %v4154_v21, 0.0  ;;  %v10140_v48 = vld [vmem:[#allocation18_spill] sm:$0xff] }
 0x350   : >> { %v3878_v62 = vpop.f32.mrf.mxu1  ;;  %v4334_v15 = vpack.c.bf16 %v4333_v29, %v4332_v33  ;;  %v3718_v29 = vadd.f32 %v10141_v16, %v3506_v58 }
 0x351   : >> { %v4133_v17 = vadd.f32 %v6801_v47, %v3923_v35  ;;  %v3921_v19 = vadd.f32 %v3878_v62, %v3711_v50  ;;  %v6802_v45 = vpop.f32.mrf.mxu0  ;;  %v4155_v44 = vadd.f32 %v9329_v11, %v4128_v57  ;;  %v4177_v22 = vmax.f32 %v4157_v61, 0.0 }
 0x352   : >> { %v6778_v43 = vpop.f32.mrf.mxu1  ;;  %v4445_v12 = vmax.f32 %v4174_v9, %v4176_v27  ;;  %v3715_v47 = vadd.f32 %v10140_v48, %v3495_v30  ;;  %v3716_v62 = vadd.f32 %v9321_v23, %v3498_v14 }
 0x353   : >> { %v4160_v0 = vadd.f32 %v9329_v11, %v4133_v17  ;;  %v4131_v51 = vadd.f32 %v4088_v34, %v3921_v19  ;;  %v3924_v6 = vadd.f32 %v6778_v43, %v3714_v18  ;;  %v4091_v31 = vpop.f32.mrf.mxu0  ;;  %v4175_v5 = vmax.f32 %v4155_v44, 0.0 }
 0x354   : >> { %v3881_v41 = vpop.f32.mrf.mxu1  ;;  %6816 = vmatmul.mubr.msk.bf16.vlgmr.msra.gmra.mxu1 %vm4213_vm0, %v10138_v40 }
 0x355   : >> { %v4158_v56 = vadd.f32 %v9329_v11, %v4131_v51  ;;  %v4134_v4 = vadd.f32 %v6802_v45, %v3924_v6  ;;  %v3922_v20 = vadd.f32 %v3881_v41, %v3712_v59  ;;  %6820 = vmatpush3.bf16.msra.mxu1 %v4334_v15  ;;  %v6805_v26 = vpop.f32.mrf.mxu0  ;;  %6821 = vmatprep.mubr.msk.bf16.mxu1 %vm7207_vm15, %v10129_v3  ;;  %v4180_v38 = vmax.f32 %v4160_v0, 0.0 }
 0x356   : >> { %v4446_v28 = vmax.f32 %v4175_v5, %v4177_v22  ;;  %v6781_v2 = vpop.f32.mrf.mxu1  ;;  %6825 = vmatprep.subr.bf16.mxu1 %v10129_v3 }
 0x357   : >> { %v4178_v13 = vmax.f32 %v4158_v56, 0.0  ;;  %v4161_v7 = vadd.f32 %v9329_v11, %v4134_v4  ;;  %v4132_v54 = vadd.f32 %v4091_v31, %v3922_v20  ;;  %v3927_v46 = vadd.f32 %v6781_v2, %v3717_v55  ;;  %v4104_v39 = vpop.f32.mrf.mxu0 }
 0x358   : >> { %v3894_v8 = vpop.f32.mrf.mxu1  ;;  %v4447_v21 = vpack.c.bf16 %v4446_v28, %v4445_v12 }
 0x359   : >> { %v4558_v10 = vmax.f32 %v4178_v13, %v4180_v38  ;;  %v4159_v37 = vadd.f32 %v9329_v11, %v4132_v54  ;;  %v4137_v1 = vadd.f32 %v6805_v26, %v3927_v46  ;;  %v3925_v35 = vadd.f32 %v3894_v8, %v3715_v47  ;;  %v6806_v34 = vpop.f32.mrf.mxu0 }
 0x35a   : >> { %6838 = vmatpush3.bf16.msra.mxu0 %v4447_v21  ;;  %v6782_v50 = vpop.f32.mrf.mxu1  ;;  %v4181_v49 = vmax.f32 %v4161_v7, 0.0 }
 0x35b   : >> { %v4179_v61 = vmax.f32 %v4159_v37, 0.0  ;;  %v3928_v57 = vadd.f32 %v6782_v50, %v3718_v29  ;;  %6849 = vmatprep.subr.bf16.mxu0 %v10129_v3  ;;  %v4164_v24 = vadd.f32 %v9329_v11, %v4137_v1  ;;  %v4135_v18 = vadd.f32 %v4104_v39, %v3925_v35  ;;  %v4107_v59 = vpop.f32.mrf.mxu0 }
 0x35c   : >> { %v3897_v33 = vpop.f32.mrf.mxu1  ;;  %6822 = vmatmul.mubr.msk.bf16.vlgmr.msra.gmra.mxu1 %vm4213_vm0, %v10130_v36 }
 0x35d   : >> { %v4559_v17 = vmax.f32 %v4179_v61, %v4181_v49  ;;  %v4138_v19 = vadd.f32 %v6806_v34, %v3928_v57  ;;  %v3926_v45 = vadd.f32 %v3897_v33, %v3716_v62  ;;  %6826 = vmatpush3.bf16.msra.mxu1 %v4334_v15  ;;  %6840 = vmatmul.mubr.msk.bf16.vlgmr.msra.gmra.mxu0 %vm4213_vm0, %v10138_v40  ;;  %v4184_v30 = vmax.f32 %v4164_v24, 0.0 }
 0x35e   : >> { %v4162_v63 = vadd.f32 %v9329_v11, %v4135_v18  ;;  %6827 = vmatprep.mubr.msk.bf16.mxu1 %vm7207_vm15, %v10129_v3  ;;  %6831 = vmatprep.subr.bf16.mxu1 %v10129_v3 }
 0x35f   : >> { %v4165_v23 = vadd.f32 %v9329_v11, %v4138_v19  ;;  %v4136_v53 = vadd.f32 %v4107_v59, %v3926_v45  ;;  %v4560_v42 = vpack.c.bf16 %v4559_v17, %v4558_v10  ;;  %6851 = vmatprep.mubr.msk.bf16.mxu0 %vm7207_vm15, %v10129_v3 }
 0x360   : >> { %v4182_v9 = vmax.f32 %v4162_v63, 0.0 }
 0x361   : >> { %v4163_v44 = vadd.f32 %v9329_v11, %v4136_v53  ;;  %6850 = vmatpush3.bf16.msra.mxu0 %v4560_v42  ;;  %v4185_v60 = vmax.f32 %v4165_v23, 0.0 }
 0x362   : >> { %v4671_v43 = vmax.f32 %v4182_v9, %v4184_v30  ;;  %6861 = vmatprep.subr.bf16.mxu0 %v10129_v3 }
 0x363   : >> { %v4183_v55 = vmax.f32 %v4163_v44, 0.0 }
 0x364   : >> { %6828 = vmatmul.mubr.msk.bf16.vlgmr.msra.gmra.mxu1 %vm4213_vm0, %v10138_v40 }
 0x365   : >> { %v4672_v0 = vmax.f32 %v4183_v55, %v4185_v60  ;;  %6832 = vmatpush3.bf16.msra.mxu1 %v4447_v21  ;;  %6852 = vmatmul.mubr.msk.bf16.vlgmr.msra.gmra.mxu0 %vm4213_vm0, %v10138_v40 }
 0x366   : >> { %6833 = vmatprep.mubr.msk.bf16.mxu1 %vm7207_vm15, %v10129_v3  ;;  %6843 = vmatprep.subr.bf16.mxu1 %v10129_v3 }
 0x367   : >> { %v4673_v11 = vpack.c.bf16 %v4672_v0, %v4671_v43  ;;  %6863 = vmatprep.mubr.msk.bf16.mxu0 %vm7207_vm15, %v10129_v3 }
 0x369   : >> { %6862 = vmatpush3.bf16.msra.mxu0 %v4673_v11 }
 0x36c   : >> { %6834 = vmatmul.mubr.msk.bf16.vlgmr.msra.gmra.mxu1 %vm4213_vm0, %v10130_v36 }
 0x36d   : >> { %6844 = vmatpush3.bf16.msra.mxu1 %v4560_v42  ;;  %6845 = vmatprep.mubr.msk.bf16.mxu1 %vm7207_vm15, %v10129_v3 }
 0x36e   : >> { %6855 = vmatprep.subr.bf16.mxu1 %v10129_v3  ;;  %6864 = vmatmul.mubr.msk.bf16.vlgmr.msra.gmra.mxu0 %vm4213_vm0, %v10138_v40  ;;  %v7080_v40 = vld [vmem:[%s9918_s5 + $0x30] sm:$0xff] (%p411_p11)  }
 0x374   : >> { %6846 = vmatmul.mubr.msk.bf16.vlgmr.msra.gmra.mxu1 %vm4213_vm0, %v10130_v36 }
 0x375   : >> { %6856 = vmatpush3.bf16.msra.mxu1 %v4673_v11  ;;  %6857 = vmatprep.mubr.msk.bf16.mxu1 %vm7207_vm15, %v10129_v3 }
 0x37c   : >> { %6858 = vmatmul.mubr.msk.bf16.vlgmr.msra.gmra.mxu1 %vm4213_vm0, %v10130_v36  ;;  %v7079_v36 = vld [vmem:[%s9918_s5 + $0x70] sm:$0xff] (%p411_p11)  }
 0x40c   : >> { %v4251_v51 = vpop.f32.mrf.mxu1 }
 0x40e   : >> { %v6811_v6 = vpop.f32.mrf.mxu1 }
 0x410   : >> { %v4254_v31 = vpop.f32.mrf.mxu1 }
 0x412   : >> { %v6812_v15 = vpop.f32.mrf.mxu1 }
 0x414   : >> { %v4294_v32 = vpop.f32.mrf.mxu1 }
 0x415   : >> { %v9438_v25 = vmax.f32 %v4251_v51, %v4294_v32 }
 0x416   : >> { %v6817_v58 = vpop.f32.mrf.mxu1 }
 0x417   : >> { %v4302_v27 = vrot.slane %v9438_v25, 1  ;;  %v4321_v22 = vrot.slane %v9438_v25, 4  ;;  %v4308_v41 = vrot.slane %v9438_v25, 2  ;;  %v4314_v26 = vrot.slane %v9438_v25, 3 }
 0x418   : >> { %v4297_v5 = vpop.f32.mrf.mxu1 }
 0x419   : >> { %4303 = vrot.lane.b32.xlu0 %v4302_v27, %s7208_s25  ;;  %4322 = vrot.lane.b32.xlu1 %v4321_v22, %s7209_s26 }
 0x41a   : >> { %v6818_v3 = vpop.f32.mrf.mxu1 }
 0x41c   : >> { %v4369_v56 = vpop.f32.mrf.mxu1 }
 0x41d   : >> { %4309 = vrot.lane.b32.xlu0 %v4308_v41, %s7210_s30  ;;  %v4522_v4 = vpop.f32.mrf.mxu0 }
 0x41e   : >> { %v6823_v20 = vpop.f32.mrf.mxu1 }
 0x41f   : >> { %v6841_v52 = vpop.f32.mrf.mxu0 }
 0x420   : >> { %v4372_v14 = vpop.f32.mrf.mxu1 }
 0x421   : >> { %4315 = vrot.lane.b32.xlu0 %v4314_v26, %s7211_s29  ;;  %v4525_v12 = vpop.f32.mrf.mxu0 }
 0x422   : >> { %v6824_v28 = vpop.f32.mrf.mxu1 }
 0x423   : >> { %v6842_v38 = vpop.f32.mrf.mxu0 }
 0x424   : >> { %v4409_v2 = vpop.f32.mrf.mxu1 }
 0x425   : >> { %v9448_v13 = vmax.f32 %v4369_v56, %v4409_v2  ;;  %v4635_v7 = vpop.f32.mrf.mxu0 }
 0x426   : >> { %v6829_v54 = vpop.f32.mrf.mxu1 }
 0x427   : >> { %v4417_v46 = vrot.slane %v9448_v13, 1  ;;  %v4435_v39 = vrot.slane %v9448_v13, 4  ;;  %v6853_v48 = vpop.f32.mrf.mxu0  ;;  %v4423_v10 = vrot.slane %v9448_v13, 2  ;;  %v4429_v34 = vrot.slane %v9448_v13, 3 }
 0x428   : >> { %v4412_v47 = vpop.f32.mrf.mxu1 }
 0x429   : >> { %4418 = vrot.lane.b32.xlu1 %v4417_v46, %s7208_s25  ;;  %4436 = vrot.lane.b32.xlu0 %v4435_v39, %s7209_s26  ;;  %v4638_v8 = vpop.f32.mrf.mxu0  ;;  %v7212_v47 = vmov 1966171168  }
 0x42a   : >> { %v6830_v21 = vpop.f32.mrf.mxu1  ;;  %v4788_v8 = vunpack.c.l.s4 %v7212_v47  ;;  %v7087_v47 = vld [vmem:[%s9918_s5 + $0x60] sm:$0xff] (%p411_p11)  }
 0x42b   : >> { %v6854_v37 = vpop.f32.mrf.mxu0 }
 0x42c   : >> { %v4482_v1 = vpop.f32.mrf.mxu1 }
 0x42d   : >> { %v9455_v16 = vmax.f32 %v4482_v1, %v4522_v4  ;;  %4424 = vrot.lane.b32.xlu1 %v4423_v10, %s7210_s30 }
 0x42e   : >> { %v6835_v29 = vpop.f32.mrf.mxu1  ;;  %v4748_v35 = vpop.f32.mrf.mxu0 }
 0x42f   : >> { %v4530_v50 = vrot.slane %v9455_v16, 1  ;;  %v4548_v24 = vrot.slane %v9455_v16, 4  ;;  %v4536_v18 = vrot.slane %v9455_v16, 2  ;;  %v4542_v63 = vrot.slane %v9455_v16, 3 }
 0x430   : >> { %v4485_v49 = vpop.f32.mrf.mxu1  ;;  %v6865_v61 = vpop.f32.mrf.mxu0 }
 0x431   : >> { %4430 = vrot.lane.b32.xlu1 %v4429_v34, %s7211_s29  ;;  %4531 = vrot.lane.b32.xlu0 %v4530_v50, %s7208_s25 }
 0x432   : >> { %v6836_v57 = vpop.f32.mrf.mxu1  ;;  %v4751_v62 = vpop.f32.mrf.mxu0 }
 0x433   : >> { %v4789_v62 = vunpack.c.0.s8 %v4788_v8  ;;  %v7088_v8 = vld [vmem:[%s9918_s5 + $0x20] sm:$0xff] (%p411_p11)  }
 0x434   : >> { %v4595_v33 = vpop.f32.mrf.mxu1  ;;  %v6866_v17 = vpop.f32.mrf.mxu0 }
 0x435   : >> { %v9464_v19 = vmax.f32 %v4595_v33, %v4635_v7  ;;  %4549 = vrot.lane.b32.xlu1 %v4548_v24, %s7209_s26  ;;  %4537 = vrot.lane.b32.xlu0 %v4536_v18, %s7210_s30 }
 0x436   : >> { %v6847_v45 = vpop.f32.mrf.mxu1 }
 0x437   : >> { %v4643_v59 = vrot.slane %v9464_v19, 1  ;;  %v4661_v42 = vrot.slane %v9464_v19, 4  ;;  %v4649_v30 = vrot.slane %v9464_v19, 2  ;;  %v4655_v60 = vrot.slane %v9464_v19, 3 }
 0x438   : >> { %v4598_v23 = vpop.f32.mrf.mxu1 }
 0x439   : >> { %4543 = vrot.lane.b32.xlu0 %v4542_v63, %s7211_s29  ;;  %4644 = vrot.lane.b32.xlu1 %v4643_v59, %s7208_s25 }
 0x43a   : >> { %v6848_v53 = vpop.f32.mrf.mxu1 }
 0x43c   : >> { %v4708_v9 = vpop.f32.mrf.mxu1 }
 0x43d   : >> { %v9474_v44 = vmax.f32 %v4708_v9, %v4748_v35  ;;  %4662 = vrot.lane.b32.xlu0 %v4661_v42, %s7209_s26  ;;  %4650 = vrot.lane.b32.xlu1 %v4649_v30, %s7210_s30  ;;  %v10142_v42 = vld [vmem:[#allocation10_spill] sm:$0xff] }
 0x43e   : >> { %v6859_v43 = vpop.f32.mrf.mxu1  ;;  %v4792_v30 = vsub.s32 %v4789_v62, %v10142_v42  ;;  %v10144_v62 = vld [vmem:[#allocation10_spill] sm:$0xff] (%p411_p11) }
 0x43f   : >> { %v4756_v55 = vrot.slane %v9474_v44, 1  ;;  %v4762_v51 = vrot.slane %v9474_v44, 2  ;;  %v4768_v6 = vrot.slane %v9474_v44, 3  ;;  %v4774_v31 = vrot.slane %v9474_v44, 4 }
 0x440   : >> { %v4711_v0 = vpop.f32.mrf.mxu1 }
 0x441   : >> { %4656 = vrot.lane.b32.xlu1 %v4655_v60, %s7211_s29  ;;  %4757 = vrot.lane.b32.xlu0 %v4756_v55, %s7208_s25  ;;  %s10147_s25 = smov (%p411_p11), %s10146_s16 }
 0x442   : >> { %v6860_v11 = vpop.f32.mrf.mxu1 }
 0x445   : >> { %4763 = vrot.lane.b32.xlu1 %v4762_v51, %s7210_s30  ;;  %4769 = vrot.lane.b32.xlu0 %v4768_v6, %s7211_s29  ;;  %s7214_s29 = smov (%p411_p11), [#allocation6]  }
 0x446   : > { %s7135_s13 = sshll.u32 (%p411_p11), %s7214_s29, 4  ;;  %s7136_s13 = int_to_ptr.vmem [resolvable:$false] %s7135_s13 }
 0x447   : > { %s7137_s24 = scalar_lea.vmem (%p411_p11), %s7136_s13, 256 }
 0x449   : >> { %4775 = vrot.lane.b32.xlu1 %v4774_v31, %s7209_s26  ;;  %s10148_s26 = sand.u32 (%p411_p11), 1, %s7187_s18  }
 0x44a   : > { %s5930_s21 = scalar_lea.sflag (%p411_p11), [#allocation7], %s10148_s26 }
 0x48b   : >> { %v4304_v15 = vpop.permute.xlu0 %4303  ;;  %v4323_v58 = vpop.permute.xlu1 %4322 }
 0x48c   : >> { %v4306_v52 = vsel %vm4213_vm0, 0.0, %v4304_v15 }
 0x48d   : >> { %v4307_v46 = vadd.f32 %v4306_v52, %v9438_v25 }
 0x48f   : >> { %v4310_v32 = vpop.permute.xlu0 %4309 }
 0x490   : >> { %v4312_v2 = vsel %vm2063_vm14, 0.0, %v4310_v32 }
 0x493   : >> { %v4316_v27 = vpop.permute.xlu0 %4315 }
 0x494   : >> { %v4319_v48 = vsel %vm4318_vm1, 0.0, %v4316_v27 }
 0x49b   : >> { %v4419_v22 = vpop.permute.xlu1 %4418  ;;  %v4437_v3 = vpop.permute.xlu0 %4436 }
 0x49c   : >> { %v4421_v26 = vsel %vm4213_vm0, 0.0, %v4419_v22  ;;  %v4439_v57 = vsel %vm4325_vm2, 0.0, %v4437_v3 }
 0x49d   : >> { %v4422_v12 = vadd.f32 %v4421_v26, %v9448_v13  ;;  %v4313_v13 = vadd.f32 %v4312_v2, %v4307_v46  ;;  %v10143_v26 = vlaneseq  ;;  %v7081_v2 = vld [vmem:[%s9918_s5 + $0xf0] sm:$0xff] (%p411_p11)   ;;  %v7084_v46 = vld [vmem:[%s9918_s5 + $0x28] sm:$0xff] (%p411_p11)  }
 0x49f   : >> { %v4425_v5 = vpop.permute.xlu1 %4424  ;;  %v4320_v25 = vadd.f32 %v4319_v48, %v4313_v13  ;;  %vm4829_vm3 = vcmp.lt.s32.totalorder %v10143_v26, 640  ;;  %v7086_v48 = vld [vmem:[%s9918_s5 + $0xa8] sm:$0xff] (%p411_p11)   ;;  %v7091_v13 = vld [vmem:[%s9918_s5 + $0x58] sm:$0xff] (%p411_p11)  }
 0x4a0   : >> { %v4427_v14 = vsel %vm2063_vm14, 0.0, %v4425_v5 }
 0x4a1   : >> { %v4428_v39 = vadd.f32 %v4427_v14, %v4422_v12  ;;  %v7075_v14 = vld [vmem:[%s9918_s5 + $0x78] sm:$0xff] (%p411_p11)  }
 0x4a2   : > { %v7076_v12 = vld [vmem:[%s9918_s5 + $0x38] sm:$0xff] (%p411_p11)   ;;  %6464 = vmatprep.subr.bf16.mxu0 (%p411_p11), %v7075_v14 }
 0x4a3   : >> { %v4431_v41 = vpop.permute.xlu1 %4430  ;;  %v4532_v56 = vpop.permute.xlu0 %4531  ;;  %6465 = vmatpush3.bf16.msra.mxu0 (%p411_p11), %v7076_v12 }
 0x4a4   : >> { %v4433_v7 = vsel %vm4318_vm1, 0.0, %v4431_v41  ;;  %v4534_v54 = vsel %vm4213_vm0, 0.0, %v4532_v56  ;;  %6466 = vmatprep.subr.bf16.mxu0 (%p411_p11), %v7079_v36 }
 0x4a5   : >> { %v4434_v37 = vadd.f32 %v4433_v7, %v4428_v39  ;;  %v4535_v1 = vadd.f32 %v4534_v54, %v9455_v16  ;;  %v4326_v16 = vsel %vm4325_vm2, 0.0, %v4323_v58  ;;  %v7082_v7 = vld [vmem:[%s9918_s5 + $0xb0] sm:$0xff] (%p411_p11)   ;;  %v7083_v54 = vld [vmem:[%s9918_s5 + $0x68] sm:$0xff] (%p411_p11)  }
 0x4a6   : >> { %v4327_v23 = vadd.f32 %v4326_v16, %v4320_v25  ;;  %v7085_v39 = vld [vmem:[%s9918_s5 + $0xe8] sm:$0xff] (%p411_p11)   ;;  %v7098_v25 = vld [vmem:[%s9918_s5 + $0x90] sm:$0xff] (%p411_p11)   ;;  %v7104_v16 = vld [vmem:[%s9918_s5] sm:$0xff] (%p411_p11)  }
 0x4a7   : >> { %v4550_v4 = vpop.permute.xlu1 %4549  ;;  %v4538_v20 = vpop.permute.xlu0 %4537  ;;  %v4440_v24 = vadd.f32 %v4439_v57, %v4434_v37  ;;  %6467 = vmatpush3.bf16.msra.mxu0 (%p411_p11), %v7080_v40  ;;  %v7092_v37 = vld [vmem:[%s9918_s5 + $0x18] sm:$0xff] (%p411_p11)   ;;  %v7101_v57 = vld [vmem:[%s9918_s5 + $0xc8] sm:$0xff] (%p411_p11)  }
 0x4a8   : >> { %v4540_v21 = vsel %vm2063_vm14, 0.0, %v4538_v20  ;;  %6468 = vmatprep.subr.bf16.mxu0 (%p411_p11), %v7083_v54 }
 0x4a9   : >> { %v4541_v49 = vadd.f32 %v4540_v21, %v4535_v1  ;;  %v4785_v43 = vcombine.low %v4327_v23, %v4440_v24  ;;  %v7089_v21 = vld [vmem:[%s9918_s5 + $0xe0] sm:$0xff] (%p411_p11)   ;;  %v7093_v1 = vld [vmem:[%s9918_s5 + $0xd8] sm:$0xff] (%p411_p11)   ;;  %v4854_v24 = vsub.s32 (%p411_p11), 1, %v10144_v62  ;;  %v9623_v23 = vsub.s32 (%p411_p11), 4, %v10144_v62 }
 0x4ab   : >> { %v4645_v28 = vpop.permute.xlu1 %4644  ;;  %v4544_v38 = vpop.permute.xlu0 %4543  ;;  %v4793_v58 = vrot.slane %v4785_v43, %v4792_v30  ;;  %6469 = vmatpush3.bf16.msra.mxu0 (%p411_p11), %v7084_v46 }
 0x4ac   : >> { %v4647_v10 = vsel %vm4213_vm0, 0.0, %v4645_v28  ;;  %v4546_v34 = vsel %vm4318_vm1, 0.0, %v4544_v38  ;;  %v7077_v28 = vld [vmem:[%s9918_s5 + $0xf8] sm:$0xff] (%p411_p11)   ;;  %6470 = vmatprep.subr.bf16.mxu0 (%p411_p11), %v7087_v47 }
 0x4ad   : >> { %v4648_v61 = vadd.f32 %v4647_v10, %v9464_v19  ;;  %v4547_v18 = vadd.f32 %v4546_v34, %v4541_v49  ;;  %v4552_v19 = vsel %vm4325_vm2, 0.0, %v4550_v4  ;;  %v7078_v38 = vld [vmem:[%s9918_s5 + $0xb8] sm:$0xff] (%p411_p11)   ;;  %6486 = vmatprep.subr.bf16.mxu1 (%p411_p11), %v7077_v28  ;;  %v7090_v10 = vld [vmem:[%s9918_s5 + $0xa0] sm:$0xff] (%p411_p11)   ;;  %v7096_v34 = vld [vmem:[%s9918_s5 + $0x10] sm:$0xff] (%p411_p11)  }
 0x4ae   : > { %6487 = vmatpush3.bf16.msra.mxu1 (%p411_p11), %v7078_v38  ;;  %v7099_v49 = vld [vmem:[%s9918_s5 + $0x48] sm:$0xff] (%p411_p11)  }
 0x4af   : >> { %v4651_v29 = vpop.permute.xlu1 %4650  ;;  %v4663_v35 = vpop.permute.xlu0 %4662  ;;  %v4553_v60 = vadd.f32 %v4552_v19, %v4547_v18  ;;  %6488 = vmatprep.subr.bf16.mxu1 (%p411_p11), %v7081_v2  ;;  %6471 = vmatpush3.bf16.msra.mxu0 (%p411_p11), %v7088_v8  ;;  %v7102_v18 = vld [vmem:[%s9918_s5 + $0x88] sm:$0xff] (%p411_p11)  }
 0x4b0   : >> { %v4653_v50 = vsel %vm2063_vm14, 0.0, %v4651_v29  ;;  %v4665_v9 = vsel %vm4325_vm2, 0.0, %v4663_v35  ;;  %6472 = vmatprep.subr.bf16.mxu0 (%p411_p11), %v7091_v13  ;;  %v7094_v29 = vld [vmem:[%s9918_s5 + $0x98] sm:$0xff] (%p411_p11)   ;;  %v7095_v35 = vld [vmem:[%s9918_s5 + $0x50] sm:$0xff] (%p411_p11)  }
 0x4b1   : >> { %v4654_v33 = vadd.f32 %v4653_v50, %v4648_v61  ;;  %v7097_v50 = vld [vmem:[%s9918_s5 + $0xd0] sm:$0xff] (%p411_p11)   ;;  %v7100_v61 = vld [vmem:[%s9918_s5 + $0x8] sm:$0xff] (%p411_p11)  }
 0x4b2   : > { %6489 = vmatpush3.bf16.msra.mxu1 (%p411_p11), %v7082_v7 }
 0x4b3   : >> { %v4657_v17 = vpop.permute.xlu1 %4656  ;;  %v4758_v45 = vpop.permute.xlu0 %4757  ;;  %6490 = vmatprep.subr.bf16.mxu1 (%p411_p11), %v7085_v39  ;;  %6473 = vmatpush3.bf16.msra.mxu0 (%p411_p11), %v7092_v37 }
 0x4b4   : >> { %v4659_v63 = vsel %vm4318_vm1, 0.0, %v4657_v17  ;;  %v4760_v59 = vsel %vm4213_vm0, 0.0, %v4758_v45  ;;  %6474 = vmatprep.subr.bf16.mxu0 (%p411_p11), %v7095_v35  ;;  %v7103_v17 = vld [vmem:[%s9918_s5 + $0x40] sm:$0xff] (%p411_p11)   ;;  %v9611_v45 = vsub.s32 (%p411_p11), 3, %v10144_v62 }
 0x4b5   : >> { %v4660_v53 = vadd.f32 %v4659_v63, %v4654_v33  ;;  %v4761_v0 = vadd.f32 %v4760_v59, %v9474_v44  ;;  %v9605_v33 = vsub.s32 (%p411_p11), 0, %v10144_v62  ;;  %v9617_v63 = vsub.s32 (%p411_p11), 2, %v10144_v62  ;;  %v7105_v59 = vld [vmem:[%s9918_s5 + $0xc0] sm:$0xff] (%p411_p11)  }
 0x4b6   : > { %6491 = vmatpush3.bf16.msra.mxu1 (%p411_p11), %v7086_v48 }
 0x4b7   : >> { %v4666_v55 = vadd.f32 %v4665_v9, %v4660_v53  ;;  %v4764_v11 = vpop.permute.xlu1 %4763  ;;  %v4770_v51 = vpop.permute.xlu0 %4769  ;;  %6492 = vmatprep.subr.bf16.mxu1 (%p411_p11), %v7089_v21  ;;  %6475 = vmatpush3.bf16.msra.mxu0 (%p411_p11), %v7096_v34 }
 0x4b8   : >> { %v4766_v6 = vsel %vm2063_vm14, 0.0, %v4764_v11  ;;  %v4772_v32 = vsel %vm4318_vm1, 0.0, %v4770_v51  ;;  %6476 = vmatprep.subr.bf16.mxu0 (%p411_p11), %v7099_v49 }
 0x4b9   : >> { %v4786_v31 = vcombine.low %v4553_v60, %v4666_v55  ;;  %v4767_v15 = vadd.f32 %v4766_v6, %v4761_v0 }
 0x4ba   : > { %6493 = vmatpush3.bf16.msra.mxu1 (%p411_p11), %v7090_v10 }
 0x4bb   : >> { %v4800_v27 = vrot.slane %v4786_v31, %v4792_v30  ;;  %v4773_v22 = vadd.f32 %v4772_v32, %v4767_v15  ;;  %v4776_v5 = vpop.permute.xlu1 %4775  ;;  %6494 = vmatprep.subr.bf16.mxu1 (%p411_p11), %v7093_v1  ;;  %6477 = vmatpush3.bf16.msra.mxu0 (%p411_p11), %v7100_v61 }
 0x4bc   : >> { %v4778_v3 = vsel %vm4325_vm2, 0.0, %v4776_v5  ;;  %6478 = vmatprep.subr.bf16.mxu0 (%p411_p11), %v7103_v17 }
 0x4bd   : >> { %v4808_v41 = vcombine.low %v4793_v58, %v4800_v27  ;;  %v4779_v56 = vadd.f32 %v4778_v3, %v4773_v22  ;;  %v10145_v27 = vmov (%p411_p11), 0.0  }
 0x4be   : > { %6495 = vmatpush3.bf16.msra.mxu1 (%p411_p11), %v7094_v29 }
 0x4bf   : >> { %v4807_v4 = vrot.slane %v4779_v56, %v4792_v30  ;;  %v4815_v20 = vrot.slane %v4808_v41, %v4792_v30  ;;  %6496 = vmatprep.subr.bf16.mxu1 (%p411_p11), %v7097_v50  ;;  %6479 = vmatpush3.bf16.msra.mxu0 (%p411_p11), %v7104_v16  ;;  %v7106_v56 = vld [vmem:[%s9918_s5 + $0x80] sm:$0xff] (%p411_p11)  }
 0x4c0   : > { %6867 = vmatprep.subr.bf16.mxu0 (%p411_p11), %v10145_v27 }
 0x4c1   : >> { %v4822_v44 = vrot.slane %v4807_v4, %v4792_v30  ;;  %413 = sbr.rel (!%p411_p11) target bundleno = 36 (0x24), region = 112 }
 0x4c2   : > { %6497 = vmatpush3.bf16.msra.mxu1 (%p411_p11), %v7098_v25 }
 0x4c3   : >> { %v4823_v52 = vcombine.low %v4815_v20, %v4822_v44  ;;  %6498 = vmatprep.subr.bf16.mxu1 (%p411_p11), %v7101_v57 }
 0x4c5   : >> { %4831 = vst.msk [vmem:[%s4826_s14] sm:$0x1f] %vm4829_vm3, %v4823_v52  ;;  %s5943_s14 = sshll.u32 (%p411_p11), %s10146_s16, 4  ;;  %s9870_s14 = int_to_ptr.vmem [resolvable:$true] %s5943_s14 }
 0x4c6   : > { %6499 = vmatpush3.bf16.msra.mxu1 %v7102_v18  ;;  %s7131_s30 = scalar_lea.vmem %s9870_s14, 128  ;;  %p7138_p1 = scmp.lt.s32.totalorder %s9870_s14, %s7136_s13 }
 0x4c7   : > { %6500 = vmatprep.subr.bf16.mxu1 %v7105_v59  ;;  %p7132_p12 = scmp.ne.s32.totalorder %s9870_s14, %s7131_s30  ;;  %p7139_p2 = scmp.lt.s32.totalorder %s7137_s24, %s7131_s30 }
 0x4c9   : > { %p7133_p13 = pnand %p7132_p12, %p7313_p5  ;;  %p7140_p3 = por %p7139_p2, %p7138_p1 }
 0x4ca   : > { %6501 = vmatpush3.bf16.msra.mxu1 %v7106_v56 }
 0x4cb   : > { %6887 = vmatprep.subr.bf16.mxu1 %v10145_v27  ;;  %p7134_p0 = pneg %p7133_p13 }
 0x4cc   : > { %v9625_v53 = vld [vmem:[#allocation5] sm:$0x1f]  ;;  %v9627_v42 = vld [vmem:[#allocation5 + $0x5] sm:$0x1f]  ;;  %v9629_v30 = vld [vmem:[#allocation5 + $0xa] sm:$0x1f] }
 0x4cd   : > { %v9631_v19 = vld [vmem:[#allocation5 + $0xf] sm:$0x1f]  ;;  %v9633_v9 = vld [vmem:[#allocation5 + $0x14] sm:$0x1f]  ;;  %v9635_v43 = vld [vmem:[#allocation5 + $0x19] sm:$0x1f]  ;;  %v4855_v60 = vrot.slane %v9625_v53, %v4854_v24  ;;  %v4875_v55 = vrot.slane %v9627_v42, %v4854_v24  ;;  %v4895_v0 = vrot.slane %v9629_v30, %v4854_v24  ;;  %v4851_v11 = vrot.slane %v9625_v53, %v9605_v33  ;;  %p7141_p4 = pnand %p7140_p3, %p7134_p0 }
 0x4ce   : > { %v9642_v51 = vld [vmem:[#allocation5 + $0x1e] sm:$0x1f]  ;;  %v9644_v6 = vld [vmem:[#allocation5 + $0x23] sm:$0x1f]  ;;  %v4915_v31 = vrot.slane %v9631_v19, %v4854_v24  ;;  %v4935_v15 = vrot.slane %v9633_v9, %v4854_v24  ;;  %v4955_v32 = vrot.slane %v9635_v43, %v4854_v24  ;;  %v4871_v58 = vrot.slane %v9627_v42, %v9605_v33 }
 0x4cf   : > { %v4975_v22 = vrot.slane %v9642_v51, %v4854_v24  ;;  %v4995_v5 = vrot.slane %v9644_v6, %v4854_v24  ;;  %v5049_v3 = vpack.c.bf16 %v4855_v60, %v4855_v60  ;;  %v5054_v41 = vpack.c.bf16 %v4875_v55, %v4875_v55 }
 0x4d0   : > { %v5059_v4 = vpack.c.bf16 %v4895_v0, %v4895_v0  ;;  %v5064_v20 = vpack.c.bf16 %v4915_v31, %v4915_v31  ;;  %v5069_v44 = vpack.c.bf16 %v4935_v15, %v4935_v15  ;;  %v5074_v26 = vpack.c.bf16 %v4955_v32, %v4955_v32 }
 0x4d1   : > { %v5079_v52 = vpack.c.bf16 %v4975_v22, %v4975_v22  ;;  %v5084_v14 = vpack.c.bf16 %v4995_v5, %v4995_v5  ;;  %v5216_v12 = vunpack.c.l.b16 %v5049_v3  ;;  %v5221_v28 = vunpack.c.l.b16 %v5054_v41 }
 0x4d2   : > { %v5226_v38 = vunpack.c.l.b16 %v5059_v4  ;;  %v5231_v36 = vunpack.c.l.b16 %v5064_v20  ;;  %v5236_v40 = vunpack.c.l.b16 %v5069_v44  ;;  %v5241_v2 = vunpack.c.l.b16 %v5074_v26 }
 0x4d3   : > { %v5246_v7 = vunpack.c.l.b16 %v5079_v52  ;;  %v5251_v54 = vunpack.c.l.b16 %v5084_v14  ;;  %v5276_v46 = vrot.slane %v5221_v28, 7  ;;  %v4891_v39 = vrot.slane %v9629_v30, %v9605_v33 }
 0x4d4   : > { %v5278_v48 = vrot.slane %v5226_v38, 6  ;;  %v5280_v47 = vrot.slane %v5231_v36, 5  ;;  %v5282_v8 = vrot.slane %v5236_v40, 4  ;;  %v5284_v21 = vrot.slane %v5241_v2, 3 }
 0x4d5   : > { %v5277_v10 = vsel %vm5256_vm4, %v5276_v46, %v5216_v12  ;;  %v5286_v13 = vrot.slane %v5246_v7, 2  ;;  %v5288_v37 = vrot.slane %v5251_v54, 1  ;;  %v4911_v1 = vrot.slane %v9631_v19, %v9605_v33 }
 0x4d6   : > { %v5279_v29 = vsel %vm5259_vm5, %v5278_v48, %v5277_v10  ;;  %v4931_v35 = vrot.slane %v9633_v9, %v9605_v33  ;;  %v4951_v34 = vrot.slane %v9635_v43, %v9605_v33  ;;  %v4971_v50 = vrot.slane %v9642_v51, %v9605_v33 }
 0x4d7   : > { %v5281_v25 = vsel %vm5262_vm6, %v5280_v47, %v5279_v29  ;;  %v4991_v49 = vrot.slane %v9644_v6, %v9605_v33  ;;  %v5048_v61 = vpack.c.bf16 %v4851_v11, %v4851_v11  ;;  %v5053_v57 = vpack.c.bf16 %v4871_v58, %v4871_v58 }
 0x4d8   : > { %v5283_v62 = vsel %vm5265_vm7, %v5282_v8, %v5281_v25  ;;  %v5058_v24 = vpack.c.bf16 %v4891_v39, %v4891_v39  ;;  %v5063_v18 = vpack.c.bf16 %v4911_v1, %v4911_v1  ;;  %v5068_v17 = vpack.c.bf16 %v4931_v35, %v4931_v35 }
 0x4d9   : > { %v5285_v16 = vsel %vm5268_vm8, %v5284_v21, %v5283_v62  ;;  %v5073_v59 = vpack.c.bf16 %v4951_v34, %v4951_v34  ;;  %v5078_v60 = vpack.c.bf16 %v4971_v50, %v4971_v50  ;;  %v5083_v55 = vpack.c.bf16 %v4991_v49, %v4991_v49 }
 0x4da   : > { %v5287_v0 = vsel %vm5271_vm9, %v5286_v13, %v5285_v16  ;;  %v5215_v31 = vunpack.c.l.b16 %v5048_v61  ;;  %v5220_v15 = vunpack.c.l.b16 %v5053_v57  ;;  %v5225_v32 = vunpack.c.l.b16 %v5058_v24 }
 0x4db   : > { %v5289_v22 = vsel %vm5274_vm10, %v5288_v37, %v5287_v0  ;;  %v5230_v33 = vunpack.c.l.b16 %v5063_v18  ;;  %v5235_v11 = vunpack.c.l.b16 %v5068_v17  ;;  %v5240_v58 = vunpack.c.l.b16 %v5073_v59 }
 0x4dc   : > { %v5333_v5 = vpack.c.b16 %v5289_v22, %v5289_v22  ;;  %v5245_v3 = vunpack.c.l.b16 %v5078_v60  ;;  %v5250_v41 = vunpack.c.l.b16 %v5083_v55  ;;  %v5255_v56 = vrot.slane %v5220_v15, 7 }
 0x4dd   : > { %v5258_v4 = vrot.slane %v5225_v32, 6  ;;  %v5261_v20 = vrot.slane %v5230_v33, 5  ;;  %v5264_v44 = vrot.slane %v5235_v11, 4  ;;  %v5267_v26 = vrot.slane %v5240_v58, 3 }
 0x4de   : > { %5614 = vmatprep.mubr.bf16.mxu0 %v5333_v5  ;;  %v5257_v52 = vsel %vm5256_vm4, %v5255_v56, %v5215_v31  ;;  %v5270_v14 = vrot.slane %v5245_v3, 2  ;;  %v5273_v12 = vrot.slane %v5250_v41, 1  ;;  %v4863_v28 = vrot.slane %v9625_v53, %v9611_v45  ;;  %v7108_v5 = vld [vmem:[%s9918_s5 + $0x130] sm:$0xff]  }
 0x4df   : > { %v5260_v38 = vsel %vm5259_vm5, %v5258_v4, %v5257_v52  ;;  %v4883_v36 = vrot.slane %v9627_v42, %v9611_v45  ;;  %v4903_v40 = vrot.slane %v9629_v30, %v9611_v45  ;;  %v4923_v2 = vrot.slane %v9631_v19, %v9611_v45 }
 0x4e0   : > { %v5263_v7 = vsel %vm5262_vm6, %v5261_v20, %v5260_v38  ;;  %v4943_v54 = vrot.slane %v9633_v9, %v9611_v45  ;;  %v4963_v46 = vrot.slane %v9635_v43, %v9611_v45  ;;  %v4983_v39 = vrot.slane %v9642_v51, %v9611_v45 }
 0x4e1   : > { %v5266_v48 = vsel %vm5265_vm7, %v5264_v44, %v5263_v7  ;;  %v5003_v47 = vrot.slane %v9644_v6, %v9611_v45  ;;  %v5051_v8 = vpack.c.bf16 %v4863_v28, %v4863_v28  ;;  %v5056_v21 = vpack.c.bf16 %v4883_v36, %v4883_v36  ;;  %v7107_v45 = vld [vmem:[%s9918_s5 + $0x138] sm:$0xff]  }
 0x4e2   : > { %v5269_v10 = vsel %vm5268_vm8, %v5267_v26, %v5266_v48  ;;  %v5061_v13 = vpack.c.bf16 %v4903_v40, %v4903_v40  ;;  %v5066_v37 = vpack.c.bf16 %v4923_v2, %v4923_v2  ;;  %v5071_v1 = vpack.c.bf16 %v4943_v54, %v4943_v54  ;;  %v7109_v54 = vld [vmem:[%s9918_s5 + $0x128] sm:$0xff]  }
 0x4e3   : > { %v5272_v29 = vsel %vm5271_vm9, %v5270_v14, %v5269_v10  ;;  %v5076_v35 = vpack.c.bf16 %v4963_v46, %v4963_v46  ;;  %v5081_v34 = vpack.c.bf16 %v4983_v39, %v4983_v39  ;;  %v5086_v50 = vpack.c.bf16 %v5003_v47, %v5003_v47 }
 0x4e4   : > { %v5275_v25 = vsel %vm5274_vm10, %v5273_v12, %v5272_v29  ;;  %v5218_v49 = vunpack.c.l.b16 %v5051_v8  ;;  %v5223_v61 = vunpack.c.l.b16 %v5056_v21  ;;  %v5228_v57 = vunpack.c.l.b16 %v5061_v13 }
 0x4e5   : > { %v5332_v62 = vpack.c.b16 %v5275_v25, %v5275_v25  ;;  %v5233_v24 = vunpack.c.l.b16 %v5066_v37  ;;  %v5238_v18 = vunpack.c.l.b16 %v5071_v1  ;;  %v5243_v17 = vunpack.c.l.b16 %v5076_v35 }
 0x4e6   : > { %v5248_v16 = vunpack.c.l.b16 %v5081_v34  ;;  %v5253_v59 = vunpack.c.l.b16 %v5086_v50  ;;  %v5304_v60 = vrot.slane %v5223_v61, 7  ;;  %v5306_v55 = vrot.slane %v5228_v57, 6 }
 0x4e7   : > { %5615 = vmatmul.mubr.bf16.vlgmr.msra.gmra.mxu0 %v5332_v62  ;;  %v5308_v0 = vrot.slane %v5233_v24, 5  ;;  %v5310_v31 = vrot.slane %v5238_v18, 4  ;;  %v5312_v15 = vrot.slane %v5243_v17, 3  ;;  %v4859_v32 = vrot.slane %v9625_v53, %v9617_v63 }
 0x4e8   : > { %v5305_v22 = vsel %vm5256_vm4, %v5304_v60, %v5218_v49  ;;  %v5314_v33 = vrot.slane %v5248_v16, 2  ;;  %v5316_v11 = vrot.slane %v5253_v59, 1  ;;  %6868 = vmatpush3.bf16.msra.mxu0 %v7107_v45  ;;  %v4879_v58 = vrot.slane %v9627_v42, %v9617_v63  ;;  %6883 = vmatprep.mubr.msk.bf16.mxu0 %vm7213_vm11, %v10145_v27  ;;  %v7110_v49 = vld [vmem:[%s9918_s5 + $0x120] sm:$0xff]  }
 0x4e9   : > { %v5307_v3 = vsel %vm5259_vm5, %v5306_v55, %v5305_v22  ;;  %v4899_v41 = vrot.slane %v9629_v30, %v9617_v63  ;;  %v4919_v56 = vrot.slane %v9631_v19, %v9617_v63  ;;  %v4939_v4 = vrot.slane %v9633_v9, %v9617_v63  ;;  %6869 = vmatprep.subr.bf16.mxu0 %v10145_v27 }
 0x4ea   : > { %v5309_v20 = vsel %vm5262_vm6, %v5308_v0, %v5307_v3  ;;  %v4959_v44 = vrot.slane %v9635_v43, %v9617_v63  ;;  %v4979_v26 = vrot.slane %v9642_v51, %v9617_v63  ;;  %v4999_v52 = vrot.slane %v9644_v6, %v9617_v63 }
 0x4eb   : > { %v5311_v14 = vsel %vm5265_vm7, %v5310_v31, %v5309_v20  ;;  %v5050_v12 = vpack.c.bf16 %v4859_v32, %v4859_v32  ;;  %v5055_v28 = vpack.c.bf16 %v4879_v58, %v4879_v58  ;;  %v5060_v38 = vpack.c.bf16 %v4899_v41, %v4899_v41 }
 0x4ec   : > { %v5313_v36 = vsel %vm5268_vm8, %v5312_v15, %v5311_v14  ;;  %v5065_v40 = vpack.c.bf16 %v4919_v56, %v4919_v56  ;;  %v5070_v2 = vpack.c.bf16 %v4939_v4, %v4939_v4  ;;  %v5075_v7 = vpack.c.bf16 %v4959_v44, %v4959_v44  ;;  %6870 = vmatpush3.bf16.msra.mxu0 %v7108_v5 }
 0x4ed   : > { %v5315_v46 = vsel %vm5271_vm9, %v5314_v33, %v5313_v36  ;;  %v5080_v39 = vpack.c.bf16 %v4979_v26, %v4979_v26  ;;  %v5085_v48 = vpack.c.bf16 %v4999_v52, %v4999_v52  ;;  %v5217_v63 = vunpack.c.l.b16 %v5050_v12  ;;  %6871 = vmatprep.subr.bf16.mxu0 %v10145_v27 }
 0x4ee   : > { %v5317_v47 = vsel %vm5274_vm10, %v5316_v11, %v5315_v46  ;;  %v5222_v8 = vunpack.c.l.b16 %v5055_v28  ;;  %v5227_v21 = vunpack.c.l.b16 %v5060_v38  ;;  %v5232_v10 = vunpack.c.l.b16 %v5065_v40  ;;  %v7113_v40 = vld [vmem:[%s9918_s5 + $0x108] sm:$0xff]  }
 0x4ef   : > { %v5335_v13 = vpack.c.b16 %v5317_v47, %v5317_v47  ;;  %v5237_v37 = vunpack.c.l.b16 %v5070_v2  ;;  %v5242_v1 = vunpack.c.l.b16 %v5075_v7  ;;  %v5247_v29 = vunpack.c.l.b16 %v5080_v39  ;;  %v7114_v47 = vld [vmem:[%s9918_s5 + $0x100] sm:$0xff]  }
 0x4f0   : > { %v5252_v35 = vunpack.c.l.b16 %v5085_v48  ;;  %v5290_v34 = vrot.slane %v5222_v8, 7  ;;  %v5292_v50 = vrot.slane %v5227_v21, 6  ;;  %v5294_v25 = vrot.slane %v5232_v10, 5  ;;  %6872 = vmatpush3.bf16.msra.mxu0 %v7109_v54 }
 0x4f1   : > { %5654 = vmatprep.mubr.bf16.mxu1 %v5335_v13  ;;  %v5296_v61 = vrot.slane %v5237_v37, 4  ;;  %v5298_v57 = vrot.slane %v5242_v1, 3  ;;  %v5300_v45 = vrot.slane %v5247_v29, 2  ;;  %6873 = vmatprep.subr.bf16.mxu0 %v10145_v27  ;;  %v4867_v62 = vrot.slane %v9625_v53, %v9623_v23  ;;  %v7115_v37 = vld [vmem:[%s9920_s7 + $0x38] sm:$0xff]   ;;  %v7116_v1 = vld [vmem:[%s9920_s7 + $0x30] sm:$0xff]   ;;  %v7117_v29 = vld [vmem:[%s9920_s7 + $0x28] sm:$0xff]  }
 0x4f2   : > { %v5291_v24 = vsel %vm5256_vm4, %v5290_v34, %v5217_v63  ;;  %v5302_v18 = vrot.slane %v5252_v35, 1  ;;  %v4887_v17 = vrot.slane %v9627_v42, %v9623_v23  ;;  %v4907_v16 = vrot.slane %v9629_v30, %v9623_v23  ;;  %v7111_v42 = vld [vmem:[%s9918_s5 + $0x118] sm:$0xff]   ;;  %v7118_v35 = vld [vmem:[%s9920_s7 + $0x20] sm:$0xff]  }
 0x4f3   : > { %v5293_v59 = vsel %vm5259_vm5, %v5292_v50, %v5291_v24  ;;  %v4927_v60 = vrot.slane %v9631_v19, %v9623_v23  ;;  %v4947_v55 = vrot.slane %v9633_v9, %v9623_v23  ;;  %v4967_v53 = vrot.slane %v9635_v43, %v9623_v23  ;;  %v7119_v34 = vld [vmem:[%s9920_s7 + $0x18] sm:$0xff]  }
 0x4f4   : > { %v5295_v0 = vsel %vm5262_vm6, %v5294_v25, %v5293_v59  ;;  %6874 = vmatpush3.bf16.msra.mxu0 %v7110_v49  ;;  %v4987_v30 = vrot.slane %v9642_v51, %v9623_v23  ;;  %v5007_v31 = vrot.slane %v9644_v6, %v9623_v23  ;;  %v5052_v19 = vpack.c.bf16 %v4867_v62, %v4867_v62  ;;  %v7112_v6 = vld [vmem:[%s9918_s5 + $0x110] sm:$0xff]   ;;  %v7123_v50 = vld [vmem:[%s9922_s9 + $0x38] sm:$0xff]   ;;  %v7126_v62 = vld [vmem:[%s9922_s9 + $0x20] sm:$0xff]  }
 0x4f5   : > { %v5297_v15 = vsel %vm5265_vm7, %v5296_v61, %v5295_v0  ;;  %6875 = vmatprep.subr.bf16.mxu0 %v10145_v27  ;;  %v5057_v9 = vpack.c.bf16 %v4887_v17, %v4887_v17  ;;  %v5062_v43 = vpack.c.bf16 %v4907_v16, %v4907_v16  ;;  %v5067_v32 = vpack.c.bf16 %v4927_v60, %v4927_v60  ;;  %v7120_v25 = vld [vmem:[%s9920_s7 + $0x10] sm:$0xff]   ;;  %v7121_v61 = vld [vmem:[%s9920_s7 + $0x8] sm:$0xff]   ;;  %v7127_v24 = vld [vmem:[%s9922_s9 + $0x18] sm:$0xff]  }
 0x4f6   : > { %v5299_v22 = vsel %vm5268_vm8, %v5298_v57, %v5297_v15  ;;  %v5072_v33 = vpack.c.bf16 %v4947_v55, %v4947_v55  ;;  %v5077_v11 = vpack.c.bf16 %v4967_v53, %v4967_v53  ;;  %v5082_v58 = vpack.c.bf16 %v4987_v30, %v4987_v30  ;;  %v7124_v49 = vld [vmem:[%s9922_s9 + $0x30] sm:$0xff]   ;;  %v7125_v57 = vld [vmem:[%s9922_s9 + $0x28] sm:$0xff]  }
 0x4f7   : > { %v5301_v5 = vsel %vm5271_vm9, %v5300_v45, %v5299_v22  ;;  %v5087_v3 = vpack.c.bf16 %v5007_v31, %v5007_v31  ;;  %v5219_v51 = vunpack.c.l.b16 %v5052_v19  ;;  %v5224_v41 = vunpack.c.l.b16 %v5057_v9  ;;  %v7122_v45 = vld [vmem:[%s9920_s7] sm:$0xff]  }
 0x4f8   : > { %v5303_v23 = vsel %vm5274_vm10, %v5302_v18, %v5301_v5  ;;  %6876 = vmatpush3.bf16.msra.mxu0 %v7111_v42  ;;  %v5229_v56 = vunpack.c.l.b16 %v5062_v43  ;;  %v5234_v4 = vunpack.c.l.b16 %v5067_v32  ;;  %v5239_v20 = vunpack.c.l.b16 %v5072_v33  ;;  %v7128_v18 = vld [vmem:[%s9922_s9 + $0x10] sm:$0xff]   ;;  %v6244_v42 = vld [vmem:[%s9919_s6] ss:$0 sm:$0xff] }
 0x4f9   : > { %v5334_v44 = vpack.c.b16 %v5303_v23, %v5303_v23  ;;  %6877 = vmatprep.subr.bf16.mxu0 %v10145_v27  ;;  %v5244_v26 = vunpack.c.l.b16 %v5077_v11  ;;  %v5249_v52 = vunpack.c.l.b16 %v5082_v58  ;;  %v5254_v14 = vunpack.c.l.b16 %v5087_v3  ;;  %v7129_v3 = vld [vmem:[%s9922_s9 + $0x8] sm:$0xff]  }
 0x4fa   : > { %v5318_v12 = vrot.slane %v5224_v41, 7  ;;  %v5320_v28 = vrot.slane %v5229_v56, 6  ;;  %v5322_v38 = vrot.slane %v5234_v4, 5  ;;  %v5324_v36 = vrot.slane %v5239_v20, 4  ;;  %v6285_v41 = vld [vmem:[%s9921_s8] ss:$0 sm:$0xff] }
 0x4fb   : > { %5655 = vmatmul.mubr.bf16.vlgmr.msra.gmra.mxu1 %v5334_v44  ;;  %v5326_v7 = vrot.slane %v5244_v26, 3  ;;  %v5328_v46 = vrot.slane %v5249_v52, 2  ;;  %v5330_v48 = vrot.slane %v5254_v14, 1 }
 0x4fc   : > { %6878 = vmatpush3.bf16.msra.mxu0 %v7112_v6  ;;  %v5319_v2 = vsel %vm5256_vm4, %v5318_v12, %v5219_v51  ;;  %6903 = vmatprep.mubr.msk.bf16.mxu1 %vm7213_vm11, %v10145_v27  ;;  %v7130_v51 = vld [vmem:[%s9922_s9] sm:$0xff]  }
 0x4fd   : > { %6879 = vmatprep.subr.bf16.mxu0 %v10145_v27  ;;  %v5321_v54 = vsel %vm5259_vm5, %v5320_v28, %v5319_v2  ;;  %6888 = vmatpush3.bf16.msra.mxu1 %v7115_v37 }
 0x4fe   : > { %v5323_v39 = vsel %vm5262_vm6, %v5322_v38, %v5321_v54  ;;  %6889 = vmatprep.subr.bf16.mxu1 %v10145_v27 }
 0x4ff   : > { %v5325_v63 = vsel %vm5265_vm7, %v5324_v36, %v5323_v39 }
 0x500   : > { %6880 = vmatpush3.bf16.msra.mxu0 %v7113_v40  ;;  %v5327_v8 = vsel %vm5268_vm8, %v5326_v7, %v5325_v63 }
 0x501   : > { %6881 = vmatprep.subr.bf16.mxu0 %v10145_v27  ;;  %v5329_v21 = vsel %vm5271_vm9, %v5328_v46, %v5327_v8  ;;  %6890 = vmatpush3.bf16.msra.mxu1 %v7116_v1 }
 0x502   : > { %v5331_v10 = vsel %vm5274_vm10, %v5330_v48, %v5329_v21  ;;  %6891 = vmatprep.subr.bf16.mxu1 %v10145_v27 }
 0x503   : > { %v5336_v13 = vpack.c.b16 %v5331_v10, %v5331_v10 }
 0x504   : > { %6882 = vmatpush3.bf16.msra.mxu0 %v7114_v47 }
 0x505   : > { %6907 = vmatprep.subr.bf16.mxu0 %v10145_v27  ;;  %6892 = vmatpush3.bf16.msra.mxu1 %v7117_v29 }
 0x506   : > { %6893 = vmatprep.subr.bf16.mxu1 %v10145_v27 }
 0x507   : > { %6884 = vmatmul.mubr.bf16.vlgmr.msra.gmra.mxu0 %v5336_v13 }
 0x508   : > { %6923 = vmatprep.mubr.msk.bf16.mxu0 %vm7213_vm11, %v10145_v27  ;;  %6908 = vmatpush3.bf16.msra.mxu0 %v7123_v50 }
 0x509   : > { %6894 = vmatpush3.bf16.msra.mxu1 %v7118_v35  ;;  %6909 = vmatprep.subr.bf16.mxu0 %v10145_v27 }
 0x50a   : > { %6895 = vmatprep.subr.bf16.mxu1 %v10145_v27 }
 0x50c   : > { %6910 = vmatpush3.bf16.msra.mxu0 %v7124_v49 }
 0x50d   : > { %6896 = vmatpush3.bf16.msra.mxu1 %v7119_v34  ;;  %6911 = vmatprep.subr.bf16.mxu0 %v10145_v27 }
 0x50e   : > { %6897 = vmatprep.subr.bf16.mxu1 %v10145_v27 }
 0x510   : > { %6912 = vmatpush3.bf16.msra.mxu0 %v7125_v57 }
 0x511   : > { %6898 = vmatpush3.bf16.msra.mxu1 %v7120_v25  ;;  %6913 = vmatprep.subr.bf16.mxu0 %v10145_v27 }
 0x512   : > { %6899 = vmatprep.subr.bf16.mxu1 %v10145_v27 }
 0x514   : > { %6914 = vmatpush3.bf16.msra.mxu0 %v7126_v62 }
 0x515   : > { %6900 = vmatpush3.bf16.msra.mxu1 %v7121_v61  ;;  %6915 = vmatprep.subr.bf16.mxu0 %v10145_v27 }
 0x516   : > { %6901 = vmatprep.subr.bf16.mxu1 %v10145_v27 }
 0x518   : > { %6916 = vmatpush3.bf16.msra.mxu0 %v7127_v24 }
 0x519   : > { %6902 = vmatpush3.bf16.msra.mxu1 %v7122_v45  ;;  %6917 = vmatprep.subr.bf16.mxu0 %v10145_v27 }
 0x51c   : > { %6918 = vmatpush3.bf16.msra.mxu0 %v7128_v18 }
 0x51d   : > { %6919 = vmatprep.subr.bf16.mxu0 %v10145_v27 }
 0x520   : > { %6920 = vmatpush3.bf16.msra.mxu0 %v7129_v3 }
 0x521   : > { %6921 = vmatprep.subr.bf16.mxu0 %v10145_v27  ;;  %v6294_v27 = vld [vmem:[%s9923_s10] ss:$0 sm:$0xff] }
 0x524   : > { %6922 = vmatpush3.bf16.msra.mxu0 %v7130_v51 }
 0x5a7   : > { %v6480_v17 = vpop.f32.mrf.mxu0 }
 0x5a9   : > { %v6481_v16 = vpop.f32.mrf.mxu0 }
 0x5aa   : > { %v6482_v0 = vadd.f32 %v6481_v16, %v6480_v17 }
 0x5ab   : > { %v6483_v59 = vpop.f32.mrf.mxu0 }
 0x5ac   : > { %v5617_v19 = vadd.f32 %v6482_v0, %v6244_v42 }
 0x5ad   : > { %v6484_v60 = vpop.f32.mrf.mxu0 }
 0x5bb   : > { %v6502_v55 = vpop.f32.mrf.mxu1 }
 0x5bd   : > { %v6503_v53 = vpop.f32.mrf.mxu1 }
 0x5be   : > { %v6504_v15 = vadd.f32 %v6503_v53, %v6502_v55 }
 0x5bf   : > { %v6505_v30 = vpop.f32.mrf.mxu1 }
 0x5c0   : > { %v5657_v9 = vadd.f32 %v6504_v15, %v5617_v19 }
 0x5c1   : > { %v6506_v31 = vpop.f32.mrf.mxu1 }
 0x5c7   : > { %v5696_v43 = vpop.f32.mrf.mxu0 }
 0x5c8   : > { %v5697_v32 = vadd.f32 %v5696_v43, %v5657_v9 }
 0x5c9   : > { %v6885_v22 = vpop.f32.mrf.mxu0 }
 0x5ca   : > { %v5702_v33 = vmax.f32 %v5697_v32, 0.0 }
 0x5cb   : > { %v5699_v11 = vpop.f32.mrf.mxu0 }
 0x5cc   : > { %v5703_v58 = vpack.c.bf16 %v5702_v33, %v5702_v33 }
 0x5cd   : > { %v6886_v5 = vpop.f32.mrf.mxu0 }
 0x5ce   : > { %6904 = vmatmul.mubr.bf16.vlgmr.msra.gmra.mxu1 %v5703_v58 }
 0x68e   : > { %v5809_v23 = vpop.f32.mrf.mxu1 }
 0x68f   : > { %v5810_v6 = vadd.f32 %v6285_v41, %v5809_v23 }
 0x690   : > { %v6905_v56 = vpop.f32.mrf.mxu1 }
 0x691   : > { %v5815_v4 = vmax.f32 %v5810_v6, 0.0 }
 0x692   : > { %v5812_v20 = vpop.f32.mrf.mxu1 }
 0x693   : > { %v5816_v44 = vpack.c.bf16 %v5815_v4, %v5815_v4 }
 0x694   : > { %v6906_v26 = vpop.f32.mrf.mxu1 }
 0x695   : > { %6924 = vmatmul.mubr.bf16.vlgmr.msra.gmra.mxu0 %v5816_v44 }
 0x755   : > { %v5922_v52 = vpop.f32.mrf.mxu0 }
 0x756   : > { %v5923_v14 = vadd.f32 %v6294_v27, %v5922_v52 }
 0x757   : > { %v6925_v12 = vpop.f32.mrf.mxu0 }
 0x758   : > { %5928 = vst [vmem:[%s10147_s25] sm:$0xff] %v5923_v14 }
 0x759   : > { %v5925_v28 = vpop.f32.mrf.mxu0 }
 0x75a   : > { %7144 = shalt.err (!%p7141_p4)
}
 0x75b   : > { %s7145_s12 = scalar_lea.hbm %s9868_s15, 128  ;;  %s7149_s22 = scalar_lea.hbm %s9924_s11, 256 }
 0x75c   : > { %p7146_p7 = scmp.ne.s32.totalorder %s9868_s15, %s7145_s12  ;;  %p7150_p10 = scmp.lt.s32.totalorder %s9868_s15, %s9924_s11 }
 0x75d   : > { %p7151_p11 = scmp.lt.s32.totalorder %s7149_s22, %s7145_s12 }
 0x75e   : > { %p7147_p8 = pnand %p7146_p7, %p7313_p5 }
 0x75f   : > { %p7152_p12 = por %p7151_p11, %p7150_p10 }
 0x760   : > { %p7148_p9 = pneg %p7147_p8 }
 0x762   : > { %p7153_p13 = pnand %p7152_p12, %p7148_p9 }
 0x764   : > { %7156 = shalt.err (!%p7153_p13)
}
 0x765   : > { %6928 = dma.vmem_to_hbm [thread:$0]  (%p7313_p5), %s9870_s14, 128, %s9868_s15, %s5930_s21   ;;  %v6926_v38 = vpop.f32.mrf.mxu0 }
 0x766 PF: > { %p6934_p0 = scmp.ge.s32.totalorder %s7195_s20, 2  ;;  %s5955_s30 = sand.u32 1, %s7183_s17  }
 0x767   : > { %s5956_s29 = scalar_lea.sflag [#allocation7], %s5955_s30 }
 0x768   : > { %p6931_p1 = pnand %p6934_p0, %p7317_p6 }
 0x76a   : > { %p6932_p2 = pneg %p6931_p1 }
 0x76c   : > { %7178 = dma.done.wait (%p6932_p2), %s5956_s29, 128  }
 0x76d   : > { %7180 = vsyncadd (%p6932_p2), %s5956_s29, 4294967168  ;;  %s10149_s27 = sld [smem:[#allocation9_spill]]  ;;  %p21_p3 = scmp.ge.s32.totalorder %s7300_s23, 4  }
 0x76e   : > { %s10150_s17 = smov %s7187_s18  ;;  %s10151_s18 = smov %s7191_s19 }
 0x76f   : > { %s10153_s20 = smov %s7300_s23  ;;  %23 = sbr.rel (!%p21_p3) target bundleno = 5 (0x5), region = 123 }
 0x773   : > { %s10152_s19 = smov %s10149_s27 }
 0x774   :  { %5961 = vsyncpa [#allocation7], 1 }
 0x775   :  { %5963 = vsyncpa [#allocation7 + $0x1], 1 }

</bundles_post_ra>
